<compile_context>
chip_gen: v5e
topology: v5e:2x2
jax: 0.10.0
libtpu: 0.0.40
codegen_flags: <defaults>
</compile_context>

<pallas_src>
import functools

import jax
import jax.numpy as jnp
from jax import lax
from jax.experimental import pallas as pl
from jax.experimental.pallas import tpu as pltpu

STATE_SIZE = 24
ACTION_SIZE = 4
HIDDEN_SIZE = 64

# Lane/sublane-aligned padded sizes (zero-filled once on the host).
STATE_PAD = 32            # 24  -> 32   (bf16 sublane tile for w_ih, aligned K)
HIDDEN_PAD = 128          # 64  -> 128  (one vreg per gate)
FC1, FC1_PAD = 400, 512   # 400 -> 512
FC2, FC2_PAD = 300, 384   # 300 -> 384
ACTION_PAD = 128          # 4   -> 128  (lane-dense output store)


def _actor_kernel(x_ref, wih_ref, whh_ref, b_ref,
                  w1_hbm, b1_ref, w2_hbm, b2_ref, w3_hbm, b3_ref,
                  out_ref,
                  pre_ref, w1_vmem, w2_vmem, w3_vmem, dma_sem,
                  *, seq_len, batch):
    """LSTM over seq_len steps -> fc1/relu -> fc2/relu -> fc3/tanh (padded)."""
    T, B = seq_len, batch
    Hp = whh_ref.shape[0]                     # 128 (padded hidden)

    # ---- Kick off the MLP-head weight DMAs (HBM -> VMEM scratch) immediately
    # ---- so they hide behind the serial LSTM recurrence.
    cp1 = pltpu.make_async_copy(w1_hbm, w1_vmem, dma_sem.at[0]); cp1.start()
    cp2 = pltpu.make_async_copy(w2_hbm, w2_vmem, dma_sem.at[1]); cp2.start()
    cp3 = pltpu.make_async_copy(w3_hbm, w3_vmem, dma_sem.at[2]); cp3.start()

    # ---- Hoisted input projection + bias for ALL timesteps in one MXU pass.
    # ---- Stored to VMEM scratch so it is NOT a 32-vreg SSA value kept live
    # ---- across the whole recurrence (x is time-major: row t*B + b).
    pre_ref[...] = (jnp.dot(x_ref[...], wih_ref[...],
                            preferred_element_type=jnp.float32)
                    + b_ref[...]).reshape(T, B, 4 * Hp)

    def sigmoid(v):
        # tanh form: one EUP push + cheap VPU fma (vs exp + reciprocal).
        return 0.5 * jnp.tanh(0.5 * v) + 0.5

    def step(t, carry):
        h, c = carry
        # One step's precomputed gate slab (B, 4Hp) + recurrent contribution.
        # whh_ref is read inside the loop body so its live range is per-step.
        gates = pre_ref[t] + jnp.dot(h.astype(jnp.bfloat16), whh_ref[...],
                                     preferred_element_type=jnp.float32)
        # PyTorch gate order: input, forget, cell(g), output. Each slice = 1 vreg.
        i_g = sigmoid(gates[:, 0 * Hp:1 * Hp])
        f_g = sigmoid(gates[:, 1 * Hp:2 * Hp])
        g_g = jnp.tanh(gates[:, 2 * Hp:3 * Hp])
        o_g = sigmoid(gates[:, 3 * Hp:4 * Hp])
        c_new = f_g * c + i_g * g_g
        h_new = o_g * jnp.tanh(c_new)
        return h_new, c_new

    h0 = jnp.zeros((B, Hp), jnp.float32)
    c0 = jnp.zeros((B, Hp), jnp.float32)
    h, _ = lax.fori_loop(0, T, step, (h0, c0), unroll=True)

    # ---- MLP head on the last LSTM output (out[:, -1, :] == h).
    # ---- Staggered DMA waits: each weight only has to land right before use.
    cp1.wait()
    x1 = jnp.maximum(
        jnp.dot(h.astype(jnp.bfloat16), w1_vmem[...],
                preferred_element_type=jnp.float32) + b1_ref[...], 0.0)     # (B, 512)
    cp2.wait()
    x2 = jnp.maximum(
        jnp.dot(x1.astype(jnp.bfloat16), w2_vmem[...],
                preferred_element_type=jnp.float32) + b2_ref[...], 0.0)     # (B, 384)
    cp3.wait()
    out_ref[...] = jnp.tanh(
        jnp.dot(x2.astype(jnp.bfloat16), w3_vmem[...],
                preferred_element_type=jnp.float32) + b3_ref[...])          # (B, 128)


@jax.jit
def actor_single(state, params):
    """tanh(fc3(relu(fc2(relu(fc1(lstm(state)[:, -1])))))) via one Pallas kernel."""
    B, T, S = state.shape
    Bp = ((B + 7) // 8) * 8                   # pad batch to sublane multiple

    # Layout plumbing (fused by XLA inside this jit): time-major, batch/state
    # zero-padded, flattened, cast to bf16 so the kernel DMA is half-size.
    x = jnp.transpose(state, (1, 0, 2))                         # (T, B, S)
    x = jnp.pad(x, ((0, 0), (0, Bp - B), (0, STATE_PAD - S)))   # (T, Bp, Sp)
    x = x.reshape(T * Bp, STATE_PAD).astype(jnp.bfloat16)       # (T*Bp, Sp)

    vmem = pl.BlockSpec(memory_space=pltpu.MemorySpace.VMEM)
    anyspace = pl.BlockSpec(memory_space=pl.ANY)
    args = (x,
            params["w_ih"], params["w_hh"], params["b_lstm"],
            params["w1"], params["b1"],
            params["w2"], params["b2"],
            params["w3"], params["b3"])
    in_specs = [vmem, vmem, vmem, vmem,
                anyspace, vmem, anyspace, vmem, anyspace, vmem]

    flops = 2 * (T * Bp * STATE_PAD * 4 * HIDDEN_PAD          # input projection
                 + T * Bp * HIDDEN_PAD * 4 * HIDDEN_PAD       # recurrence
                 + Bp * HIDDEN_PAD * FC1_PAD
                 + Bp * FC1_PAD * FC2_PAD
                 + Bp * FC2_PAD * ACTION_PAD)
    transcendentals = T * 5 * Bp * HIDDEN_PAD + Bp * ACTION_PAD
    bytes_accessed = (sum(int(a.size) * a.dtype.itemsize for a in args)
                      + Bp * ACTION_PAD * 4)

    out_padded = pl.pallas_call(
        functools.partial(_actor_kernel, seq_len=T, batch=Bp),
        out_shape=jax.ShapeDtypeStruct((Bp, ACTION_PAD), jnp.float32),
        in_specs=in_specs,
        out_specs=vmem,
        scratch_shapes=[
            pltpu.VMEM((T, Bp, 4 * HIDDEN_PAD), jnp.float32),   # pre-gates
            pltpu.VMEM((HIDDEN_PAD, FC1_PAD), jnp.bfloat16),    # w1 landing buf
            pltpu.VMEM((FC1_PAD, FC2_PAD), jnp.bfloat16),       # w2 landing buf
            pltpu.VMEM((FC2_PAD, ACTION_PAD), jnp.bfloat16),    # w3 landing buf
            pltpu.SemaphoreType.DMA((3,)),
        ],
        cost_estimate=pl.CostEstimate(flops=flops,
                                      transcendentals=transcendentals,
                                      bytes_accessed=bytes_accessed),
    )(*args)
    return out_padded[:B, :ACTION_SIZE]


def actor_forward(state, params, timesteps=None, action=None, single=False):
    """Mirrors Actor.forward. The hot path (LSTM + MLP) runs in the Pallas kernel."""
    act = actor_single(state, params)
    if single:
        return act
    # Non-single branch of the original module: the `return` sits inside the
    # loop, so only i == 0 is ever processed before returning. Reproduced with
    # traced indices (no host sync) via dynamic_update_slice + where guard.
    output = jnp.asarray(action, jnp.float32)
    t_next = timesteps[0].astype(jnp.int32) + 1
    updated = jax.lax.dynamic_update_slice(
        output, act[0].reshape(1, 1, -1), (0, t_next, 0))
    return jnp.where(t_next < output.shape[1], updated, output)


def init_params(key):
    """Deterministic synthetic init matching the PyTorch parameter shapes,
    transposed / zero-padded to the lane-aligned kernel layout."""
    ks = jax.random.split(key, 9)

    def uniform(k, shape, fan_in):
        bound = 1.0 / jnp.sqrt(jnp.float32(fan_in))
        return jax.random.uniform(k, shape, jnp.float32, -bound, bound)

    H, S, Hp, Sp = HIDDEN_SIZE, STATE_SIZE, HIDDEN_PAD, STATE_PAD

    # ---- LSTM params (PyTorch shapes: (4H, S), (4H, H), (4H,), (4H,)).
    w_ih_pt = uniform(ks[0], (4 * H, S), H)
    w_hh_pt = uniform(ks[1], (4 * H, H), H)
    b_ih = uniform(ks[2], (4 * H,), H)
    b_hh = jnp.full((4 * H,), -0.2, jnp.float32)     # .bias_hh_l0.data.fill_(-0.2)
    b_raw = (b_ih + b_hh).reshape(1, 4 * H)

    def pad_gate_cols(w_t):
        # (in, 4H) -> (in, 4Hp): zero-pad each gate block to Hp columns, so the
        # padded hidden/cell lanes stay exactly zero through the recurrence.
        parts = [w_t[:, k * H:(k + 1) * H] for k in range(4)]
        return jnp.concatenate(
            [jnp.pad(p, ((0, 0), (0, Hp - H))) for p in parts], axis=1)

    w_ih = pad_gate_cols(jnp.pad(w_ih_pt.T, ((0, Sp - S), (0, 0)))
                         ).astype(jnp.bfloat16)                           # (Sp, 4Hp)
    w_hh = pad_gate_cols(jnp.pad(w_hh_pt.T, ((0, Hp - H), (0, 0)))
                         ).astype(jnp.bfloat16)                           # (Hp, 4Hp)
    b_lstm = pad_gate_cols(b_raw)                                         # (1, 4Hp) f32

    # ---- MLP head (PyTorch shapes: (400,64), (300,400), (4,300) + biases).
    w1_pt = uniform(ks[3], (FC1, H), H)
    b1_pt = uniform(ks[4], (FC1,), H)
    w2_pt = uniform(ks[5], (FC2, FC1), FC1)
    b2_pt = uniform(ks[6], (FC2,), FC1)
    w3_pt = uniform(ks[7], (ACTION_SIZE, FC2), FC2)
    b3_pt = uniform(ks[8], (ACTION_SIZE,), FC2)

    w1 = jnp.pad(w1_pt.T, ((0, Hp - H), (0, FC1_PAD - FC1))).astype(jnp.bfloat16)
    b1 = jnp.pad(b1_pt, (0, FC1_PAD - FC1)).reshape(1, FC1_PAD)
    w2 = jnp.pad(w2_pt.T, ((0, FC1_PAD - FC1), (0, FC2_PAD - FC2))).astype(jnp.bfloat16)
    b2 = jnp.pad(b2_pt, (0, FC2_PAD - FC2)).reshape(1, FC2_PAD)
    w3 = jnp.pad(w3_pt.T, ((0, FC2_PAD - FC2), (0, ACTION_PAD - ACTION_SIZE))
                 ).astype(jnp.bfloat16)
    b3 = jnp.pad(b3_pt, (0, ACTION_PAD - ACTION_SIZE)).reshape(1, ACTION_PAD)

    return dict(w_ih=w_ih, w_hh=w_hh, b_lstm=b_lstm,
                w1=w1, b1=b1, w2=w2, b2=b2, w3=w3, b3=b3)


if __name__ == "__main__":
    key = jax.random.PRNGKey(0)
    k_state, k_param, k_act = jax.random.split(key, 3)

    B, T = 2, 8
    state = jax.random.normal(k_state, (B, T, STATE_SIZE), jnp.float32)
    params = init_params(k_param)

    # single=True path (pure kernel output)
    out_single = actor_forward(state, params, single=True)
    out_single = jax.block_until_ready(out_single)
    assert out_single.shape == (B, ACTION_SIZE)
    assert bool(jnp.all(jnp.isfinite(out_single)))
    assert bool(jnp.all(jnp.abs(out_single) <= 1.0))

    # non-single path (replicates the original module's early-return behaviour)
    action = jax.random.normal(k_act, (B, 6, ACTION_SIZE), jnp.float32)
    timesteps = jnp.array([2, 3], jnp.int32)
    out_full = actor_forward(state, params, timesteps=timesteps,
                             action=action, single=False)
    out_full = jax.block_until_ready(out_full)
    assert out_full.shape == action.shape

    print("KERNEL_OK")
</pallas_src>

<mosaic_0001>
module attributes {stable_mosaic.version = 11 : i64} {
  func.func @_actor_kernel(%arg0: memref<64x32xbf16, #tpu.memory_space<vmem>>, %arg1: memref<32x512xbf16, #tpu.memory_space<vmem>>, %arg2: memref<128x512xbf16, #tpu.memory_space<vmem>>, %arg3: memref<1x512xf32, #tpu.memory_space<vmem>>, %arg4: memref<128x512xbf16, #tpu.memory_space<any>>, %arg5: memref<1x512xf32, #tpu.memory_space<vmem>>, %arg6: memref<512x384xbf16, #tpu.memory_space<any>>, %arg7: memref<1x384xf32, #tpu.memory_space<vmem>>, %arg8: memref<384x128xbf16, #tpu.memory_space<any>>, %arg9: memref<1x128xf32, #tpu.memory_space<vmem>>, %arg10: memref<8x128xf32, #tpu.memory_space<vmem>>, %arg11: memref<8x8x512xf32, #tpu.memory_space<vmem>>, %arg12: memref<128x512xbf16, #tpu.memory_space<vmem>>, %arg13: memref<512x384xbf16, #tpu.memory_space<vmem>>, %arg14: memref<384x128xbf16, #tpu.memory_space<vmem>>, %arg15: memref<3x!tpu.dma_semaphore, #tpu.memory_space<semaphore_mem>>) attributes {dimension_semantics = [], scalar_prefetch = 0 : i64, scratch_operands = 5 : i64, tpu.core_type = #tpu.core_type<tc>} {
    %c0_i32 = arith.constant 0 : i32
    %0 = tpu.memref_slice %arg15[%c0_i32] : memref<3x!tpu.dma_semaphore, #tpu.memory_space<semaphore_mem>> -> memref<1x!tpu.dma_semaphore, #tpu.memory_space<semaphore_mem>>
    %1 = tpu.memref_squeeze %0 : memref<1x!tpu.dma_semaphore, #tpu.memory_space<semaphore_mem>> -> memref<!tpu.dma_semaphore, #tpu.memory_space<semaphore_mem>>
    tpu.enqueue_dma source(%arg4 : memref<128x512xbf16, #tpu.memory_space<any>>) target(%arg12 : memref<128x512xbf16, #tpu.memory_space<vmem>>) target_semaphore(%1 : memref<!tpu.dma_semaphore, #tpu.memory_space<semaphore_mem>>)
    %c1_i32 = arith.constant 1 : i32
    %2 = tpu.memref_slice %arg15[%c1_i32] : memref<3x!tpu.dma_semaphore, #tpu.memory_space<semaphore_mem>> -> memref<1x!tpu.dma_semaphore, #tpu.memory_space<semaphore_mem>>
    %3 = tpu.memref_squeeze %2 : memref<1x!tpu.dma_semaphore, #tpu.memory_space<semaphore_mem>> -> memref<!tpu.dma_semaphore, #tpu.memory_space<semaphore_mem>>
    tpu.enqueue_dma source(%arg6 : memref<512x384xbf16, #tpu.memory_space<any>>) target(%arg13 : memref<512x384xbf16, #tpu.memory_space<vmem>>) target_semaphore(%3 : memref<!tpu.dma_semaphore, #tpu.memory_space<semaphore_mem>>)
    %c2_i32 = arith.constant 2 : i32
    %4 = tpu.memref_slice %arg15[%c2_i32] : memref<3x!tpu.dma_semaphore, #tpu.memory_space<semaphore_mem>> -> memref<1x!tpu.dma_semaphore, #tpu.memory_space<semaphore_mem>>
    %5 = tpu.memref_squeeze %4 : memref<1x!tpu.dma_semaphore, #tpu.memory_space<semaphore_mem>> -> memref<!tpu.dma_semaphore, #tpu.memory_space<semaphore_mem>>
    tpu.enqueue_dma source(%arg8 : memref<384x128xbf16, #tpu.memory_space<any>>) target(%arg14 : memref<384x128xbf16, #tpu.memory_space<vmem>>) target_semaphore(%5 : memref<!tpu.dma_semaphore, #tpu.memory_space<semaphore_mem>>)
    %c0 = arith.constant 0 : index
    %c0_0 = arith.constant 0 : index
    %6 = vector.load %arg0[%c0, %c0_0] : memref<64x32xbf16, #tpu.memory_space<vmem>>, vector<64x32xbf16>
    %c0_1 = arith.constant 0 : index
    %c0_2 = arith.constant 0 : index
    %7 = vector.load %arg1[%c0_1, %c0_2] : memref<32x512xbf16, #tpu.memory_space<vmem>>, vector<32x512xbf16>
    %cst = arith.constant dense<0.000000e+00> : vector<64x512xf32>
    %8 = tpu.matmul %6, %7, %cst {dimension_numbers = #tpu.dot_dimension_numbers<[1], [0], [0], [1], [0, 0, 1, 1], [], []>} : vector<64x32xbf16>, vector<32x512xbf16>, vector<64x512xf32> -> vector<64x512xf32>
    %c0_3 = arith.constant 0 : index
    %c0_4 = arith.constant 0 : index
    %9 = vector.load %arg3[%c0_3, %c0_4] : memref<1x512xf32, #tpu.memory_space<vmem>>, vector<1x512xf32>
    %10 = vector.broadcast %9 : vector<1x512xf32> to vector<64x512xf32>
    %11 = arith.addf %8, %10 : vector<64x512xf32>
    %12 = vector.shape_cast %11 : vector<64x512xf32> to vector<8x8x512xf32>
    %c0_5 = arith.constant 0 : index
    %c0_6 = arith.constant 0 : index
    %c0_7 = arith.constant 0 : index
    %13 = vector.load %arg11[%c0_5, %c0_6, %c0_7] : memref<8x8x512xf32, #tpu.memory_space<vmem>>, vector<8x8x512xf32>
    tpu.vector_store %arg11[%c0_5, %c0_6, %c0_7], %12 {strides = array<i32>} : memref<8x8x512xf32, #tpu.memory_space<vmem>>, vector<8x8x512xf32>,
    %cst_8 = arith.constant 0.000000e+00 : f32
    %14 = vector.broadcast %cst_8 : f32 to vector<8x128xf32>
    %cst_9 = arith.constant 0.000000e+00 : f32
    %15 = vector.broadcast %cst_9 : f32 to vector<8x128xf32>
    %c0_i32_10 = arith.constant 0 : i32
    %16 = arith.index_cast %c0_i32_10 : i32 to index
    %c0_11 = arith.constant 0 : index
    %c0_12 = arith.constant 0 : index
    %17 = vector.load %arg11[%16, %c0_11, %c0_12] : memref<8x8x512xf32, #tpu.memory_space<vmem>>, vector<1x8x512xf32>
    %18 = vector.shape_cast %17 : vector<1x8x512xf32> to vector<8x512xf32>
    %19 = arith.truncf %14 : vector<8x128xf32> to vector<8x128xbf16>
    %c0_13 = arith.constant 0 : index
    %c0_14 = arith.constant 0 : index
    %20 = vector.load %arg2[%c0_13, %c0_14] : memref<128x512xbf16, #tpu.memory_space<vmem>>, vector<128x512xbf16>
    %cst_15 = arith.constant dense<0.000000e+00> : vector<8x512xf32>
    %21 = tpu.matmul %19, %20, %cst_15 {dimension_numbers = #tpu.dot_dimension_numbers<[1], [0], [0], [1], [0, 0, 1, 1], [], []>} : vector<8x128xbf16>, vector<128x512xbf16>, vector<8x512xf32> -> vector<8x512xf32>
    %22 = arith.addf %18, %21 : vector<8x512xf32>
    %23 = vector.extract_strided_slice %22 {offsets = [0, 0], sizes = [8, 128], strides = [1, 1]} : vector<8x512xf32> to vector<8x128xf32>
    %cst_16 = arith.constant 5.000000e-01 : f32
    %24 = vector.broadcast %cst_16 : f32 to vector<8x128xf32>
    %25 = arith.mulf %24, %23 : vector<8x128xf32>
    %26 = math.tanh %25 : vector<8x128xf32>
    %cst_17 = arith.constant 5.000000e-01 : f32
    %27 = vector.broadcast %cst_17 : f32 to vector<8x128xf32>
    %28 = arith.mulf %27, %26 : vector<8x128xf32>
    %cst_18 = arith.constant 5.000000e-01 : f32
    %29 = vector.broadcast %cst_18 : f32 to vector<8x128xf32>
    %30 = arith.addf %28, %29 : vector<8x128xf32>
    %31 = vector.extract_strided_slice %22 {offsets = [0, 128], sizes = [8, 128], strides = [1, 1]} : vector<8x512xf32> to vector<8x128xf32>
    %cst_19 = arith.constant 5.000000e-01 : f32
    %32 = vector.broadcast %cst_19 : f32 to vector<8x128xf32>
    %33 = arith.mulf %32, %31 : vector<8x128xf32>
    %34 = math.tanh %33 : vector<8x128xf32>
    %cst_20 = arith.constant 5.000000e-01 : f32
    %35 = vector.broadcast %cst_20 : f32 to vector<8x128xf32>
    %36 = arith.mulf %35, %34 : vector<8x128xf32>
    %cst_21 = arith.constant 5.000000e-01 : f32
    %37 = vector.broadcast %cst_21 : f32 to vector<8x128xf32>
    %38 = arith.addf %36, %37 : vector<8x128xf32>
    %39 = vector.extract_strided_slice %22 {offsets = [0, 256], sizes = [8, 128], strides = [1, 1]} : vector<8x512xf32> to vector<8x128xf32>
    %40 = math.tanh %39 : vector<8x128xf32>
    %41 = vector.extract_strided_slice %22 {offsets = [0, 384], sizes = [8, 128], strides = [1, 1]} : vector<8x512xf32> to vector<8x128xf32>
    %cst_22 = arith.constant 5.000000e-01 : f32
    %42 = vector.broadcast %cst_22 : f32 to vector<8x128xf32>
    %43 = arith.mulf %42, %41 : vector<8x128xf32>
    %44 = math.tanh %43 : vector<8x128xf32>
    %cst_23 = arith.constant 5.000000e-01 : f32
    %45 = vector.broadcast %cst_23 : f32 to vector<8x128xf32>
    %46 = arith.mulf %45, %44 : vector<8x128xf32>
    %cst_24 = arith.constant 5.000000e-01 : f32
    %47 = vector.broadcast %cst_24 : f32 to vector<8x128xf32>
    %48 = arith.addf %46, %47 : vector<8x128xf32>
    %49 = arith.mulf %38, %15 : vector<8x128xf32>
    %50 = arith.mulf %30, %40 : vector<8x128xf32>
    %51 = arith.addf %49, %50 : vector<8x128xf32>
    %52 = math.tanh %51 : vector<8x128xf32>
    %53 = arith.mulf %48, %52 : vector<8x128xf32>
    %c1_i32_25 = arith.constant 1 : i32
    %54 = arith.index_cast %c1_i32_25 : i32 to index
    %c0_26 = arith.constant 0 : index
    %c0_27 = arith.constant 0 : index
    %55 = vector.load %arg11[%54, %c0_26, %c0_27] : memref<8x8x512xf32, #tpu.memory_space<vmem>>, vector<1x8x512xf32>
    %56 = vector.shape_cast %55 : vector<1x8x512xf32> to vector<8x512xf32>
    %57 = arith.truncf %53 : vector<8x128xf32> to vector<8x128xbf16>
    %c0_28 = arith.constant 0 : index
    %c0_29 = arith.constant 0 : index
    %58 = vector.load %arg2[%c0_28, %c0_29] : memref<128x512xbf16, #tpu.memory_space<vmem>>, vector<128x512xbf16>
    %cst_30 = arith.constant dense<0.000000e+00> : vector<8x512xf32>
    %59 = tpu.matmul %57, %58, %cst_30 {dimension_numbers = #tpu.dot_dimension_numbers<[1], [0], [0], [1], [0, 0, 1, 1], [], []>} : vector<8x128xbf16>, vector<128x512xbf16>, vector<8x512xf32> -> vector<8x512xf32>
    %60 = arith.addf %56, %59 : vector<8x512xf32>
    %61 = vector.extract_strided_slice %60 {offsets = [0, 0], sizes = [8, 128], strides = [1, 1]} : vector<8x512xf32> to vector<8x128xf32>
    %cst_31 = arith.constant 5.000000e-01 : f32
    %62 = vector.broadcast %cst_31 : f32 to vector<8x128xf32>
    %63 = arith.mulf %62, %61 : vector<8x128xf32>
    %64 = math.tanh %63 : vector<8x128xf32>
    %cst_32 = arith.constant 5.000000e-01 : f32
    %65 = vector.broadcast %cst_32 : f32 to vector<8x128xf32>
    %66 = arith.mulf %65, %64 : vector<8x128xf32>
    %cst_33 = arith.constant 5.000000e-01 : f32
    %67 = vector.broadcast %cst_33 : f32 to vector<8x128xf32>
    %68 = arith.addf %66, %67 : vector<8x128xf32>
    %69 = vector.extract_strided_slice %60 {offsets = [0, 128], sizes = [8, 128], strides = [1, 1]} : vector<8x512xf32> to vector<8x128xf32>
    %cst_34 = arith.constant 5.000000e-01 : f32
    %70 = vector.broadcast %cst_34 : f32 to vector<8x128xf32>
    %71 = arith.mulf %70, %69 : vector<8x128xf32>
    %72 = math.tanh %71 : vector<8x128xf32>
    %cst_35 = arith.constant 5.000000e-01 : f32
    %73 = vector.broadcast %cst_35 : f32 to vector<8x128xf32>
    %74 = arith.mulf %73, %72 : vector<8x128xf32>
    %cst_36 = arith.constant 5.000000e-01 : f32
    %75 = vector.broadcast %cst_36 : f32 to vector<8x128xf32>
    %76 = arith.addf %74, %75 : vector<8x128xf32>
    %77 = vector.extract_strided_slice %60 {offsets = [0, 256], sizes = [8, 128], strides = [1, 1]} : vector<8x512xf32> to vector<8x128xf32>
    %78 = math.tanh %77 : vector<8x128xf32>
    %79 = vector.extract_strided_slice %60 {offsets = [0, 384], sizes = [8, 128], strides = [1, 1]} : vector<8x512xf32> to vector<8x128xf32>
    %cst_37 = arith.constant 5.000000e-01 : f32
    %80 = vector.broadcast %cst_37 : f32 to vector<8x128xf32>
    %81 = arith.mulf %80, %79 : vector<8x128xf32>
    %82 = math.tanh %81 : vector<8x128xf32>
    %cst_38 = arith.constant 5.000000e-01 : f32
    %83 = vector.broadcast %cst_38 : f32 to vector<8x128xf32>
    %84 = arith.mulf %83, %82 : vector<8x128xf32>
    %cst_39 = arith.constant 5.000000e-01 : f32
    %85 = vector.broadcast %cst_39 : f32 to vector<8x128xf32>
    %86 = arith.addf %84, %85 : vector<8x128xf32>
    %87 = arith.mulf %76, %51 : vector<8x128xf32>
    %88 = arith.mulf %68, %78 : vector<8x128xf32>
    %89 = arith.addf %87, %88 : vector<8x128xf32>
    %90 = math.tanh %89 : vector<8x128xf32>
    %91 = arith.mulf %86, %90 : vector<8x128xf32>
    %c2_i32_40 = arith.constant 2 : i32
    %92 = arith.index_cast %c2_i32_40 : i32 to index
    %c0_41 = arith.constant 0 : index
    %c0_42 = arith.constant 0 : index
    %93 = vector.load %arg11[%92, %c0_41, %c0_42] : memref<8x8x512xf32, #tpu.memory_space<vmem>>, vector<1x8x512xf32>
    %94 = vector.shape_cast %93 : vector<1x8x512xf32> to vector<8x512xf32>
    %95 = arith.truncf %91 : vector<8x128xf32> to vector<8x128xbf16>
    %c0_43 = arith.constant 0 : index
    %c0_44 = arith.constant 0 : index
    %96 = vector.load %arg2[%c0_43, %c0_44] : memref<128x512xbf16, #tpu.memory_space<vmem>>, vector<128x512xbf16>
    %cst_45 = arith.constant dense<0.000000e+00> : vector<8x512xf32>
    %97 = tpu.matmul %95, %96, %cst_45 {dimension_numbers = #tpu.dot_dimension_numbers<[1], [0], [0], [1], [0, 0, 1, 1], [], []>} : vector<8x128xbf16>, vector<128x512xbf16>, vector<8x512xf32> -> vector<8x512xf32>
    %98 = arith.addf %94, %97 : vector<8x512xf32>
    %99 = vector.extract_strided_slice %98 {offsets = [0, 0], sizes = [8, 128], strides = [1, 1]} : vector<8x512xf32> to vector<8x128xf32>
    %cst_46 = arith.constant 5.000000e-01 : f32
    %100 = vector.broadcast %cst_46 : f32 to vector<8x128xf32>
    %101 = arith.mulf %100, %99 : vector<8x128xf32>
    %102 = math.tanh %101 : vector<8x128xf32>
    %cst_47 = arith.constant 5.000000e-01 : f32
    %103 = vector.broadcast %cst_47 : f32 to vector<8x128xf32>
    %104 = arith.mulf %103, %102 : vector<8x128xf32>
    %cst_48 = arith.constant 5.000000e-01 : f32
    %105 = vector.broadcast %cst_48 : f32 to vector<8x128xf32>
    %106 = arith.addf %104, %105 : vector<8x128xf32>
    %107 = vector.extract_strided_slice %98 {offsets = [0, 128], sizes = [8, 128], strides = [1, 1]} : vector<8x512xf32> to vector<8x128xf32>
    %cst_49 = arith.constant 5.000000e-01 : f32
    %108 = vector.broadcast %cst_49 : f32 to vector<8x128xf32>
    %109 = arith.mulf %108, %107 : vector<8x128xf32>
    %110 = math.tanh %109 : vector<8x128xf32>
    %cst_50 = arith.constant 5.000000e-01 : f32
    %111 = vector.broadcast %cst_50 : f32 to vector<8x128xf32>
    %112 = arith.mulf %111, %110 : vector<8x128xf32>
    %cst_51 = arith.constant 5.000000e-01 : f32
    %113 = vector.broadcast %cst_51 : f32 to vector<8x128xf32>
    %114 = arith.addf %112, %113 : vector<8x128xf32>
    %115 = vector.extract_strided_slice %98 {offsets = [0, 256], sizes = [8, 128], strides = [1, 1]} : vector<8x512xf32> to vector<8x128xf32>
    %116 = math.tanh %115 : vector<8x128xf32>
    %117 = vector.extract_strided_slice %98 {offsets = [0, 384], sizes = [8, 128], strides = [1, 1]} : vector<8x512xf32> to vector<8x128xf32>
    %cst_52 = arith.constant 5.000000e-01 : f32
    %118 = vector.broadcast %cst_52 : f32 to vector<8x128xf32>
    %119 = arith.mulf %118, %117 : vector<8x128xf32>
    %120 = math.tanh %119 : vector<8x128xf32>
    %cst_53 = arith.constant 5.000000e-01 : f32
    %121 = vector.broadcast %cst_53 : f32 to vector<8x128xf32>
    %122 = arith.mulf %121, %120 : vector<8x128xf32>
    %cst_54 = arith.constant 5.000000e-01 : f32
    %123 = vector.broadcast %cst_54 : f32 to vector<8x128xf32>
    %124 = arith.addf %122, %123 : vector<8x128xf32>
    %125 = arith.mulf %114, %89 : vector<8x128xf32>
    %126 = arith.mulf %106, %116 : vector<8x128xf32>
    %127 = arith.addf %125, %126 : vector<8x128xf32>
    %128 = math.tanh %127 : vector<8x128xf32>
    %129 = arith.mulf %124, %128 : vector<8x128xf32>
    %c3_i32 = arith.constant 3 : i32
    %130 = arith.index_cast %c3_i32 : i32 to index
    %c0_55 = arith.constant 0 : index
    %c0_56 = arith.constant 0 : index
    %131 = vector.load %arg11[%130, %c0_55, %c0_56] : memref<8x8x512xf32, #tpu.memory_space<vmem>>, vector<1x8x512xf32>
    %132 = vector.shape_cast %131 : vector<1x8x512xf32> to vector<8x512xf32>
    %133 = arith.truncf %129 : vector<8x128xf32> to vector<8x128xbf16>
    %c0_57 = arith.constant 0 : index
    %c0_58 = arith.constant 0 : index
    %134 = vector.load %arg2[%c0_57, %c0_58] : memref<128x512xbf16, #tpu.memory_space<vmem>>, vector<128x512xbf16>
    %cst_59 = arith.constant dense<0.000000e+00> : vector<8x512xf32>
    %135 = tpu.matmul %133, %134, %cst_59 {dimension_numbers = #tpu.dot_dimension_numbers<[1], [0], [0], [1], [0, 0, 1, 1], [], []>} : vector<8x128xbf16>, vector<128x512xbf16>, vector<8x512xf32> -> vector<8x512xf32>
    %136 = arith.addf %132, %135 : vector<8x512xf32>
    %137 = vector.extract_strided_slice %136 {offsets = [0, 0], sizes = [8, 128], strides = [1, 1]} : vector<8x512xf32> to vector<8x128xf32>
    %cst_60 = arith.constant 5.000000e-01 : f32
    %138 = vector.broadcast %cst_60 : f32 to vector<8x128xf32>
    %139 = arith.mulf %138, %137 : vector<8x128xf32>
    %140 = math.tanh %139 : vector<8x128xf32>
    %cst_61 = arith.constant 5.000000e-01 : f32
    %141 = vector.broadcast %cst_61 : f32 to vector<8x128xf32>
    %142 = arith.mulf %141, %140 : vector<8x128xf32>
    %cst_62 = arith.constant 5.000000e-01 : f32
    %143 = vector.broadcast %cst_62 : f32 to vector<8x128xf32>
    %144 = arith.addf %142, %143 : vector<8x128xf32>
    %145 = vector.extract_strided_slice %136 {offsets = [0, 128], sizes = [8, 128], strides = [1, 1]} : vector<8x512xf32> to vector<8x128xf32>
    %cst_63 = arith.constant 5.000000e-01 : f32
    %146 = vector.broadcast %cst_63 : f32 to vector<8x128xf32>
    %147 = arith.mulf %146, %145 : vector<8x128xf32>
    %148 = math.tanh %147 : vector<8x128xf32>
    %cst_64 = arith.constant 5.000000e-01 : f32
    %149 = vector.broadcast %cst_64 : f32 to vector<8x128xf32>
    %150 = arith.mulf %149, %148 : vector<8x128xf32>
    %cst_65 = arith.constant 5.000000e-01 : f32
    %151 = vector.broadcast %cst_65 : f32 to vector<8x128xf32>
    %152 = arith.addf %150, %151 : vector<8x128xf32>
    %153 = vector.extract_strided_slice %136 {offsets = [0, 256], sizes = [8, 128], strides = [1, 1]} : vector<8x512xf32> to vector<8x128xf32>
    %154 = math.tanh %153 : vector<8x128xf32>
    %155 = vector.extract_strided_slice %136 {offsets = [0, 384], sizes = [8, 128], strides = [1, 1]} : vector<8x512xf32> to vector<8x128xf32>
    %cst_66 = arith.constant 5.000000e-01 : f32
    %156 = vector.broadcast %cst_66 : f32 to vector<8x128xf32>
    %157 = arith.mulf %156, %155 : vector<8x128xf32>
    %158 = math.tanh %157 : vector<8x128xf32>
    %cst_67 = arith.constant 5.000000e-01 : f32
    %159 = vector.broadcast %cst_67 : f32 to vector<8x128xf32>
    %160 = arith.mulf %159, %158 : vector<8x128xf32>
    %cst_68 = arith.constant 5.000000e-01 : f32
    %161 = vector.broadcast %cst_68 : f32 to vector<8x128xf32>
    %162 = arith.addf %160, %161 : vector<8x128xf32>
    %163 = arith.mulf %152, %127 : vector<8x128xf32>
    %164 = arith.mulf %144, %154 : vector<8x128xf32>
    %165 = arith.addf %163, %164 : vector<8x128xf32>
    %166 = math.tanh %165 : vector<8x128xf32>
    %167 = arith.mulf %162, %166 : vector<8x128xf32>
    %c4_i32 = arith.constant 4 : i32
    %168 = arith.index_cast %c4_i32 : i32 to index
    %c0_69 = arith.constant 0 : index
    %c0_70 = arith.constant 0 : index
    %169 = vector.load %arg11[%168, %c0_69, %c0_70] : memref<8x8x512xf32, #tpu.memory_space<vmem>>, vector<1x8x512xf32>
    %170 = vector.shape_cast %169 : vector<1x8x512xf32> to vector<8x512xf32>
    %171 = arith.truncf %167 : vector<8x128xf32> to vector<8x128xbf16>
    %c0_71 = arith.constant 0 : index
    %c0_72 = arith.constant 0 : index
    %172 = vector.load %arg2[%c0_71, %c0_72] : memref<128x512xbf16, #tpu.memory_space<vmem>>, vector<128x512xbf16>
    %cst_73 = arith.constant dense<0.000000e+00> : vector<8x512xf32>
    %173 = tpu.matmul %171, %172, %cst_73 {dimension_numbers = #tpu.dot_dimension_numbers<[1], [0], [0], [1], [0, 0, 1, 1], [], []>} : vector<8x128xbf16>, vector<128x512xbf16>, vector<8x512xf32> -> vector<8x512xf32>
    %174 = arith.addf %170, %173 : vector<8x512xf32>
    %175 = vector.extract_strided_slice %174 {offsets = [0, 0], sizes = [8, 128], strides = [1, 1]} : vector<8x512xf32> to vector<8x128xf32>
    %cst_74 = arith.constant 5.000000e-01 : f32
    %176 = vector.broadcast %cst_74 : f32 to vector<8x128xf32>
    %177 = arith.mulf %176, %175 : vector<8x128xf32>
    %178 = math.tanh %177 : vector<8x128xf32>
    %cst_75 = arith.constant 5.000000e-01 : f32
    %179 = vector.broadcast %cst_75 : f32 to vector<8x128xf32>
    %180 = arith.mulf %179, %178 : vector<8x128xf32>
    %cst_76 = arith.constant 5.000000e-01 : f32
    %181 = vector.broadcast %cst_76 : f32 to vector<8x128xf32>
    %182 = arith.addf %180, %181 : vector<8x128xf32>
    %183 = vector.extract_strided_slice %174 {offsets = [0, 128], sizes = [8, 128], strides = [1, 1]} : vector<8x512xf32> to vector<8x128xf32>
    %cst_77 = arith.constant 5.000000e-01 : f32
    %184 = vector.broadcast %cst_77 : f32 to vector<8x128xf32>
    %185 = arith.mulf %184, %183 : vector<8x128xf32>
    %186 = math.tanh %185 : vector<8x128xf32>
    %cst_78 = arith.constant 5.000000e-01 : f32
    %187 = vector.broadcast %cst_78 : f32 to vector<8x128xf32>
    %188 = arith.mulf %187, %186 : vector<8x128xf32>
    %cst_79 = arith.constant 5.000000e-01 : f32
    %189 = vector.broadcast %cst_79 : f32 to vector<8x128xf32>
    %190 = arith.addf %188, %189 : vector<8x128xf32>
    %191 = vector.extract_strided_slice %174 {offsets = [0, 256], sizes = [8, 128], strides = [1, 1]} : vector<8x512xf32> to vector<8x128xf32>
    %192 = math.tanh %191 : vector<8x128xf32>
    %193 = vector.extract_strided_slice %174 {offsets = [0, 384], sizes = [8, 128], strides = [1, 1]} : vector<8x512xf32> to vector<8x128xf32>
    %cst_80 = arith.constant 5.000000e-01 : f32
    %194 = vector.broadcast %cst_80 : f32 to vector<8x128xf32>
    %195 = arith.mulf %194, %193 : vector<8x128xf32>
    %196 = math.tanh %195 : vector<8x128xf32>
    %cst_81 = arith.constant 5.000000e-01 : f32
    %197 = vector.broadcast %cst_81 : f32 to vector<8x128xf32>
    %198 = arith.mulf %197, %196 : vector<8x128xf32>
    %cst_82 = arith.constant 5.000000e-01 : f32
    %199 = vector.broadcast %cst_82 : f32 to vector<8x128xf32>
    %200 = arith.addf %198, %199 : vector<8x128xf32>
    %201 = arith.mulf %190, %165 : vector<8x128xf32>
    %202 = arith.mulf %182, %192 : vector<8x128xf32>
    %203 = arith.addf %201, %202 : vector<8x128xf32>
    %204 = math.tanh %203 : vector<8x128xf32>
    %205 = arith.mulf %200, %204 : vector<8x128xf32>
    %c5_i32 = arith.constant 5 : i32
    %206 = arith.index_cast %c5_i32 : i32 to index
    %c0_83 = arith.constant 0 : index
    %c0_84 = arith.constant 0 : index
    %207 = vector.load %arg11[%206, %c0_83, %c0_84] : memref<8x8x512xf32, #tpu.memory_space<vmem>>, vector<1x8x512xf32>
    %208 = vector.shape_cast %207 : vector<1x8x512xf32> to vector<8x512xf32>
    %209 = arith.truncf %205 : vector<8x128xf32> to vector<8x128xbf16>
    %c0_85 = arith.constant 0 : index
    %c0_86 = arith.constant 0 : index
    %210 = vector.load %arg2[%c0_85, %c0_86] : memref<128x512xbf16, #tpu.memory_space<vmem>>, vector<128x512xbf16>
    %cst_87 = arith.constant dense<0.000000e+00> : vector<8x512xf32>
    %211 = tpu.matmul %209, %210, %cst_87 {dimension_numbers = #tpu.dot_dimension_numbers<[1], [0], [0], [1], [0, 0, 1, 1], [], []>} : vector<8x128xbf16>, vector<128x512xbf16>, vector<8x512xf32> -> vector<8x512xf32>
    %212 = arith.addf %208, %211 : vector<8x512xf32>
    %213 = vector.extract_strided_slice %212 {offsets = [0, 0], sizes = [8, 128], strides = [1, 1]} : vector<8x512xf32> to vector<8x128xf32>
    %cst_88 = arith.constant 5.000000e-01 : f32
    %214 = vector.broadcast %cst_88 : f32 to vector<8x128xf32>
    %215 = arith.mulf %214, %213 : vector<8x128xf32>
    %216 = math.tanh %215 : vector<8x128xf32>
    %cst_89 = arith.constant 5.000000e-01 : f32
    %217 = vector.broadcast %cst_89 : f32 to vector<8x128xf32>
    %218 = arith.mulf %217, %216 : vector<8x128xf32>
    %cst_90 = arith.constant 5.000000e-01 : f32
    %219 = vector.broadcast %cst_90 : f32 to vector<8x128xf32>
    %220 = arith.addf %218, %219 : vector<8x128xf32>
    %221 = vector.extract_strided_slice %212 {offsets = [0, 128], sizes = [8, 128], strides = [1, 1]} : vector<8x512xf32> to vector<8x128xf32>
    %cst_91 = arith.constant 5.000000e-01 : f32
    %222 = vector.broadcast %cst_91 : f32 to vector<8x128xf32>
    %223 = arith.mulf %222, %221 : vector<8x128xf32>
    %224 = math.tanh %223 : vector<8x128xf32>
    %cst_92 = arith.constant 5.000000e-01 : f32
    %225 = vector.broadcast %cst_92 : f32 to vector<8x128xf32>
    %226 = arith.mulf %225, %224 : vector<8x128xf32>
    %cst_93 = arith.constant 5.000000e-01 : f32
    %227 = vector.broadcast %cst_93 : f32 to vector<8x128xf32>
    %228 = arith.addf %226, %227 : vector<8x128xf32>
    %229 = vector.extract_strided_slice %212 {offsets = [0, 256], sizes = [8, 128], strides = [1, 1]} : vector<8x512xf32> to vector<8x128xf32>
    %230 = math.tanh %229 : vector<8x128xf32>
    %231 = vector.extract_strided_slice %212 {offsets = [0, 384], sizes = [8, 128], strides = [1, 1]} : vector<8x512xf32> to vector<8x128xf32>
    %cst_94 = arith.constant 5.000000e-01 : f32
    %232 = vector.broadcast %cst_94 : f32 to vector<8x128xf32>
    %233 = arith.mulf %232, %231 : vector<8x128xf32>
    %234 = math.tanh %233 : vector<8x128xf32>
    %cst_95 = arith.constant 5.000000e-01 : f32
    %235 = vector.broadcast %cst_95 : f32 to vector<8x128xf32>
    %236 = arith.mulf %235, %234 : vector<8x128xf32>
    %cst_96 = arith.constant 5.000000e-01 : f32
    %237 = vector.broadcast %cst_96 : f32 to vector<8x128xf32>
    %238 = arith.addf %236, %237 : vector<8x128xf32>
    %239 = arith.mulf %228, %203 : vector<8x128xf32>
    %240 = arith.mulf %220, %230 : vector<8x128xf32>
    %241 = arith.addf %239, %240 : vector<8x128xf32>
    %242 = math.tanh %241 : vector<8x128xf32>
    %243 = arith.mulf %238, %242 : vector<8x128xf32>
    %c6_i32 = arith.constant 6 : i32
    %244 = arith.index_cast %c6_i32 : i32 to index
    %c0_97 = arith.constant 0 : index
    %c0_98 = arith.constant 0 : index
    %245 = vector.load %arg11[%244, %c0_97, %c0_98] : memref<8x8x512xf32, #tpu.memory_space<vmem>>, vector<1x8x512xf32>
    %246 = vector.shape_cast %245 : vector<1x8x512xf32> to vector<8x512xf32>
    %247 = arith.truncf %243 : vector<8x128xf32> to vector<8x128xbf16>
    %c0_99 = arith.constant 0 : index
    %c0_100 = arith.constant 0 : index
    %248 = vector.load %arg2[%c0_99, %c0_100] : memref<128x512xbf16, #tpu.memory_space<vmem>>, vector<128x512xbf16>
    %cst_101 = arith.constant dense<0.000000e+00> : vector<8x512xf32>
    %249 = tpu.matmul %247, %248, %cst_101 {dimension_numbers = #tpu.dot_dimension_numbers<[1], [0], [0], [1], [0, 0, 1, 1], [], []>} : vector<8x128xbf16>, vector<128x512xbf16>, vector<8x512xf32> -> vector<8x512xf32>
    %250 = arith.addf %246, %249 : vector<8x512xf32>
    %251 = vector.extract_strided_slice %250 {offsets = [0, 0], sizes = [8, 128], strides = [1, 1]} : vector<8x512xf32> to vector<8x128xf32>
    %cst_102 = arith.constant 5.000000e-01 : f32
    %252 = vector.broadcast %cst_102 : f32 to vector<8x128xf32>
    %253 = arith.mulf %252, %251 : vector<8x128xf32>
    %254 = math.tanh %253 : vector<8x128xf32>
    %cst_103 = arith.constant 5.000000e-01 : f32
    %255 = vector.broadcast %cst_103 : f32 to vector<8x128xf32>
    %256 = arith.mulf %255, %254 : vector<8x128xf32>
    %cst_104 = arith.constant 5.000000e-01 : f32
    %257 = vector.broadcast %cst_104 : f32 to vector<8x128xf32>
    %258 = arith.addf %256, %257 : vector<8x128xf32>
    %259 = vector.extract_strided_slice %250 {offsets = [0, 128], sizes = [8, 128], strides = [1, 1]} : vector<8x512xf32> to vector<8x128xf32>
    %cst_105 = arith.constant 5.000000e-01 : f32
    %260 = vector.broadcast %cst_105 : f32 to vector<8x128xf32>
    %261 = arith.mulf %260, %259 : vector<8x128xf32>
    %262 = math.tanh %261 : vector<8x128xf32>
    %cst_106 = arith.constant 5.000000e-01 : f32
    %263 = vector.broadcast %cst_106 : f32 to vector<8x128xf32>
    %264 = arith.mulf %263, %262 : vector<8x128xf32>
    %cst_107 = arith.constant 5.000000e-01 : f32
    %265 = vector.broadcast %cst_107 : f32 to vector<8x128xf32>
    %266 = arith.addf %264, %265 : vector<8x128xf32>
    %267 = vector.extract_strided_slice %250 {offsets = [0, 256], sizes = [8, 128], strides = [1, 1]} : vector<8x512xf32> to vector<8x128xf32>
    %268 = math.tanh %267 : vector<8x128xf32>
    %269 = vector.extract_strided_slice %250 {offsets = [0, 384], sizes = [8, 128], strides = [1, 1]} : vector<8x512xf32> to vector<8x128xf32>
    %cst_108 = arith.constant 5.000000e-01 : f32
    %270 = vector.broadcast %cst_108 : f32 to vector<8x128xf32>
    %271 = arith.mulf %270, %269 : vector<8x128xf32>
    %272 = math.tanh %271 : vector<8x128xf32>
    %cst_109 = arith.constant 5.000000e-01 : f32
    %273 = vector.broadcast %cst_109 : f32 to vector<8x128xf32>
    %274 = arith.mulf %273, %272 : vector<8x128xf32>
    %cst_110 = arith.constant 5.000000e-01 : f32
    %275 = vector.broadcast %cst_110 : f32 to vector<8x128xf32>
    %276 = arith.addf %274, %275 : vector<8x128xf32>
    %277 = arith.mulf %266, %241 : vector<8x128xf32>
    %278 = arith.mulf %258, %268 : vector<8x128xf32>
    %279 = arith.addf %277, %278 : vector<8x128xf32>
    %280 = math.tanh %279 : vector<8x128xf32>
    %281 = arith.mulf %276, %280 : vector<8x128xf32>
    %c7_i32 = arith.constant 7 : i32
    %282 = arith.index_cast %c7_i32 : i32 to index
    %c0_111 = arith.constant 0 : index
    %c0_112 = arith.constant 0 : index
    %283 = vector.load %arg11[%282, %c0_111, %c0_112] : memref<8x8x512xf32, #tpu.memory_space<vmem>>, vector<1x8x512xf32>
    %284 = vector.shape_cast %283 : vector<1x8x512xf32> to vector<8x512xf32>
    %285 = arith.truncf %281 : vector<8x128xf32> to vector<8x128xbf16>
    %c0_113 = arith.constant 0 : index
    %c0_114 = arith.constant 0 : index
    %286 = vector.load %arg2[%c0_113, %c0_114] : memref<128x512xbf16, #tpu.memory_space<vmem>>, vector<128x512xbf16>
    %cst_115 = arith.constant dense<0.000000e+00> : vector<8x512xf32>
    %287 = tpu.matmul %285, %286, %cst_115 {dimension_numbers = #tpu.dot_dimension_numbers<[1], [0], [0], [1], [0, 0, 1, 1], [], []>} : vector<8x128xbf16>, vector<128x512xbf16>, vector<8x512xf32> -> vector<8x512xf32>
    %288 = arith.addf %284, %287 : vector<8x512xf32>
    %289 = vector.extract_strided_slice %288 {offsets = [0, 0], sizes = [8, 128], strides = [1, 1]} : vector<8x512xf32> to vector<8x128xf32>
    %cst_116 = arith.constant 5.000000e-01 : f32
    %290 = vector.broadcast %cst_116 : f32 to vector<8x128xf32>
    %291 = arith.mulf %290, %289 : vector<8x128xf32>
    %292 = math.tanh %291 : vector<8x128xf32>
    %cst_117 = arith.constant 5.000000e-01 : f32
    %293 = vector.broadcast %cst_117 : f32 to vector<8x128xf32>
    %294 = arith.mulf %293, %292 : vector<8x128xf32>
    %cst_118 = arith.constant 5.000000e-01 : f32
    %295 = vector.broadcast %cst_118 : f32 to vector<8x128xf32>
    %296 = arith.addf %294, %295 : vector<8x128xf32>
    %297 = vector.extract_strided_slice %288 {offsets = [0, 128], sizes = [8, 128], strides = [1, 1]} : vector<8x512xf32> to vector<8x128xf32>
    %cst_119 = arith.constant 5.000000e-01 : f32
    %298 = vector.broadcast %cst_119 : f32 to vector<8x128xf32>
    %299 = arith.mulf %298, %297 : vector<8x128xf32>
    %300 = math.tanh %299 : vector<8x128xf32>
    %cst_120 = arith.constant 5.000000e-01 : f32
    %301 = vector.broadcast %cst_120 : f32 to vector<8x128xf32>
    %302 = arith.mulf %301, %300 : vector<8x128xf32>
    %cst_121 = arith.constant 5.000000e-01 : f32
    %303 = vector.broadcast %cst_121 : f32 to vector<8x128xf32>
    %304 = arith.addf %302, %303 : vector<8x128xf32>
    %305 = vector.extract_strided_slice %288 {offsets = [0, 256], sizes = [8, 128], strides = [1, 1]} : vector<8x512xf32> to vector<8x128xf32>
    %306 = math.tanh %305 : vector<8x128xf32>
    %307 = vector.extract_strided_slice %288 {offsets = [0, 384], sizes = [8, 128], strides = [1, 1]} : vector<8x512xf32> to vector<8x128xf32>
    %cst_122 = arith.constant 5.000000e-01 : f32
    %308 = vector.broadcast %cst_122 : f32 to vector<8x128xf32>
    %309 = arith.mulf %308, %307 : vector<8x128xf32>
    %310 = math.tanh %309 : vector<8x128xf32>
    %cst_123 = arith.constant 5.000000e-01 : f32
    %311 = vector.broadcast %cst_123 : f32 to vector<8x128xf32>
    %312 = arith.mulf %311, %310 : vector<8x128xf32>
    %cst_124 = arith.constant 5.000000e-01 : f32
    %313 = vector.broadcast %cst_124 : f32 to vector<8x128xf32>
    %314 = arith.addf %312, %313 : vector<8x128xf32>
    %315 = arith.mulf %304, %279 : vector<8x128xf32>
    %316 = arith.mulf %296, %306 : vector<8x128xf32>
    %317 = arith.addf %315, %316 : vector<8x128xf32>
    %318 = math.tanh %317 : vector<8x128xf32>
    %319 = arith.mulf %314, %318 : vector<8x128xf32>
    %c8_i32 = arith.constant 8 : i32
    %c0_i32_125 = arith.constant 0 : i32
    %320 = tpu.memref_slice %arg15[%c0_i32_125] : memref<3x!tpu.dma_semaphore, #tpu.memory_space<semaphore_mem>> -> memref<1x!tpu.dma_semaphore, #tpu.memory_space<semaphore_mem>>
    %321 = tpu.memref_squeeze %320 : memref<1x!tpu.dma_semaphore, #tpu.memory_space<semaphore_mem>> -> memref<!tpu.dma_semaphore, #tpu.memory_space<semaphore_mem>>
    tpu.wait_dma2 semaphore(%321 : memref<!tpu.dma_semaphore, #tpu.memory_space<semaphore_mem>>) src(%arg4 : memref<128x512xbf16, #tpu.memory_space<any>>) dst(%arg12 : memref<128x512xbf16, #tpu.memory_space<vmem>>)
    %322 = arith.truncf %319 : vector<8x128xf32> to vector<8x128xbf16>
    %c0_126 = arith.constant 0 : index
    %c0_127 = arith.constant 0 : index
    %323 = vector.load %arg12[%c0_126, %c0_127] : memref<128x512xbf16, #tpu.memory_space<vmem>>, vector<128x512xbf16>
    %cst_128 = arith.constant dense<0.000000e+00> : vector<8x512xf32>
    %324 = tpu.matmul %322, %323, %cst_128 {dimension_numbers = #tpu.dot_dimension_numbers<[1], [0], [0], [1], [0, 0, 1, 1], [], []>} : vector<8x128xbf16>, vector<128x512xbf16>, vector<8x512xf32> -> vector<8x512xf32>
    %c0_129 = arith.constant 0 : index
    %c0_130 = arith.constant 0 : index
    %325 = vector.load %arg5[%c0_129, %c0_130] : memref<1x512xf32, #tpu.memory_space<vmem>>, vector<1x512xf32>
    %326 = vector.broadcast %325 : vector<1x512xf32> to vector<8x512xf32>
    %327 = arith.addf %324, %326 : vector<8x512xf32>
    %cst_131 = arith.constant 0.000000e+00 : f32
    %328 = vector.broadcast %cst_131 : f32 to vector<8x512xf32>
    %329 = arith.maximumf %327, %328 : vector<8x512xf32>
    %c1_i32_132 = arith.constant 1 : i32
    %330 = tpu.memref_slice %arg15[%c1_i32_132] : memref<3x!tpu.dma_semaphore, #tpu.memory_space<semaphore_mem>> -> memref<1x!tpu.dma_semaphore, #tpu.memory_space<semaphore_mem>>
    %331 = tpu.memref_squeeze %330 : memref<1x!tpu.dma_semaphore, #tpu.memory_space<semaphore_mem>> -> memref<!tpu.dma_semaphore, #tpu.memory_space<semaphore_mem>>
    tpu.wait_dma2 semaphore(%331 : memref<!tpu.dma_semaphore, #tpu.memory_space<semaphore_mem>>) src(%arg6 : memref<512x384xbf16, #tpu.memory_space<any>>) dst(%arg13 : memref<512x384xbf16, #tpu.memory_space<vmem>>)
    %332 = arith.truncf %329 : vector<8x512xf32> to vector<8x512xbf16>
    %c0_133 = arith.constant 0 : index
    %c0_134 = arith.constant 0 : index
    %333 = vector.load %arg13[%c0_133, %c0_134] : memref<512x384xbf16, #tpu.memory_space<vmem>>, vector<512x384xbf16>
    %cst_135 = arith.constant dense<0.000000e+00> : vector<8x384xf32>
    %334 = tpu.matmul %332, %333, %cst_135 {dimension_numbers = #tpu.dot_dimension_numbers<[1], [0], [0], [1], [0, 0, 1, 1], [], []>} : vector<8x512xbf16>, vector<512x384xbf16>, vector<8x384xf32> -> vector<8x384xf32>
    %c0_136 = arith.constant 0 : index
    %c0_137 = arith.constant 0 : index
    %335 = vector.load %arg7[%c0_136, %c0_137] : memref<1x384xf32, #tpu.memory_space<vmem>>, vector<1x384xf32>
    %336 = vector.broadcast %335 : vector<1x384xf32> to vector<8x384xf32>
    %337 = arith.addf %334, %336 : vector<8x384xf32>
    %cst_138 = arith.constant 0.000000e+00 : f32
    %338 = vector.broadcast %cst_138 : f32 to vector<8x384xf32>
    %339 = arith.maximumf %337, %338 : vector<8x384xf32>
    %c2_i32_139 = arith.constant 2 : i32
    %340 = tpu.memref_slice %arg15[%c2_i32_139] : memref<3x!tpu.dma_semaphore, #tpu.memory_space<semaphore_mem>> -> memref<1x!tpu.dma_semaphore, #tpu.memory_space<semaphore_mem>>
    %341 = tpu.memref_squeeze %340 : memref<1x!tpu.dma_semaphore, #tpu.memory_space<semaphore_mem>> -> memref<!tpu.dma_semaphore, #tpu.memory_space<semaphore_mem>>
    tpu.wait_dma2 semaphore(%341 : memref<!tpu.dma_semaphore, #tpu.memory_space<semaphore_mem>>) src(%arg8 : memref<384x128xbf16, #tpu.memory_space<any>>) dst(%arg14 : memref<384x128xbf16, #tpu.memory_space<vmem>>)
    %342 = arith.truncf %339 : vector<8x384xf32> to vector<8x384xbf16>
    %c0_140 = arith.constant 0 : index
    %c0_141 = arith.constant 0 : index
    %343 = vector.load %arg14[%c0_140, %c0_141] : memref<384x128xbf16, #tpu.memory_space<vmem>>, vector<384x128xbf16>
    %cst_142 = arith.constant dense<0.000000e+00> : vector<8x128xf32>
    %344 = tpu.matmul %342, %343, %cst_142 {dimension_numbers = #tpu.dot_dimension_numbers<[1], [0], [0], [1], [0, 0, 1, 1], [], []>} : vector<8x384xbf16>, vector<384x128xbf16>, vector<8x128xf32> -> vector<8x128xf32>
    %c0_143 = arith.constant 0 : index
    %c0_144 = arith.constant 0 : index
    %345 = vector.load %arg9[%c0_143, %c0_144] : memref<1x128xf32, #tpu.memory_space<vmem>>, vector<1x128xf32>
    %346 = vector.broadcast %345 : vector<1x128xf32> to vector<8x128xf32>
    %347 = arith.addf %344, %346 : vector<8x128xf32>
    %348 = math.tanh %347 : vector<8x128xf32>
    %c0_145 = arith.constant 0 : index
    %c0_146 = arith.constant 0 : index
    %349 = vector.load %arg10[%c0_145, %c0_146] : memref<8x128xf32, #tpu.memory_space<vmem>>, vector<8x128xf32>
    tpu.vector_store %arg10[%c0_145, %c0_146], %348 {strides = array<i32>} : memref<8x128xf32, #tpu.memory_space<vmem>>, vector<8x128xf32>,
    return
  }
}

</mosaic_0001>

<bundles_post_ra>
// kernel: actor_single.1
= control target key start
LH: loop header
LB: loop body
LE: loop exit
PB: predicated region body
PF: predicated region fallthrough
CT: control target
= control target key end

     0   :  { %15 = vsyncpa [#allocation8], 0  ;;  %s3704_s16 = smov [#allocation7]   ;;  %s3705_s18 = smov 256   ;;  %s4379_s0 = inlined_call_operand.vmem [shape: bf16[64,32], index: 0, kind: input, shape index: {}]   ;;  %s4380_s1 = inlined_call_operand.vmem [shape: bf16[32,512], index: 1, kind: input, shape index: {}]   ;;  %s4381_s2 = inlined_call_operand.hbm [shape: bf16[128,512], index: 2, kind: input, shape index: {}]   ;;  %s4382_s3 = inlined_call_operand.vmem [shape: f32[1,512], index: 3, kind: input, shape index: {}]   ;;  %s4383_s4 = inlined_call_operand.hbm [shape: bf16[128,512], index: 4, kind: input, shape index: {}]   ;;  %s4384_s5 = inlined_call_operand.vmem [shape: f32[1,512], index: 5, kind: input, shape index: {}]   ;;  %s4385_s6 = inlined_call_operand.hbm [shape: bf16[512,384], index: 6, kind: input, shape index: {}]   ;;  %s4386_s7 = inlined_call_operand.vmem [shape: f32[1,384], index: 7, kind: input, shape index: {}]   ;;  %s4387_s8 = inlined_call_operand.hbm [shape: bf16[384,128], index: 8, kind: input, shape index: {}]   ;;  %s4388_s9 = inlined_call_operand.vmem [shape: f32[1,128], index: 9, kind: input, shape index: {}]   ;;  %s4389_s10 = inlined_call_operand.vmem [shape: f32[8,128], index: 10, kind: output, shape index: {}]  }
   0x1   :  { %s24_s15 = sshll.u32 %s4381_s2, 4  ;;  %s26_s17 = sshll.u32 %s3704_s16, 4  ;;  %s25_s15 = int_to_ptr.hbm [resolvable:$true] %s24_s15  ;;  %s27_s17 = int_to_ptr.vmem [resolvable:$true] %s26_s17 }
   0x2   :  { %s3706_s19 = smov 16  }
   0x3   :  { %32 = dma.hbm_to_vmem [thread:$0]  %s25_s15, 4096, %s27_s17, [#allocation8], %s3705_s18, %s3705_s18, %s3706_s19  }
   0x4   :  { %3696 = dma.done.wait [#allocation8], 4096  }
   0x5   :  { %3697 = vsyncadd [#allocation8], 4294963200  ;;  %v2545_v0 = vld [vmem:[%s4380_s1 + $0x20] sm:$0xf]  ;;  %v3324_v1 = vld [vmem:[%s4380_s1 + $0x2c] sm:$0xf0] }
   0x6   :  { %v3322_v2 = vld [vmem:[%s4380_s1 + $0x24] sm:$0xf]  ;;  %v2546_v3 = vor.u32 %v3324_v1, %v2545_v0  ;;  %v2547_v4 = vld [vmem:[%s4380_s1 + $0x30] sm:$0xf0]  ;;  %v2553_v5 = vld [vmem:[%s4380_s1 + $0x28] sm:$0xf] }
   0x7   :  { %v3325_v6 = vld [vmem:[%s4380_s1 + $0x34] sm:$0xf0]  ;;  %v2550_v7 = vor.u32 %v3322_v2, %v2547_v4  ;;  %v3323_v9 = vld [vmem:[%s4380_s1 + $0x2c] sm:$0xf]  ;;  %v2555_v10 = vld [vmem:[%s4380_s1 + $0x38] sm:$0xf0] }
   0x8   :  { %v2554_v8 = vor.u32 %v3325_v6, %v2553_v5  ;;  %v2529_v11 = vld [vmem:[%s4380_s1] sm:$0xf]  ;;  %192 = vmatpush.bf16.msra.mxu0 %v2546_v3  ;;  %v2558_v12 = vor.u32 %v3323_v9, %v2555_v10  ;;  %v3320_v13 = vld [vmem:[%s4380_s1 + $0xc] sm:$0xf0]  ;;  %v3318_v14 = vld [vmem:[%s4380_s1 + $0x4] sm:$0xf] }
   0x9   :  { %v2531_v15 = vld [vmem:[%s4380_s1 + $0x10] sm:$0xf0]  ;;  %221 = vmatpush.bf16.msra.mxu1 %v2550_v7  ;;  %v2530_v16 = vor.u32 %v3320_v13, %v2529_v11  ;;  %v2537_v18 = vld [vmem:[%s4380_s1 + $0x8] sm:$0xf]  ;;  %v3321_v19 = vld [vmem:[%s4380_s1 + $0x14] sm:$0xf0] }
   0xa   :  { %250 = vmatpush.bf16.msra.mxu2 %v2554_v8  ;;  %v2534_v17 = vor.u32 %v3318_v14, %v2531_v15  ;;  %v3319_v20 = vld [vmem:[%s4380_s1 + $0xc] sm:$0xf]  ;;  %279 = vmatpush.bf16.msra.mxu3 %v2558_v12  ;;  %v2538_v21 = vor.u32 %v3321_v19, %v2537_v18  ;;  %v2539_v22 = vld [vmem:[%s4380_s1 + $0x18] sm:$0xf0]  ;;  %v3314_v23 = vld [vmem:[%s4379_s0] sm:$0xff]  ;;  %vm173_vm0 = vcmask 261120  }
   0xb   :  { %v2689_v24 = vld [vmem:[#allocation7 + $0xe0] sm:$0xf]  ;;  %v2542_v25 = vor.u32 %v3319_v20, %v2539_v22  ;;  %v3356_v26 = vld [vmem:[#allocation7 + $0xec] sm:$0xf0]  ;;  %v3354_v27 = vld [vmem:[#allocation7 + $0xe4] sm:$0xf] }
   0xc   :  { %v2691_v28 = vld [vmem:[#allocation7 + $0xf0] sm:$0xf0]  ;;  %193 = vmatpush.bf16.msra.mxu0 %v2530_v16  ;;  %v3820_v29 = vor.u32 %v3356_v26, %v2689_v24  ;;  %v2697_v31 = vld [vmem:[#allocation7 + $0xe8] sm:$0xf]  ;;  %v3357_v32 = vld [vmem:[#allocation7 + $0xf4] sm:$0xf0] }
   0xd   :  { %v3822_v30 = vor.u32 %v3354_v27, %v2691_v28  ;;  %v3355_v33 = vld [vmem:[#allocation7 + $0xec] sm:$0xf]  ;;  %222 = vmatpush.bf16.msra.mxu1 %v2534_v17  ;;  %v3824_v34 = vor.u32 %v3357_v32, %v2697_v31  ;;  %v2699_v35 = vld [vmem:[#allocation7 + $0xf8] sm:$0xf0]  ;;  %v2673_v36 = vld [vmem:[#allocation7 + $0xc0] sm:$0xf] }
   0xe   :  { %251 = vmatpush.bf16.msra.mxu2 %v2538_v21  ;;  %v3352_v37 = vld [vmem:[#allocation7 + $0xcc] sm:$0xf0]  ;;  %280 = vmatpush.bf16.msra.mxu3 %v2542_v25  ;;  %v3827_v38 = vor.u32 %v3355_v33, %v2699_v35  ;;  %v3350_v40 = vld [vmem:[#allocation7 + $0xc4] sm:$0xf]  ;;  %v2675_v41 = vld [vmem:[#allocation7 + $0xd0] sm:$0xf0] }
   0xf   :  { %v3829_v39 = vor.u32 %v3352_v37, %v2673_v36  ;;  %v2681_v42 = vld [vmem:[#allocation7 + $0xc8] sm:$0xf]  ;;  %2559 = vmatmul.msk.bf16.vlgmr.msra.gmra.mxu0 %vm173_vm0, %v3314_v23  ;;  %v3833_v43 = vor.u32 %v3350_v40, %v2675_v41  ;;  %v3353_v44 = vld [vmem:[#allocation7 + $0xd4] sm:$0xf0]  ;;  %v3351_v45 = vld [vmem:[#allocation7 + $0xcc] sm:$0xf] }
  0x10   :  { %530 = vmatpush.bf16.msrb.mxu0 %v3820_v29  ;;  %v2683_v46 = vld [vmem:[#allocation7 + $0xd8] sm:$0xf0]  ;;  %2563 = vmatmul.msk.bf16.vlgmr.msra.gmra.mxu1 %vm173_vm0, %v3314_v23  ;;  %v2657_v47 = vld [vmem:[#allocation7 + $0xa0] sm:$0xf]  ;;  %v3348_v48 = vld [vmem:[#allocation7 + $0xac] sm:$0xf0]  ;;  %v3839_v49 = vor.u32 %v3353_v44, %v2681_v42 }
  0x11   :  { %543 = vmatpush.bf16.msrb.mxu1 %v3822_v30  ;;  %2567 = vmatmul.msk.bf16.vlgmr.msra.gmra.mxu2 %vm173_vm0, %v3314_v23  ;;  %v3346_v50 = vld [vmem:[#allocation7 + $0xa4] sm:$0xf]  ;;  %v2659_v51 = vld [vmem:[#allocation7 + $0xb0] sm:$0xf0]  ;;  %v3843_v52 = vor.u32 %v3351_v45, %v2683_v46  ;;  %v3845_v53 = vor.u32 %v3348_v48, %v2657_v47  ;;  %v2665_v54 = vld [vmem:[#allocation7 + $0xa8] sm:$0xf] }
  0x12   :  { %2571 = vmatmul.msk.bf16.vlgmr.msra.gmra.mxu3 %vm173_vm0, %v3314_v23  ;;  %556 = vmatpush.bf16.msrb.mxu2 %v3824_v34  ;;  %v3349_v55 = vld [vmem:[#allocation7 + $0xb4] sm:$0xf0]  ;;  %v3347_v56 = vld [vmem:[#allocation7 + $0xac] sm:$0xf]  ;;  %v3848_v57 = vor.u32 %v3346_v50, %v2659_v51  ;;  %v2667_v58 = vld [vmem:[#allocation7 + $0xb8] sm:$0xf0] }
  0x13   :  { %569 = vmatpush.bf16.msrb.mxu3 %v3827_v38  ;;  %v2641_v59 = vld [vmem:[#allocation7 + $0x80] sm:$0xf]  ;;  %v3344_v60 = vld [vmem:[#allocation7 + $0x8c] sm:$0xf0]  ;;  %v3342_v61 = vld [vmem:[#allocation7 + $0x84] sm:$0xf]  ;;  %v3851_v63 = vor.u32 %v3349_v55, %v2665_v54  ;;  %v3855_v0 = vor.u32 %v3347_v56, %v2667_v58 }
  0x14   :  { %531 = vmatpush.bf16.msrb.mxu0 %v3829_v39  ;;  %v2643_v62 = vld [vmem:[#allocation7 + $0x90] sm:$0xf0]  ;;  %v3857_v1 = vor.u32 %v3344_v60, %v2641_v59  ;;  %v2649_v2 = vld [vmem:[#allocation7 + $0x88] sm:$0xf]  ;;  %v3345_v3 = vld [vmem:[#allocation7 + $0x94] sm:$0xf0] }
  0x15   :  { %544 = vmatpush.bf16.msrb.mxu1 %v3833_v43  ;;  %v3343_v4 = vld [vmem:[#allocation7 + $0x8c] sm:$0xf]  ;;  %v3860_v5 = vor.u32 %v3342_v61, %v2643_v62  ;;  %v2651_v6 = vld [vmem:[#allocation7 + $0x98] sm:$0xf0]  ;;  %v2625_v7 = vld [vmem:[#allocation7 + $0x60] sm:$0xf]  ;;  %v3866_v12 = vor.u32 %v3345_v3, %v2649_v2 }
  0x16   :  { %557 = vmatpush.bf16.msrb.mxu2 %v3839_v49  ;;  %v3340_v8 = vld [vmem:[#allocation7 + $0x6c] sm:$0xf0]  ;;  %v3338_v9 = vld [vmem:[#allocation7 + $0x64] sm:$0xf]  ;;  %v2627_v10 = vld [vmem:[#allocation7 + $0x70] sm:$0xf0]  ;;  %v3870_v13 = vor.u32 %v3343_v4, %v2651_v6 }
  0x17   :  { %570 = vmatpush.bf16.msrb.mxu3 %v3843_v52  ;;  %v3315_v11 = vld [vmem:[%s4379_s0 + $0x8] sm:$0xff]  ;;  %v3872_v14 = vor.u32 %v3340_v8, %v2625_v7  ;;  %v3341_v16 = vld [vmem:[#allocation7 + $0x74] sm:$0xf0]  ;;  %v3875_v18 = vor.u32 %v3338_v9, %v2627_v10  ;;  %v2635_v19 = vld [vmem:[#allocation7 + $0x78] sm:$0xf0]  ;;  %v3707_v10 = vmov 0  }
  0x18   :  { %532 = vmatpush.bf16.msrb.mxu0 %v3845_v53  ;;  %v2633_v15 = vld [vmem:[#allocation7 + $0x68] sm:$0xf]  ;;  %v3339_v17 = vld [vmem:[#allocation7 + $0x6c] sm:$0xf]  ;;  %v2609_v20 = vld [vmem:[#allocation7 + $0x40] sm:$0xf] }
  0x19   :  { %545 = vmatpush.bf16.msrb.mxu1 %v3848_v57  ;;  %v3336_v21 = vld [vmem:[#allocation7 + $0x4c] sm:$0xf0]  ;;  %v3334_v22 = vld [vmem:[#allocation7 + $0x44] sm:$0xf]  ;;  %v2611_v23 = vld [vmem:[#allocation7 + $0x50] sm:$0xf0]  ;;  %v3878_v24 = vor.u32 %v3341_v16, %v2633_v15  ;;  %v3882_v25 = vor.u32 %v3339_v17, %v2635_v19 }
  0x1a   :  { %558 = vmatpush.bf16.msrb.mxu2 %v3851_v63  ;;  %v3884_v26 = vor.u32 %v3336_v21, %v2609_v20  ;;  %v2617_v27 = vld [vmem:[#allocation7 + $0x48] sm:$0xf]  ;;  %v3337_v28 = vld [vmem:[#allocation7 + $0x54] sm:$0xf0]  ;;  %v3888_v31 = vor.u32 %v3334_v22, %v2611_v23  ;;  %v3335_v32 = vld [vmem:[#allocation7 + $0x4c] sm:$0xf] }
  0x1b   :  { %571 = vmatpush.bf16.msrb.mxu3 %v3855_v0  ;;  %v2619_v33 = vld [vmem:[#allocation7 + $0x58] sm:$0xf0]  ;;  %v3894_v35 = vor.u32 %v3337_v28, %v2617_v27  ;;  %v2593_v36 = vld [vmem:[#allocation7 + $0x20] sm:$0xf]  ;;  %v3332_v37 = vld [vmem:[#allocation7 + $0x2c] sm:$0xf0] }
  0x1c   :  { %533 = vmatpush.bf16.msrb.mxu0 %v3857_v1  ;;  %v3330_v40 = vld [vmem:[#allocation7 + $0x24] sm:$0xf]  ;;  %v3898_v41 = vor.u32 %v3335_v32, %v2619_v33  ;;  %v3900_v42 = vor.u32 %v3332_v37, %v2593_v36  ;;  %v2595_v44 = vld [vmem:[#allocation7 + $0x30] sm:$0xf0]  ;;  %v2601_v45 = vld [vmem:[#allocation7 + $0x28] sm:$0xf] }
  0x1d   :  { %546 = vmatpush.bf16.msrb.mxu1 %v3860_v5  ;;  %v3333_v46 = vld [vmem:[#allocation7 + $0x34] sm:$0xf0]  ;;  %v3903_v47 = vor.u32 %v3330_v40, %v2595_v44  ;;  %v3331_v48 = vld [vmem:[#allocation7 + $0x2c] sm:$0xf]  ;;  %v2603_v50 = vld [vmem:[#allocation7 + $0x38] sm:$0xf0] }
  0x1e   :  { %559 = vmatpush.bf16.msrb.mxu2 %v3866_v12  ;;  %v2577_v51 = vld [vmem:[#allocation7] sm:$0xf]  ;;  %v3328_v54 = vld [vmem:[#allocation7 + $0xc] sm:$0xf0]  ;;  %v3326_v55 = vld [vmem:[#allocation7 + $0x4] sm:$0xf]  ;;  %v3906_v58 = vor.u32 %v3333_v46, %v2601_v45  ;;  %v3910_v59 = vor.u32 %v3331_v48, %v2603_v50 }
  0x1f   :  { %572 = vmatpush.bf16.msrb.mxu3 %v3870_v13  ;;  %2560 = vmatmul.msk.bf16.gmra.mxu0 %vm173_vm0, %v3315_v11  ;;  %v2579_v56 = vld [vmem:[#allocation7 + $0x10] sm:$0xf0]  ;;  %v3912_v60 = vor.u32 %v3328_v54, %v2577_v51  ;;  %v2585_v61 = vld [vmem:[#allocation7 + $0x8] sm:$0xf]  ;;  %v3329_v62 = vld [vmem:[#allocation7 + $0x14] sm:$0xf0] }
  0x20   :  { %534 = vmatpush.bf16.msrb.mxu0 %v3872_v14  ;;  %2564 = vmatmul.msk.bf16.gmra.mxu1 %vm173_vm0, %v3315_v11  ;;  %v3915_v2 = vor.u32 %v3326_v55, %v2579_v56  ;;  %v3327_v3 = vld [vmem:[#allocation7 + $0xc] sm:$0xf]  ;;  %v2587_v4 = vld [vmem:[#allocation7 + $0x18] sm:$0xf0]  ;;  %v3918_v6 = vor.u32 %v3329_v62, %v2585_v61  ;;  %v3316_v8 = vld [vmem:[%s4379_s0 + $0x10] sm:$0xff]  ;;  %s53_s19 = sshll.u32 %s4383_s4, 4  ;;  %s54_s19 = int_to_ptr.hbm [resolvable:$true] %s53_s19 }
  0x21   :  { %547 = vmatpush.bf16.msrb.mxu1 %v3875_v18  ;;  %2568 = vmatmul.msk.bf16.gmra.mxu2 %vm173_vm0, %v3315_v11  ;;  %v3922_v7 = vor.u32 %v3327_v3, %v2587_v4  ;;  %v3317_v9 = vld [vmem:[%s4379_s0 + $0x18] sm:$0xff]  ;;  %v103_v16 = vld [vmem:[%s4382_s3] sm:$0xf]  ;;  %s3708_s20 = smov [#allocation3]   ;;  %s67_s24 = sshll.u32 %s4385_s6, 4  ;;  %s68_s24 = int_to_ptr.hbm [resolvable:$true] %s67_s24 }
  0x22   :  { %2572 = vmatmul.msk.bf16.gmra.mxu3 %vm173_vm0, %v3315_v11  ;;  %560 = vmatpush.bf16.msrb.mxu2 %v3878_v24  ;;  %v105_v17 = vperm.slane %v103_v16, 0  ;;  %v106_v20 = vperm.slane %v103_v16, 1  ;;  %v4016_v32 = vperm.slane %v103_v16, 2  ;;  %v4018_v33 = vperm.slane %v103_v16, 3  ;;  %s55_s21 = sshll.u32 %s3708_s20, 4  ;;  %s3709_s25 = smov [#allocation4]   ;;  %s56_s21 = int_to_ptr.vmem [resolvable:$true] %s55_s21 }
  0x23   :  { %573 = vmatpush.bf16.msrb.mxu3 %v3882_v25  ;;  %58 = dma.hbm_to_vmem [thread:$0]  %s54_s19, 4096, %s56_s21, [#allocation6] }
  0x24   :  { %535 = vmatpush.bf16.msrb.mxu0 %v3884_v26  ;;  %s69_s2 = sshll.u32 %s3709_s25, 4  ;;  %s81_s28 = sshll.u32 %s4387_s8, 4  ;;  %s70_s2 = int_to_ptr.vmem [resolvable:$true] %s69_s2  ;;  %s82_s28 = int_to_ptr.hbm [resolvable:$true] %s81_s28 }
  0x25   :  { %548 = vmatpush.bf16.msrb.mxu1 %v3888_v31  ;;  %72 = dma.hbm_to_vmem [thread:$0]  %s68_s24, 12288, %s70_s2, [#allocation6 + $0x1] }
  0x26   :  { %561 = vmatpush.bf16.msrb.mxu2 %v3894_v35  ;;  %s3710_s4 = smov [#allocation5]  }
  0x27   :  { %574 = vmatpush.bf16.msrb.mxu3 %v3898_v41  ;;  %s83_s29 = sshll.u32 %s3710_s4, 4  ;;  %s84_s29 = int_to_ptr.vmem [resolvable:$true] %s83_s29 }
  0x28   :  { %536 = vmatpush.bf16.msrb.mxu0 %v3900_v42  ;;  %86 = dma.hbm_to_vmem [thread:$0]  %s82_s28, 3072, %s84_s29, [#allocation6 + $0x2] }
  0x29   :  { %549 = vmatpush.bf16.msrb.mxu1 %v3903_v47 }
  0x2a   :  { %562 = vmatpush.bf16.msrb.mxu2 %v3906_v58 }
  0x2b   :  { %575 = vmatpush.bf16.msrb.mxu3 %v3910_v59 }
  0x2c   :  { %537 = vmatpush.bf16.msrb.mxu0 %v3912_v60 }
  0x2d   :  { %550 = vmatpush.bf16.msrb.mxu1 %v3915_v2 }
  0x2e   :  { %563 = vmatpush.bf16.msrb.mxu2 %v3918_v6 }
  0x2f   :  { %576 = vmatpush.bf16.msrb.mxu3 %v3922_v7  ;;  %2561 = vmatmul.msk.bf16.gmra.mxu0 %vm173_vm0, %v3316_v8 }
  0x30   :  { %610 = vmatpush.bf16.msra.mxu0 %v3820_v29  ;;  %2565 = vmatmul.msk.bf16.gmra.mxu1 %vm173_vm0, %v3316_v8 }
  0x31   :  { %623 = vmatpush.bf16.msra.mxu1 %v3822_v30  ;;  %2569 = vmatmul.msk.bf16.gmra.mxu2 %vm173_vm0, %v3316_v8 }
  0x32   :  { %636 = vmatpush.bf16.msra.mxu2 %v3824_v34  ;;  %2573 = vmatmul.msk.bf16.gmra.mxu3 %vm173_vm0, %v3316_v8 }
  0x33   :  { %649 = vmatpush.bf16.msra.mxu3 %v3827_v38 }
  0x34   :  { %611 = vmatpush.bf16.msra.mxu0 %v3829_v39 }
  0x35   :  { %624 = vmatpush.bf16.msra.mxu1 %v3833_v43 }
  0x36   :  { %637 = vmatpush.bf16.msra.mxu2 %v3839_v49 }
  0x37   :  { %650 = vmatpush.bf16.msra.mxu3 %v3843_v52 }
  0x38   :  { %612 = vmatpush.bf16.msra.mxu0 %v3845_v53 }
  0x39   :  { %625 = vmatpush.bf16.msra.mxu1 %v3848_v57 }
  0x3a   :  { %638 = vmatpush.bf16.msra.mxu2 %v3851_v63 }
  0x3b   :  { %651 = vmatpush.bf16.msra.mxu3 %v3855_v0 }
  0x3c   :  { %613 = vmatpush.bf16.msra.mxu0 %v3857_v1 }
  0x3d   :  { %626 = vmatpush.bf16.msra.mxu1 %v3860_v5 }
  0x3e   :  { %639 = vmatpush.bf16.msra.mxu2 %v3866_v12 }
  0x3f   :  { %652 = vmatpush.bf16.msra.mxu3 %v3870_v13  ;;  %2562 = vmatmul.msk.bf16.gmra.mxu0 %vm173_vm0, %v3317_v9 }
  0x40   :  { %614 = vmatpush.bf16.msra.mxu0 %v3872_v14  ;;  %2566 = vmatmul.msk.bf16.gmra.mxu1 %vm173_vm0, %v3317_v9 }
  0x41   :  { %627 = vmatpush.bf16.msra.mxu1 %v3875_v18  ;;  %2570 = vmatmul.msk.bf16.gmra.mxu2 %vm173_vm0, %v3317_v9 }
  0x42   :  { %640 = vmatpush.bf16.msra.mxu2 %v3878_v24  ;;  %2574 = vmatmul.msk.bf16.gmra.mxu3 %vm173_vm0, %v3317_v9 }
  0x43   :  { %653 = vmatpush.bf16.msra.mxu3 %v3882_v25 }
  0x44   :  { %615 = vmatpush.bf16.msra.mxu0 %v3884_v26 }
  0x45   :  { %628 = vmatpush.bf16.msra.mxu1 %v3888_v31 }
  0x46   :  { %641 = vmatpush.bf16.msra.mxu2 %v3894_v35 }
  0x47   :  { %654 = vmatpush.bf16.msra.mxu3 %v3898_v41 }
  0x48   :  { %616 = vmatpush.bf16.msra.mxu0 %v3900_v42 }
  0x49   :  { %629 = vmatpush.bf16.msra.mxu1 %v3903_v47 }
  0x4a   :  { %642 = vmatpush.bf16.msra.mxu2 %v3906_v58 }
  0x4b   :  { %655 = vmatpush.bf16.msra.mxu3 %v3910_v59 }
  0x4c   :  { %617 = vmatpush.bf16.msra.mxu0 %v3912_v60 }
  0x4d   :  { %630 = vmatpush.bf16.msra.mxu1 %v3915_v2 }
  0x4e   :  { %643 = vmatpush.bf16.msra.mxu2 %v3918_v6 }
  0x4f   :  { %656 = vmatpush.bf16.msra.mxu3 %v3922_v7  ;;  %538 = vmatmul.bf16.vlgmr.msrb.gmra.mxu0 %v3707_v10 }
  0x50   :  { %551 = vmatmul.bf16.vlgmr.msrb.gmra.mxu1 %v3707_v10  ;;  %690 = vmatpush.bf16.msrb.mxu0 %v3820_v29 }
  0x51   :  { %564 = vmatmul.bf16.vlgmr.msrb.gmra.mxu2 %v3707_v10  ;;  %703 = vmatpush.bf16.msrb.mxu1 %v3822_v30 }
  0x52   :  { %577 = vmatmul.bf16.vlgmr.msrb.gmra.mxu3 %v3707_v10  ;;  %716 = vmatpush.bf16.msrb.mxu2 %v3824_v34 }
  0x53   :  { %729 = vmatpush.bf16.msrb.mxu3 %v3827_v38 }
  0x54   :  { %691 = vmatpush.bf16.msrb.mxu0 %v3829_v39 }
  0x55   :  { %704 = vmatpush.bf16.msrb.mxu1 %v3833_v43 }
  0x56   :  { %717 = vmatpush.bf16.msrb.mxu2 %v3839_v49 }
  0x57   :  { %730 = vmatpush.bf16.msrb.mxu3 %v3843_v52 }
  0x58   :  { %692 = vmatpush.bf16.msrb.mxu0 %v3845_v53 }
  0x59   :  { %705 = vmatpush.bf16.msrb.mxu1 %v3848_v57 }
  0x5a   :  { %718 = vmatpush.bf16.msrb.mxu2 %v3851_v63 }
  0x5b   :  { %731 = vmatpush.bf16.msrb.mxu3 %v3855_v0 }
  0x5c   :  { %693 = vmatpush.bf16.msrb.mxu0 %v3857_v1 }
  0x5d   :  { %706 = vmatpush.bf16.msrb.mxu1 %v3860_v5 }
  0x5e   :  { %719 = vmatpush.bf16.msrb.mxu2 %v3866_v12 }
  0x5f   :  { %732 = vmatpush.bf16.msrb.mxu3 %v3870_v13 }
  0x60   :  { %694 = vmatpush.bf16.msrb.mxu0 %v3872_v14 }
  0x61   :  { %707 = vmatpush.bf16.msrb.mxu1 %v3875_v18 }
  0x62   :  { %720 = vmatpush.bf16.msrb.mxu2 %v3878_v24 }
  0x63   :  { %733 = vmatpush.bf16.msrb.mxu3 %v3882_v25 }
  0x64   :  { %695 = vmatpush.bf16.msrb.mxu0 %v3884_v26 }
  0x65   :  { %708 = vmatpush.bf16.msrb.mxu1 %v3888_v31 }
  0x66   :  { %721 = vmatpush.bf16.msrb.mxu2 %v3894_v35 }
  0x67   :  { %734 = vmatpush.bf16.msrb.mxu3 %v3898_v41 }
  0x68   :  { %696 = vmatpush.bf16.msrb.mxu0 %v3900_v42 }
  0x69   :  { %709 = vmatpush.bf16.msrb.mxu1 %v3903_v47 }
  0x6a   :  { %722 = vmatpush.bf16.msrb.mxu2 %v3906_v58 }
  0x6b   :  { %735 = vmatpush.bf16.msrb.mxu3 %v3910_v59 }
  0x6c   :  { %697 = vmatpush.bf16.msrb.mxu0 %v3912_v60 }
  0x6d   :  { %710 = vmatpush.bf16.msrb.mxu1 %v3915_v2 }
  0x6e   :  { %723 = vmatpush.bf16.msrb.mxu2 %v3918_v6 }
  0x6f   :  { %736 = vmatpush.bf16.msrb.mxu3 %v3922_v7 }
  0x8c   :  { %v195_v11 = vpop.f32.mrf.mxu0 }
  0x8d   :  { %v224_v15 = vpop.f32.mrf.mxu1 }
  0x94   :  { %v4008_v19 = vpop.f32.mrf.mxu2  ;;  %v197_v22 = vpop.f32.mrf.mxu0 }
  0x95   :  { %v4010_v21 = vpop.f32.mrf.mxu3  ;;  %v4012_v23 = vadd.f32 %v197_v22, %v105_v17  ;;  %v226_v27 = vpop.f32.mrf.mxu1 }
  0x96   :  { %v4014_v28 = vadd.f32 %v226_v27, %v106_v20 }
  0x9c   :  { %v255_v36 = vpop.f32.mrf.mxu2  ;;  %v200_v44 = vpop.f32.mrf.mxu0 }
  0x9d   :  { %v4021_v37 = vadd.f32 %v255_v36, %v4016_v32  ;;  %v284_v40 = vpop.f32.mrf.mxu3  ;;  %v4026_v46 = vadd.f32 %v200_v44, %v105_v17  ;;  %v229_v48 = vpop.f32.mrf.mxu1 }
  0x9e   :  { %v4024_v45 = vadd.f32 %v284_v40, %v4018_v33  ;;  %v4028_v50 = vadd.f32 %v229_v48, %v106_v20 }
  0xa4   :  { %v258_v51 = vpop.f32.mrf.mxu2  ;;  %v202_v56 = vpop.f32.mrf.mxu0 }
  0xa5   :  { %v4031_v54 = vadd.f32 %v258_v51, %v4016_v32  ;;  %v287_v55 = vpop.f32.mrf.mxu3  ;;  %v4036_v62 = vadd.f32 %v202_v56, %v105_v17  ;;  %v231_v3 = vpop.f32.mrf.mxu1 }
  0xa6   :  { %v4034_v61 = vadd.f32 %v287_v55, %v4018_v33  ;;  %v4038_v4 = vadd.f32 %v231_v3, %v106_v20 }
  0xa8   :  { %4390 = vst [vmem:[#allocation21_spill] sm:$0xff] %v4038_v4 }
  0xac   :  { %v260_v8 = vpop.f32.mrf.mxu2  ;;  %v205_v16 = vpop.f32.mrf.mxu0 }
  0xad   :  { %v4041_v9 = vadd.f32 %v260_v8, %v4016_v32  ;;  %v289_v10 = vpop.f32.mrf.mxu3  ;;  %v4046_v27 = vadd.f32 %v205_v16, %v105_v17  ;;  %v234_v36 = vpop.f32.mrf.mxu1 }
  0xae   :  { %v4044_v22 = vadd.f32 %v289_v10, %v4018_v33  ;;  %v4048_v40 = vadd.f32 %v234_v36, %v106_v20 }
  0xaf   :  { %4391 = vst [vmem:[#allocation22_spill] sm:$0xff] %v4041_v9 }
  0xb0   :  { %4392 = vst [vmem:[#allocation23_spill] sm:$0xff] %v4044_v22 }
  0xb1   :  { %4393 = vst [vmem:[#allocation24_spill] sm:$0xff] %v4046_v27 }
  0xb2   :  { %4394 = vst [vmem:[#allocation25_spill] sm:$0xff] %v4048_v40 }
  0xb4   :  { %v263_v44 = vpop.f32.mrf.mxu2  ;;  %v207_v55 = vpop.f32.mrf.mxu0 }
  0xb5   :  { %v4051_v48 = vadd.f32 %v263_v44, %v4016_v32  ;;  %v292_v51 = vpop.f32.mrf.mxu3  ;;  %v4056_v3 = vadd.f32 %v207_v55, %v105_v17  ;;  %v236_v8 = vpop.f32.mrf.mxu1 }
  0xb6   :  { %v4054_v56 = vadd.f32 %v292_v51, %v4018_v33  ;;  %v4058_v9 = vadd.f32 %v236_v8, %v106_v20 }
  0xb7   :  { %4395 = vst [vmem:[#allocation26_spill] sm:$0xff] %v4051_v48 }
  0xb8   :  { %4396 = vst [vmem:[#allocation27_spill] sm:$0xff] %v4054_v56 }
  0xb9   :  { %4397 = vst [vmem:[#allocation28_spill] sm:$0xff] %v4056_v3 }
  0xba   :  { %4398 = vst [vmem:[#allocation29_spill] sm:$0xff] %v4058_v9 }
  0xbc   :  { %v265_v10 = vpop.f32.mrf.mxu2  ;;  %v210_v40 = vpop.f32.mrf.mxu0 }
  0xbd   :  { %v4061_v16 = vadd.f32 %v265_v10, %v4016_v32  ;;  %v294_v36 = vpop.f32.mrf.mxu3  ;;  %v4066_v44 = vadd.f32 %v210_v40, %v105_v17  ;;  %v239_v48 = vpop.f32.mrf.mxu1 }
  0xbe   :  { %v4064_v27 = vadd.f32 %v294_v36, %v4018_v33  ;;  %v4068_v22 = vadd.f32 %v239_v48, %v106_v20  ;;  %v196_v36 = vadd.f32 %v195_v11, %v105_v17  ;;  %v283_v11 = vadd.f32 %v4010_v21, %v4018_v33 }
  0xbf   :  { %4399 = vst [vmem:[#allocation30_spill] sm:$0xff] %v4061_v16 }
  0xc0   :  { %4400 = vst [vmem:[#allocation31_spill] sm:$0xff] %v4064_v27 }
  0xc1   :  { %4401 = vst [vmem:[#allocation32_spill] sm:$0xff] %v4066_v44  ;;  %v225_v44 = vadd.f32 %v224_v15, %v106_v20 }
  0xc2   :  { %4402 = vst [vmem:[#allocation33_spill] sm:$0xff] %v4068_v22 }
  0xc4   :  { %v268_v51 = vpop.f32.mrf.mxu2  ;;  %v212_v9 = vpop.f32.mrf.mxu0 }
  0xc5   :  { %v4071_v55 = vadd.f32 %v268_v51, %v4016_v32  ;;  %v297_v8 = vpop.f32.mrf.mxu3  ;;  %v4076_v10 = vadd.f32 %v212_v9, %v105_v17  ;;  %v241_v16 = vpop.f32.mrf.mxu1 }
  0xc6   :  { %v4074_v3 = vadd.f32 %v297_v8, %v4018_v33  ;;  %v4078_v56 = vadd.f32 %v241_v16, %v106_v20  ;;  %v254_v16 = vadd.f32 %v4008_v19, %v4016_v32 }
  0xc7   :  { %4403 = vst [vmem:[#allocation34_spill] sm:$0xff] %v4071_v55 }
  0xc8   :  { %4404 = vst [vmem:[#allocation35_spill] sm:$0xff] %v4074_v3 }
  0xcc   :  { %v270_v40 = vpop.f32.mrf.mxu2  ;;  %v539_v27 = vpop.f32.mrf.mxu0 }
  0xcd   :  { %v4081_v48 = vadd.f32 %v270_v40, %v4016_v32  ;;  %v299_v22 = vpop.f32.mrf.mxu3  ;;  %v582_v55 = vadd.f32 %v539_v27, %v196_v36  ;;  %v552_v4 = vpop.f32.mrf.mxu1 }
  0xce   :  { %v4084_v51 = vadd.f32 %v299_v22, %v4018_v33  ;;  %v583_v8 = vadd.f32 %v552_v4, %v225_v44 }
  0xcf   :  { %4405 = vst [vmem:[#allocation36_spill] sm:$0xff] %v4081_v48  ;;  %v586_v3 = vmul.f32 0.5, %v582_v55 }
  0xd0   :  { %4406 = vst [vmem:[#allocation37_spill] sm:$0xff] %v4084_v51  ;;  %v590_v9 = vmul.f32 0.5, %v583_v8 }
  0xd1   :  { %3517 = vtanh.f32 %v586_v3 }
  0xd2   :  { %3519 = vtanh.f32 %v590_v9 }
  0xd4   :  { %v565_v15 = vpop.f32.mrf.mxu2  ;;  %v541_v40 = vpop.f32.mrf.mxu0 }
  0xd5   :  { %v584_v17 = vadd.f32 %v565_v15, %v254_v16  ;;  %v578_v20 = vpop.f32.mrf.mxu3  ;;  %v554_v22 = vpop.f32.mrf.mxu1 }
  0xd6   :  { %v585_v48 = vadd.f32 %v578_v20, %v283_v11 }
  0xd7   :  { %3521 = vtanh.f32 %v584_v17  ;;  %v3518_v27 = vpop.eup %3517 }
  0xd8   :  { %v595_v36 = vmul.f32 0.5, %v585_v48  ;;  %v3520_v4 = vpop.eup %3519  ;;  %v588_v44 = vmul.f32 0.5, %v3518_v27 }
  0xd9   :  { %v592_v55 = vmul.f32 0.5, %v3520_v4 }
  0xda   :  { %3523 = vtanh.f32 %v595_v36  ;;  %v589_v3 = vadd.f32 0.5, %v588_v44 }
  0xdb   :  { %v593_v8 = vadd.f32 0.5, %v592_v55 }
  0xdc   :  { %v567_v19 = vpop.f32.mrf.mxu2 }
  0xdd   :  { %v3522_v32 = vpop.eup %3521  ;;  %v580_v9 = vpop.f32.mrf.mxu3  ;;  %v599_v51 = vmul.f32 0.0, %v593_v8 }
  0xde   :  { %v600_v21 = vmul.f32 %v3522_v32, %v589_v3 }
  0xe0   :  { %v3524_v33 = vpop.eup %3523  ;;  %v4090_v16 = vadd.f32 %v600_v21, %v599_v51 }
  0xe1   :  { %v597_v11 = vmul.f32 0.5, %v3524_v33 }
  0xe2   :  { %3525 = vtanh.f32 %v4090_v16 }
  0xe3   :  { %v598_v15 = vadd.f32 0.5, %v597_v11 }
  0xe8   :  { %v3526_v17 = vpop.eup %3525 }
  0xe9   :  { %v603_v48 = vmul.f32 %v3526_v17, %v598_v15 }
  0xeb   :  { %v609_v20 = vpack.c.bf16 %v603_v48, %v603_v48 }
  0xed   :  { %618 = vmatmul.bf16.vlgmr.msra.gmra.mxu0 %v609_v20  ;;  %631 = vmatmul.bf16.vlgmr.msra.gmra.mxu1 %v609_v20 }
  0xee   :  { %644 = vmatmul.bf16.vlgmr.msra.gmra.mxu2 %v609_v20  ;;  %657 = vmatmul.bf16.vlgmr.msra.gmra.mxu3 %v609_v20 }
  0xef   :  { %770 = vmatpush.bf16.msra.mxu0 %v3820_v29  ;;  %783 = vmatpush.bf16.msra.mxu1 %v3822_v30 }
  0xf0   :  { %796 = vmatpush.bf16.msra.mxu2 %v3824_v34  ;;  %809 = vmatpush.bf16.msra.mxu3 %v3827_v38 }
  0xf3   :  { %771 = vmatpush.bf16.msra.mxu0 %v3829_v39  ;;  %784 = vmatpush.bf16.msra.mxu1 %v3833_v43 }
  0xf4   :  { %797 = vmatpush.bf16.msra.mxu2 %v3839_v49  ;;  %810 = vmatpush.bf16.msra.mxu3 %v3843_v52 }
  0xf7   :  { %772 = vmatpush.bf16.msra.mxu0 %v3845_v53  ;;  %785 = vmatpush.bf16.msra.mxu1 %v3848_v57 }
  0xf8   :  { %798 = vmatpush.bf16.msra.mxu2 %v3851_v63  ;;  %811 = vmatpush.bf16.msra.mxu3 %v3855_v0 }
  0xfb   :  { %773 = vmatpush.bf16.msra.mxu0 %v3857_v1  ;;  %786 = vmatpush.bf16.msra.mxu1 %v3860_v5 }
  0xfc   :  { %799 = vmatpush.bf16.msra.mxu2 %v3866_v12  ;;  %812 = vmatpush.bf16.msra.mxu3 %v3870_v13 }
  0xff   :  { %774 = vmatpush.bf16.msra.mxu0 %v3872_v14  ;;  %787 = vmatpush.bf16.msra.mxu1 %v3875_v18 }
 0x100   :  { %800 = vmatpush.bf16.msra.mxu2 %v3878_v24  ;;  %813 = vmatpush.bf16.msra.mxu3 %v3882_v25 }
 0x103   :  { %775 = vmatpush.bf16.msra.mxu0 %v3884_v26  ;;  %788 = vmatpush.bf16.msra.mxu1 %v3888_v31 }
 0x104   :  { %801 = vmatpush.bf16.msra.mxu2 %v3894_v35  ;;  %814 = vmatpush.bf16.msra.mxu3 %v3898_v41 }
 0x107   :  { %776 = vmatpush.bf16.msra.mxu0 %v3900_v42  ;;  %789 = vmatpush.bf16.msra.mxu1 %v3903_v47 }
 0x108   :  { %802 = vmatpush.bf16.msra.mxu2 %v3906_v58  ;;  %815 = vmatpush.bf16.msra.mxu3 %v3910_v59 }
 0x10b   :  { %777 = vmatpush.bf16.msra.mxu0 %v3912_v60  ;;  %790 = vmatpush.bf16.msra.mxu1 %v3915_v2 }
 0x10c   :  { %803 = vmatpush.bf16.msra.mxu2 %v3918_v6  ;;  %816 = vmatpush.bf16.msra.mxu3 %v3922_v7 }
 0x16a   :  { %v619_v51 = vpop.f32.mrf.mxu0  ;;  %v632_v40 = vpop.f32.mrf.mxu1 }
 0x16b   :  { %v662_v22 = vadd.f32 %v619_v51, %v4012_v23  ;;  %v663_v27 = vadd.f32 %v632_v40, %v4014_v28 }
 0x16d   :  { %v666_v36 = vmul.f32 0.5, %v662_v22  ;;  %v670_v4 = vmul.f32 0.5, %v663_v27 }
 0x16f   :  { %3527 = vtanh.f32 %v666_v36 }
 0x170   :  { %3529 = vtanh.f32 %v670_v4 }
 0x171   :  { %v645_v44 = vpop.f32.mrf.mxu2  ;;  %v658_v55 = vpop.f32.mrf.mxu3 }
 0x172   :  { %v664_v3 = vadd.f32 %v645_v44, %v4021_v37  ;;  %v665_v8 = vadd.f32 %v658_v55, %v4024_v45  ;;  %v621_v19 = vpop.f32.mrf.mxu0  ;;  %v634_v32 = vpop.f32.mrf.mxu1 }
 0x174   :  { %3531 = vtanh.f32 %v664_v3  ;;  %v675_v9 = vmul.f32 0.5, %v665_v8 }
 0x175   :  { %v3528_v21 = vpop.eup %3527 }
 0x176   :  { %v3530_v33 = vpop.eup %3529  ;;  %v668_v11 = vmul.f32 0.5, %v3528_v21  ;;  %3533 = vtanh.f32 %v675_v9 }
 0x177   :  { %v672_v23 = vmul.f32 0.5, %v3530_v33 }
 0x178   :  { %v669_v28 = vadd.f32 0.5, %v668_v11 }
 0x179   :  { %v673_v15 = vadd.f32 0.5, %v672_v23  ;;  %v647_v17 = vpop.f32.mrf.mxu2  ;;  %v660_v48 = vpop.f32.mrf.mxu3 }
 0x17a   :  { %v3532_v20 = vpop.eup %3531 }
 0x17b   :  { %v679_v51 = vmul.f32 %v673_v15, %v4090_v16  ;;  %v680_v40 = vmul.f32 %v3532_v20, %v669_v28 }
 0x17c   :  { %v3534_v37 = vpop.eup %3533 }
 0x17d   :  { %v4130_v22 = vadd.f32 %v680_v40, %v679_v51  ;;  %v677_v45 = vmul.f32 0.5, %v3534_v37 }
 0x17f   :  { %3535 = vtanh.f32 %v4130_v22  ;;  %v678_v27 = vadd.f32 0.5, %v677_v45 }
 0x185   :  { %v3536_v36 = vpop.eup %3535 }
 0x186   :  { %v683_v4 = vmul.f32 %v3536_v36, %v678_v27 }
 0x188   :  { %v689_v44 = vpack.c.bf16 %v683_v4, %v683_v4 }
 0x18a   :  { %698 = vmatmul.bf16.vlgmr.msrb.gmra.mxu0 %v689_v44  ;;  %711 = vmatmul.bf16.vlgmr.msrb.gmra.mxu1 %v689_v44 }
 0x18b   :  { %724 = vmatmul.bf16.vlgmr.msrb.gmra.mxu2 %v689_v44  ;;  %737 = vmatmul.bf16.vlgmr.msrb.gmra.mxu3 %v689_v44 }
 0x18c   :  { %850 = vmatpush.bf16.msrb.mxu0 %v3820_v29  ;;  %863 = vmatpush.bf16.msrb.mxu1 %v3822_v30 }
 0x18d   :  { %876 = vmatpush.bf16.msrb.mxu2 %v3824_v34  ;;  %889 = vmatpush.bf16.msrb.mxu3 %v3827_v38 }
 0x190   :  { %851 = vmatpush.bf16.msrb.mxu0 %v3829_v39  ;;  %864 = vmatpush.bf16.msrb.mxu1 %v3833_v43 }
 0x191   :  { %877 = vmatpush.bf16.msrb.mxu2 %v3839_v49  ;;  %890 = vmatpush.bf16.msrb.mxu3 %v3843_v52 }
 0x194   :  { %852 = vmatpush.bf16.msrb.mxu0 %v3845_v53  ;;  %865 = vmatpush.bf16.msrb.mxu1 %v3848_v57 }
 0x195   :  { %878 = vmatpush.bf16.msrb.mxu2 %v3851_v63  ;;  %891 = vmatpush.bf16.msrb.mxu3 %v3855_v0 }
 0x198   :  { %853 = vmatpush.bf16.msrb.mxu0 %v3857_v1  ;;  %866 = vmatpush.bf16.msrb.mxu1 %v3860_v5 }
 0x199   :  { %879 = vmatpush.bf16.msrb.mxu2 %v3866_v12  ;;  %892 = vmatpush.bf16.msrb.mxu3 %v3870_v13 }
 0x19c   :  { %854 = vmatpush.bf16.msrb.mxu0 %v3872_v14  ;;  %867 = vmatpush.bf16.msrb.mxu1 %v3875_v18 }
 0x19d   :  { %880 = vmatpush.bf16.msrb.mxu2 %v3878_v24  ;;  %893 = vmatpush.bf16.msrb.mxu3 %v3882_v25 }
 0x1a0   :  { %855 = vmatpush.bf16.msrb.mxu0 %v3884_v26  ;;  %868 = vmatpush.bf16.msrb.mxu1 %v3888_v31 }
 0x1a1   :  { %881 = vmatpush.bf16.msrb.mxu2 %v3894_v35  ;;  %894 = vmatpush.bf16.msrb.mxu3 %v3898_v41 }
 0x1a4   :  { %856 = vmatpush.bf16.msrb.mxu0 %v3900_v42  ;;  %869 = vmatpush.bf16.msrb.mxu1 %v3903_v47 }
 0x1a5   :  { %882 = vmatpush.bf16.msrb.mxu2 %v3906_v58  ;;  %895 = vmatpush.bf16.msrb.mxu3 %v3910_v59 }
 0x1a8   :  { %857 = vmatpush.bf16.msrb.mxu0 %v3912_v60  ;;  %870 = vmatpush.bf16.msrb.mxu1 %v3915_v2 }
 0x1a9   :  { %883 = vmatpush.bf16.msrb.mxu2 %v3918_v6  ;;  %896 = vmatpush.bf16.msrb.mxu3 %v3922_v7 }
 0x207   :  { %v699_v16 = vpop.f32.mrf.mxu0  ;;  %v712_v55 = vpop.f32.mrf.mxu1 }
 0x208   :  { %v742_v3 = vadd.f32 %v699_v16, %v4026_v46  ;;  %v743_v8 = vadd.f32 %v712_v55, %v4028_v50 }
 0x20a   :  { %v746_v19 = vmul.f32 0.5, %v742_v3  ;;  %v750_v32 = vmul.f32 0.5, %v743_v8 }
 0x20c   :  { %3537 = vtanh.f32 %v746_v19 }
 0x20d   :  { %3539 = vtanh.f32 %v750_v32  ;;  %v4407_v32 = vld [vmem:[#allocation21_spill] sm:$0xff] }
 0x20e   :  { %v725_v9 = vpop.f32.mrf.mxu2  ;;  %v738_v21 = vpop.f32.mrf.mxu3 }
 0x20f   :  { %v744_v33 = vadd.f32 %v725_v9, %v4031_v54  ;;  %v745_v11 = vadd.f32 %v738_v21, %v4034_v61  ;;  %v701_v23 = vpop.f32.mrf.mxu0  ;;  %v714_v28 = vpop.f32.mrf.mxu1 }
 0x210   :  { %v4408_v28 = vld [vmem:[#allocation22_spill] sm:$0xff] }
 0x211   :  { %3541 = vtanh.f32 %v744_v33  ;;  %v755_v15 = vmul.f32 0.5, %v745_v11 }
 0x212   :  { %v3538_v17 = vpop.eup %3537 }
 0x213   :  { %v3540_v48 = vpop.eup %3539  ;;  %v748_v20 = vmul.f32 0.5, %v3538_v17  ;;  %3543 = vtanh.f32 %v755_v15  ;;  %v4409_v17 = vld [vmem:[#allocation23_spill] sm:$0xff] }
 0x214   :  { %v752_v46 = vmul.f32 0.5, %v3540_v48 }
 0x215   :  { %v749_v50 = vadd.f32 0.5, %v748_v20 }
 0x216   :  { %v753_v51 = vadd.f32 0.5, %v752_v46  ;;  %v727_v40 = vpop.f32.mrf.mxu2  ;;  %v740_v37 = vpop.f32.mrf.mxu3 }
 0x217   :  { %v3542_v45 = vpop.eup %3541 }
 0x218   :  { %v759_v27 = vmul.f32 %v753_v51, %v4130_v22  ;;  %v760_v36 = vmul.f32 %v3542_v45, %v749_v50 }
 0x219   :  { %v3544_v54 = vpop.eup %3543 }
 0x21a   :  { %v4170_v4 = vadd.f32 %v760_v36, %v759_v27  ;;  %v757_v61 = vmul.f32 0.5, %v3544_v54 }
 0x21c   :  { %3545 = vtanh.f32 %v4170_v4  ;;  %v758_v44 = vadd.f32 0.5, %v757_v61 }
 0x222   :  { %v3546_v16 = vpop.eup %3545 }
 0x223   :  { %v763_v55 = vmul.f32 %v3546_v16, %v758_v44 }
 0x225   :  { %v769_v3 = vpack.c.bf16 %v763_v55, %v763_v55 }
 0x227   :  { %778 = vmatmul.bf16.vlgmr.msra.gmra.mxu0 %v769_v3  ;;  %791 = vmatmul.bf16.vlgmr.msra.gmra.mxu1 %v769_v3 }
 0x228   :  { %804 = vmatmul.bf16.vlgmr.msra.gmra.mxu2 %v769_v3  ;;  %817 = vmatmul.bf16.vlgmr.msra.gmra.mxu3 %v769_v3 }
 0x229   :  { %930 = vmatpush.bf16.msra.mxu0 %v3820_v29  ;;  %943 = vmatpush.bf16.msra.mxu1 %v3822_v30 }
 0x22a   :  { %956 = vmatpush.bf16.msra.mxu2 %v3824_v34  ;;  %969 = vmatpush.bf16.msra.mxu3 %v3827_v38 }
 0x22d   :  { %931 = vmatpush.bf16.msra.mxu0 %v3829_v39  ;;  %944 = vmatpush.bf16.msra.mxu1 %v3833_v43 }
 0x22e   :  { %957 = vmatpush.bf16.msra.mxu2 %v3839_v49  ;;  %970 = vmatpush.bf16.msra.mxu3 %v3843_v52 }
 0x231   :  { %932 = vmatpush.bf16.msra.mxu0 %v3845_v53  ;;  %945 = vmatpush.bf16.msra.mxu1 %v3848_v57 }
 0x232   :  { %958 = vmatpush.bf16.msra.mxu2 %v3851_v63  ;;  %971 = vmatpush.bf16.msra.mxu3 %v3855_v0 }
 0x235   :  { %933 = vmatpush.bf16.msra.mxu0 %v3857_v1  ;;  %946 = vmatpush.bf16.msra.mxu1 %v3860_v5 }
 0x236   :  { %959 = vmatpush.bf16.msra.mxu2 %v3866_v12  ;;  %972 = vmatpush.bf16.msra.mxu3 %v3870_v13 }
 0x239   :  { %934 = vmatpush.bf16.msra.mxu0 %v3872_v14  ;;  %947 = vmatpush.bf16.msra.mxu1 %v3875_v18 }
 0x23a   :  { %960 = vmatpush.bf16.msra.mxu2 %v3878_v24  ;;  %973 = vmatpush.bf16.msra.mxu3 %v3882_v25 }
 0x23d   :  { %935 = vmatpush.bf16.msra.mxu0 %v3884_v26  ;;  %948 = vmatpush.bf16.msra.mxu1 %v3888_v31 }
 0x23e   :  { %961 = vmatpush.bf16.msra.mxu2 %v3894_v35  ;;  %974 = vmatpush.bf16.msra.mxu3 %v3898_v41 }
 0x241   :  { %936 = vmatpush.bf16.msra.mxu0 %v3900_v42  ;;  %949 = vmatpush.bf16.msra.mxu1 %v3903_v47 }
 0x242   :  { %962 = vmatpush.bf16.msra.mxu2 %v3906_v58  ;;  %975 = vmatpush.bf16.msra.mxu3 %v3910_v59 }
 0x245   :  { %937 = vmatpush.bf16.msra.mxu0 %v3912_v60  ;;  %950 = vmatpush.bf16.msra.mxu1 %v3915_v2 }
 0x246   :  { %963 = vmatpush.bf16.msra.mxu2 %v3918_v6  ;;  %976 = vmatpush.bf16.msra.mxu3 %v3922_v7 }
 0x2a4   :  { %v779_v22 = vpop.f32.mrf.mxu0  ;;  %v792_v8 = vpop.f32.mrf.mxu1 }
 0x2a5   :  { %v822_v19 = vadd.f32 %v779_v22, %v4036_v62  ;;  %v823_v9 = vadd.f32 %v792_v8, %v4407_v32 }
 0x2a7   :  { %v826_v21 = vmul.f32 0.5, %v822_v19  ;;  %v830_v33 = vmul.f32 0.5, %v823_v9 }
 0x2a9   :  { %3547 = vtanh.f32 %v826_v21 }
 0x2aa   :  { %3549 = vtanh.f32 %v830_v33  ;;  %v4410_v33 = vld [vmem:[#allocation24_spill] sm:$0xff] }
 0x2ab   :  { %v805_v11 = vpop.f32.mrf.mxu2  ;;  %v818_v23 = vpop.f32.mrf.mxu3 }
 0x2ac   :  { %v824_v15 = vadd.f32 %v805_v11, %v4408_v28  ;;  %v825_v48 = vadd.f32 %v818_v23, %v4409_v17  ;;  %v781_v20 = vpop.f32.mrf.mxu0  ;;  %v794_v46 = vpop.f32.mrf.mxu1  ;;  %v4411_v23 = vld [vmem:[#allocation25_spill] sm:$0xff] }
 0x2ad   :  { %v4412_v46 = vld [vmem:[#allocation26_spill] sm:$0xff] }
 0x2ae   :  { %3551 = vtanh.f32 %v824_v15  ;;  %v835_v50 = vmul.f32 0.5, %v825_v48 }
 0x2af   :  { %v3548_v51 = vpop.eup %3547 }
 0x2b0   :  { %v3550_v40 = vpop.eup %3549  ;;  %v828_v37 = vmul.f32 0.5, %v3548_v51  ;;  %3553 = vtanh.f32 %v835_v50  ;;  %v4413_v51 = vld [vmem:[#allocation27_spill] sm:$0xff] }
 0x2b1   :  { %v832_v62 = vmul.f32 0.5, %v3550_v40 }
 0x2b2   :  { %v829_v45 = vadd.f32 0.5, %v828_v37 }
 0x2b3   :  { %v833_v27 = vadd.f32 0.5, %v832_v62  ;;  %v807_v36 = vpop.f32.mrf.mxu2  ;;  %v820_v54 = vpop.f32.mrf.mxu3 }
 0x2b4   :  { %v3552_v61 = vpop.eup %3551 }
 0x2b5   :  { %v839_v44 = vmul.f32 %v833_v27, %v4170_v4  ;;  %v840_v16 = vmul.f32 %v3552_v61, %v829_v45 }
 0x2b6   :  { %v3554_v55 = vpop.eup %3553 }
 0x2b7   :  { %v4210_v3 = vadd.f32 %v840_v16, %v839_v44  ;;  %v837_v22 = vmul.f32 0.5, %v3554_v55 }
 0x2b9   :  { %3555 = vtanh.f32 %v4210_v3  ;;  %v838_v8 = vadd.f32 0.5, %v837_v22 }
 0x2bf   :  { %v3556_v19 = vpop.eup %3555 }
 0x2c0   :  { %v843_v32 = vmul.f32 %v3556_v19, %v838_v8 }
 0x2c2   :  { %v849_v9 = vpack.c.bf16 %v843_v32, %v843_v32 }
 0x2c4   :  { %858 = vmatmul.bf16.vlgmr.msrb.gmra.mxu0 %v849_v9  ;;  %871 = vmatmul.bf16.vlgmr.msrb.gmra.mxu1 %v849_v9 }
 0x2c5   :  { %884 = vmatmul.bf16.vlgmr.msrb.gmra.mxu2 %v849_v9  ;;  %897 = vmatmul.bf16.vlgmr.msrb.gmra.mxu3 %v849_v9 }
 0x2c6   :  { %1010 = vmatpush.bf16.msrb.mxu0 %v3820_v29  ;;  %1023 = vmatpush.bf16.msrb.mxu1 %v3822_v30 }
 0x2c7   :  { %1036 = vmatpush.bf16.msrb.mxu2 %v3824_v34  ;;  %1049 = vmatpush.bf16.msrb.mxu3 %v3827_v38 }
 0x2ca   :  { %1011 = vmatpush.bf16.msrb.mxu0 %v3829_v39  ;;  %1024 = vmatpush.bf16.msrb.mxu1 %v3833_v43 }
 0x2cb   :  { %1037 = vmatpush.bf16.msrb.mxu2 %v3839_v49  ;;  %1050 = vmatpush.bf16.msrb.mxu3 %v3843_v52 }
 0x2ce   :  { %1012 = vmatpush.bf16.msrb.mxu0 %v3845_v53  ;;  %1025 = vmatpush.bf16.msrb.mxu1 %v3848_v57 }
 0x2cf   :  { %1038 = vmatpush.bf16.msrb.mxu2 %v3851_v63  ;;  %1051 = vmatpush.bf16.msrb.mxu3 %v3855_v0 }
 0x2d2   :  { %1013 = vmatpush.bf16.msrb.mxu0 %v3857_v1  ;;  %1026 = vmatpush.bf16.msrb.mxu1 %v3860_v5 }
 0x2d3   :  { %1039 = vmatpush.bf16.msrb.mxu2 %v3866_v12  ;;  %1052 = vmatpush.bf16.msrb.mxu3 %v3870_v13 }
 0x2d6   :  { %1014 = vmatpush.bf16.msrb.mxu0 %v3872_v14  ;;  %1027 = vmatpush.bf16.msrb.mxu1 %v3875_v18 }
 0x2d7   :  { %1040 = vmatpush.bf16.msrb.mxu2 %v3878_v24  ;;  %1053 = vmatpush.bf16.msrb.mxu3 %v3882_v25 }
 0x2da   :  { %1015 = vmatpush.bf16.msrb.mxu0 %v3884_v26  ;;  %1028 = vmatpush.bf16.msrb.mxu1 %v3888_v31 }
 0x2db   :  { %1041 = vmatpush.bf16.msrb.mxu2 %v3894_v35  ;;  %1054 = vmatpush.bf16.msrb.mxu3 %v3898_v41 }
 0x2de   :  { %1016 = vmatpush.bf16.msrb.mxu0 %v3900_v42  ;;  %1029 = vmatpush.bf16.msrb.mxu1 %v3903_v47 }
 0x2df   :  { %1042 = vmatpush.bf16.msrb.mxu2 %v3906_v58  ;;  %1055 = vmatpush.bf16.msrb.mxu3 %v3910_v59 }
 0x2e2   :  { %1017 = vmatpush.bf16.msrb.mxu0 %v3912_v60  ;;  %1030 = vmatpush.bf16.msrb.mxu1 %v3915_v2 }
 0x2e3   :  { %1043 = vmatpush.bf16.msrb.mxu2 %v3918_v6  ;;  %1056 = vmatpush.bf16.msrb.mxu3 %v3922_v7 }
 0x341   :  { %v859_v4 = vpop.f32.mrf.mxu0  ;;  %v872_v21 = vpop.f32.mrf.mxu1 }
 0x342   :  { %v902_v11 = vadd.f32 %v859_v4, %v4410_v33  ;;  %v903_v28 = vadd.f32 %v872_v21, %v4411_v23 }
 0x344   :  { %v906_v15 = vmul.f32 0.5, %v902_v11  ;;  %v910_v17 = vmul.f32 0.5, %v903_v28 }
 0x346   :  { %3557 = vtanh.f32 %v906_v15 }
 0x347   :  { %3559 = vtanh.f32 %v910_v17 }
 0x348   :  { %v885_v48 = vpop.f32.mrf.mxu2  ;;  %v898_v20 = vpop.f32.mrf.mxu3 }
 0x349   :  { %v904_v50 = vadd.f32 %v885_v48, %v4412_v46  ;;  %v905_v40 = vadd.f32 %v898_v20, %v4413_v51  ;;  %v861_v37 = vpop.f32.mrf.mxu0  ;;  %v874_v62 = vpop.f32.mrf.mxu1  ;;  %v4418_v46 = vld [vmem:[#allocation32_spill] sm:$0xff]  ;;  %v4419_v51 = vld [vmem:[#allocation33_spill] sm:$0xff] }
 0x34b   :  { %3561 = vtanh.f32 %v904_v50  ;;  %v915_v45 = vmul.f32 0.5, %v905_v40 }
 0x34c   :  { %v3558_v27 = vpop.eup %3557 }
 0x34d   :  { %v3560_v36 = vpop.eup %3559  ;;  %v908_v54 = vmul.f32 0.5, %v3558_v27  ;;  %3563 = vtanh.f32 %v915_v45 }
 0x34e   :  { %v912_v61 = vmul.f32 0.5, %v3560_v36  ;;  %v4420_v36 = vld [vmem:[#allocation34_spill] sm:$0xff] }
 0x34f   :  { %v909_v44 = vadd.f32 0.5, %v908_v54 }
 0x350   :  { %v913_v16 = vadd.f32 0.5, %v912_v61  ;;  %v887_v55 = vpop.f32.mrf.mxu2  ;;  %v900_v22 = vpop.f32.mrf.mxu3  ;;  %v4421_v61 = vld [vmem:[#allocation35_spill] sm:$0xff] }
 0x351   :  { %v3562_v8 = vpop.eup %3561 }
 0x352   :  { %v919_v19 = vmul.f32 %v913_v16, %v4210_v3  ;;  %v920_v32 = vmul.f32 %v3562_v8, %v909_v44 }
 0x353   :  { %v3564_v9 = vpop.eup %3563 }
 0x354   :  { %v4250_v4 = vadd.f32 %v920_v32, %v919_v19  ;;  %v917_v21 = vmul.f32 0.5, %v3564_v9 }
 0x356   :  { %3565 = vtanh.f32 %v4250_v4  ;;  %v918_v33 = vadd.f32 0.5, %v917_v21 }
 0x35c   :  { %v3566_v11 = vpop.eup %3565 }
 0x35d   :  { %v923_v23 = vmul.f32 %v3566_v11, %v918_v33 }
 0x35f   :  { %v929_v28 = vpack.c.bf16 %v923_v23, %v923_v23 }
 0x361   :  { %938 = vmatmul.bf16.vlgmr.msra.gmra.mxu0 %v929_v28  ;;  %951 = vmatmul.bf16.vlgmr.msra.gmra.mxu1 %v929_v28 }
 0x362   :  { %964 = vmatmul.bf16.vlgmr.msra.gmra.mxu2 %v929_v28  ;;  %977 = vmatmul.bf16.vlgmr.msra.gmra.mxu3 %v929_v28 }
 0x363   :  { %1090 = vmatpush.bf16.msra.mxu0 %v3820_v29  ;;  %1103 = vmatpush.bf16.msra.mxu1 %v3822_v30 }
 0x364   :  { %1116 = vmatpush.bf16.msra.mxu2 %v3824_v34  ;;  %1129 = vmatpush.bf16.msra.mxu3 %v3827_v38  ;;  %v4414_v34 = vld [vmem:[#allocation28_spill] sm:$0xff] }
 0x367   :  { %1091 = vmatpush.bf16.msra.mxu0 %v3829_v39  ;;  %1104 = vmatpush.bf16.msra.mxu1 %v3833_v43  ;;  %v4415_v39 = vld [vmem:[#allocation29_spill] sm:$0xff] }
 0x368   :  { %1117 = vmatpush.bf16.msra.mxu2 %v3839_v49  ;;  %1130 = vmatpush.bf16.msra.mxu3 %v3843_v52 }
 0x36b   :  { %1092 = vmatpush.bf16.msra.mxu0 %v3845_v53  ;;  %1105 = vmatpush.bf16.msra.mxu1 %v3848_v57 }
 0x36c   :  { %1118 = vmatpush.bf16.msra.mxu2 %v3851_v63  ;;  %1131 = vmatpush.bf16.msra.mxu3 %v3855_v0  ;;  %v4416_v63 = vld [vmem:[#allocation30_spill] sm:$0xff] }
 0x36f   :  { %1093 = vmatpush.bf16.msra.mxu0 %v3857_v1  ;;  %1106 = vmatpush.bf16.msra.mxu1 %v3860_v5  ;;  %v4417_v1 = vld [vmem:[#allocation31_spill] sm:$0xff] }
 0x370   :  { %1119 = vmatpush.bf16.msra.mxu2 %v3866_v12  ;;  %1132 = vmatpush.bf16.msra.mxu3 %v3870_v13 }
 0x373   :  { %1094 = vmatpush.bf16.msra.mxu0 %v3872_v14  ;;  %1107 = vmatpush.bf16.msra.mxu1 %v3875_v18 }
 0x374   :  { %1120 = vmatpush.bf16.msra.mxu2 %v3878_v24  ;;  %1133 = vmatpush.bf16.msra.mxu3 %v3882_v25 }
 0x377   :  { %1095 = vmatpush.bf16.msra.mxu0 %v3884_v26  ;;  %1108 = vmatpush.bf16.msra.mxu1 %v3888_v31 }
 0x378   :  { %1121 = vmatpush.bf16.msra.mxu2 %v3894_v35  ;;  %1134 = vmatpush.bf16.msra.mxu3 %v3898_v41 }
 0x37b   :  { %1096 = vmatpush.bf16.msra.mxu0 %v3900_v42  ;;  %1109 = vmatpush.bf16.msra.mxu1 %v3903_v47 }
 0x37c   :  { %1122 = vmatpush.bf16.msra.mxu2 %v3906_v58  ;;  %1135 = vmatpush.bf16.msra.mxu3 %v3910_v59 }
 0x37f   :  { %1097 = vmatpush.bf16.msra.mxu0 %v3912_v60  ;;  %1110 = vmatpush.bf16.msra.mxu1 %v3915_v2 }
 0x380   :  { %1123 = vmatpush.bf16.msra.mxu2 %v3918_v6  ;;  %1136 = vmatpush.bf16.msra.mxu3 %v3922_v7 }
 0x3de   :  { %v939_v29 = vpop.f32.mrf.mxu0  ;;  %v952_v30 = vpop.f32.mrf.mxu1 }
 0x3df   :  { %v982_v38 = vadd.f32 %v939_v29, %v4414_v34  ;;  %v983_v43 = vadd.f32 %v952_v30, %v4415_v39 }
 0x3e1   :  { %v986_v49 = vmul.f32 0.5, %v982_v38  ;;  %v990_v52 = vmul.f32 0.5, %v983_v43 }
 0x3e3   :  { %3567 = vtanh.f32 %v986_v49 }
 0x3e4   :  { %3569 = vtanh.f32 %v990_v52 }
 0x3e5   :  { %v965_v53 = vpop.f32.mrf.mxu2  ;;  %v978_v57 = vpop.f32.mrf.mxu3 }
 0x3e6   :  { %v984_v0 = vadd.f32 %v965_v53, %v4416_v63  ;;  %v985_v5 = vadd.f32 %v978_v57, %v4417_v1  ;;  %v941_v12 = vpop.f32.mrf.mxu0  ;;  %v954_v13 = vpop.f32.mrf.mxu1 }
 0x3e8   :  { %3571 = vtanh.f32 %v984_v0  ;;  %v995_v14 = vmul.f32 0.5, %v985_v5 }
 0x3e9   :  { %v3568_v18 = vpop.eup %3567 }
 0x3ea   :  { %v3570_v24 = vpop.eup %3569  ;;  %v988_v25 = vmul.f32 0.5, %v3568_v18  ;;  %3573 = vtanh.f32 %v995_v14  ;;  %v4422_v14 = vld [vmem:[#allocation36_spill] sm:$0xff] }
 0x3eb   :  { %v992_v26 = vmul.f32 0.5, %v3570_v24  ;;  %v4423_v24 = vld [vmem:[#allocation37_spill] sm:$0xff] }
 0x3ec   :  { %v989_v31 = vadd.f32 0.5, %v988_v25 }
 0x3ed   :  { %v993_v35 = vadd.f32 0.5, %v992_v26  ;;  %v967_v41 = vpop.f32.mrf.mxu2  ;;  %v980_v42 = vpop.f32.mrf.mxu3 }
 0x3ee   :  { %v3572_v47 = vpop.eup %3571 }
 0x3ef   :  { %v999_v58 = vmul.f32 %v993_v35, %v4250_v4  ;;  %v1000_v59 = vmul.f32 %v3572_v47, %v989_v31 }
 0x3f0   :  { %v3574_v60 = vpop.eup %3573 }
 0x3f1   :  { %v1001_v2 = vadd.f32 %v1000_v59, %v999_v58  ;;  %v997_v6 = vmul.f32 0.5, %v3574_v60 }
 0x3f3   :  { %3575 = vtanh.f32 %v1001_v2  ;;  %v998_v7 = vadd.f32 0.5, %v997_v6 }
 0x3f9   :  { %v3576_v3 = vpop.eup %3575 }
 0x3fa   :  { %v1003_v15 = vmul.f32 %v3576_v3, %v998_v7 }
 0x3fc   :  { %v1009_v17 = vpack.c.bf16 %v1003_v15, %v1003_v15 }
 0x3fe   :  { %1018 = vmatmul.bf16.vlgmr.msrb.gmra.mxu0 %v1009_v17  ;;  %1031 = vmatmul.bf16.vlgmr.msrb.gmra.mxu1 %v1009_v17 }
 0x3ff   :  { %1044 = vmatmul.bf16.vlgmr.msrb.gmra.mxu2 %v1009_v17  ;;  %1057 = vmatmul.bf16.vlgmr.msrb.gmra.mxu3 %v1009_v17 }
 0x47b   :  { %v1019_v48 = vpop.f32.mrf.mxu0  ;;  %v1032_v20 = vpop.f32.mrf.mxu1 }
 0x47c   :  { %v1062_v50 = vadd.f32 %v1019_v48, %v4418_v46  ;;  %v1063_v40 = vadd.f32 %v1032_v20, %v4419_v51 }
 0x47e   :  { %v1066_v37 = vmul.f32 0.5, %v1062_v50  ;;  %v1070_v62 = vmul.f32 0.5, %v1063_v40 }
 0x480   :  { %3577 = vtanh.f32 %v1066_v37 }
 0x481   :  { %3579 = vtanh.f32 %v1070_v62 }
 0x482   :  { %v1045_v45 = vpop.f32.mrf.mxu2  ;;  %v1058_v27 = vpop.f32.mrf.mxu3 }
 0x483   :  { %v1064_v54 = vadd.f32 %v1045_v45, %v4420_v36  ;;  %v1065_v44 = vadd.f32 %v1058_v27, %v4421_v61  ;;  %v1021_v16 = vpop.f32.mrf.mxu0  ;;  %v1034_v55 = vpop.f32.mrf.mxu1 }
 0x485   :  { %3581 = vtanh.f32 %v1064_v54  ;;  %v1075_v22 = vmul.f32 0.5, %v1065_v44 }
 0x486   :  { %v3578_v8 = vpop.eup %3577 }
 0x487   :  { %v3580_v19 = vpop.eup %3579  ;;  %v1068_v32 = vmul.f32 0.5, %v3578_v8  ;;  %3583 = vtanh.f32 %v1075_v22 }
 0x488   :  { %v1072_v9 = vmul.f32 0.5, %v3580_v19 }
 0x489   :  { %v1069_v4 = vadd.f32 0.5, %v1068_v32 }
 0x48a   :  { %v1073_v21 = vadd.f32 0.5, %v1072_v9  ;;  %v1047_v33 = vpop.f32.mrf.mxu2  ;;  %v1060_v11 = vpop.f32.mrf.mxu3 }
 0x48b   :  { %v3582_v23 = vpop.eup %3581 }
 0x48c   :  { %v1079_v28 = vmul.f32 %v1073_v21, %v1001_v2  ;;  %v1080_v29 = vmul.f32 %v3582_v23, %v1069_v4 }
 0x48d   :  { %v3584_v30 = vpop.eup %3583 }
 0x48e   :  { %v1081_v34 = vadd.f32 %v1080_v29, %v1079_v28  ;;  %v1077_v38 = vmul.f32 0.5, %v3584_v30 }
 0x490   :  { %3585 = vtanh.f32 %v1081_v34  ;;  %v1078_v39 = vadd.f32 0.5, %v1077_v38 }
 0x496   :  { %v3586_v43 = vpop.eup %3585 }
 0x497   :  { %v1083_v49 = vmul.f32 %v3586_v43, %v1078_v39 }
 0x499   :  { %v1089_v52 = vpack.c.bf16 %v1083_v49, %v1083_v49 }
 0x49b   :  { %1098 = vmatmul.bf16.vlgmr.msra.gmra.mxu0 %v1089_v52  ;;  %1111 = vmatmul.bf16.vlgmr.msra.gmra.mxu1 %v1089_v52 }
 0x49c   :  { %1124 = vmatmul.bf16.vlgmr.msra.gmra.mxu2 %v1089_v52  ;;  %1137 = vmatmul.bf16.vlgmr.msra.gmra.mxu3 %v1089_v52 }
 0x518   :  { %v1099_v53 = vpop.f32.mrf.mxu0  ;;  %v1112_v57 = vpop.f32.mrf.mxu1 }
 0x519   :  { %v1142_v63 = vadd.f32 %v1099_v53, %v4076_v10  ;;  %v1143_v0 = vadd.f32 %v1112_v57, %v4078_v56 }
 0x51b   :  { %v1146_v1 = vmul.f32 0.5, %v1142_v63  ;;  %v1150_v5 = vmul.f32 0.5, %v1143_v0 }
 0x51d   :  { %3587 = vtanh.f32 %v1146_v1 }
 0x51e   :  { %3589 = vtanh.f32 %v1150_v5 }
 0x51f   :  { %v1125_v12 = vpop.f32.mrf.mxu2  ;;  %v1138_v13 = vpop.f32.mrf.mxu3 }
 0x520   :  { %v1144_v18 = vadd.f32 %v1125_v12, %v4422_v14  ;;  %v1145_v25 = vadd.f32 %v1138_v13, %v4423_v24  ;;  %v1101_v26 = vpop.f32.mrf.mxu0  ;;  %v1114_v31 = vpop.f32.mrf.mxu1 }
 0x522   :  { %3591 = vtanh.f32 %v1144_v18  ;;  %v1155_v35 = vmul.f32 0.5, %v1145_v25 }
 0x523   :  { %v3588_v41 = vpop.eup %3587 }
 0x524   :  { %v3590_v42 = vpop.eup %3589  ;;  %v1148_v47 = vmul.f32 0.5, %v3588_v41  ;;  %3593 = vtanh.f32 %v1155_v35 }
 0x525   :  { %v1152_v10 = vmul.f32 0.5, %v3590_v42 }
 0x526   :  { %v1149_v56 = vadd.f32 0.5, %v1148_v47 }
 0x527   :  { %v1153_v58 = vadd.f32 0.5, %v1152_v10  ;;  %v1127_v59 = vpop.f32.mrf.mxu2  ;;  %v1140_v60 = vpop.f32.mrf.mxu3 }
 0x528   :  { %v3592_v2 = vpop.eup %3591 }
 0x529   :  { %v1159_v6 = vmul.f32 %v1153_v58, %v1081_v34  ;;  %v1160_v7 = vmul.f32 %v3592_v2, %v1149_v56 }
 0x52a   :  { %v3594_v3 = vpop.eup %3593 }
 0x52b   :  { %v1161_v15 = vadd.f32 %v1160_v7, %v1159_v6  ;;  %v1157_v17 = vmul.f32 0.5, %v3594_v3 }
 0x52d   :  { %3595 = vtanh.f32 %v1161_v15  ;;  %v1158_v48 = vadd.f32 0.5, %v1157_v17 }
 0x533   :  { %v3596_v20 = vpop.eup %3595 }
 0x534   :  { %v4307_v46 = vmul.f32 %v3596_v20, %v1158_v48 }
 0x535   :  { %3698 = dma.done.wait [#allocation6], 4096 }
 0x536   :  { %3699 = vsyncadd [#allocation6], 4294963200  ;;  %v2817_v50 = vld [vmem:[#allocation3 + $0xe0] sm:$0xf]  ;;  %v3388_v51 = vld [vmem:[#allocation3 + $0xec] sm:$0xf0] }
 0x537   :  { %v3386_v40 = vld [vmem:[#allocation3 + $0xe4] sm:$0xf]  ;;  %v2818_v37 = vor.u32 %v3388_v51, %v2817_v50  ;;  %v2819_v62 = vld [vmem:[#allocation3 + $0xf0] sm:$0xf0]  ;;  %v2825_v45 = vld [vmem:[#allocation3 + $0xe8] sm:$0xf] }
 0x538   :  { %v3389_v27 = vld [vmem:[#allocation3 + $0xf4] sm:$0xf0]  ;;  %v2822_v36 = vor.u32 %v3386_v40, %v2819_v62  ;;  %v3387_v61 = vld [vmem:[#allocation3 + $0xec] sm:$0xf]  ;;  %v2827_v44 = vld [vmem:[#allocation3 + $0xf8] sm:$0xf0] }
 0x539   :  { %v2826_v54 = vor.u32 %v3389_v27, %v2825_v45  ;;  %v2801_v16 = vld [vmem:[#allocation3 + $0xc0] sm:$0xf]  ;;  %1371 = vmatpush.bf16.msrb.mxu0 %v2818_v37  ;;  %v2830_v55 = vor.u32 %v3387_v61, %v2827_v44  ;;  %v3384_v22 = vld [vmem:[#allocation3 + $0xcc] sm:$0xf0]  ;;  %v3382_v8 = vld [vmem:[#allocation3 + $0xc4] sm:$0xf] }
 0x53a   :  { %v2803_v19 = vld [vmem:[#allocation3 + $0xd0] sm:$0xf0]  ;;  %1384 = vmatpush.bf16.msrb.mxu1 %v2822_v36  ;;  %v2802_v32 = vor.u32 %v3384_v22, %v2801_v16  ;;  %v2809_v4 = vld [vmem:[#allocation3 + $0xc8] sm:$0xf]  ;;  %v3385_v21 = vld [vmem:[#allocation3 + $0xd4] sm:$0xf0] }
 0x53b   :  { %1397 = vmatpush.bf16.msrb.mxu2 %v2826_v54  ;;  %v2806_v9 = vor.u32 %v3382_v8, %v2803_v19  ;;  %v3383_v33 = vld [vmem:[#allocation3 + $0xcc] sm:$0xf]  ;;  %1410 = vmatpush.bf16.msrb.mxu3 %v2830_v55  ;;  %v2810_v11 = vor.u32 %v3385_v21, %v2809_v4  ;;  %v2811_v23 = vld [vmem:[#allocation3 + $0xd8] sm:$0xf0]  ;;  %v2785_v28 = vld [vmem:[#allocation3 + $0xa0] sm:$0xf] }
 0x53c   :  { %v3380_v29 = vld [vmem:[#allocation3 + $0xac] sm:$0xf0]  ;;  %v2814_v30 = vor.u32 %v3383_v33, %v2811_v23  ;;  %v3378_v34 = vld [vmem:[#allocation3 + $0xa4] sm:$0xf]  ;;  %v2787_v38 = vld [vmem:[#allocation3 + $0xb0] sm:$0xf0] }
 0x53d   :  { %v2793_v39 = vld [vmem:[#allocation3 + $0xa8] sm:$0xf]  ;;  %1372 = vmatpush.bf16.msrb.mxu0 %v2802_v32  ;;  %v2786_v43 = vor.u32 %v3380_v29, %v2785_v28  ;;  %v3381_v49 = vld [vmem:[#allocation3 + $0xb4] sm:$0xf0]  ;;  %v3379_v52 = vld [vmem:[#allocation3 + $0xac] sm:$0xf]  ;;  %v2790_v57 = vor.u32 %v3378_v34, %v2787_v38 }
 0x53e   :  { %v2795_v53 = vld [vmem:[#allocation3 + $0xb8] sm:$0xf0]  ;;  %1385 = vmatpush.bf16.msrb.mxu1 %v2806_v9  ;;  %v2794_v63 = vor.u32 %v3381_v49, %v2793_v39  ;;  %v2769_v0 = vld [vmem:[#allocation3 + $0x80] sm:$0xf]  ;;  %v3376_v1 = vld [vmem:[#allocation3 + $0x8c] sm:$0xf0] }
 0x53f   :  { %1398 = vmatpush.bf16.msrb.mxu2 %v2810_v11  ;;  %v3374_v5 = vld [vmem:[#allocation3 + $0x84] sm:$0xf]  ;;  %1411 = vmatpush.bf16.msrb.mxu3 %v2814_v30  ;;  %v2798_v12 = vor.u32 %v3379_v52, %v2795_v53  ;;  %v2771_v13 = vld [vmem:[#allocation3 + $0x90] sm:$0xf0]  ;;  %v2777_v14 = vld [vmem:[#allocation3 + $0x88] sm:$0xf]  ;;  %v2770_v26 = vor.u32 %v3376_v1, %v2769_v0 }
 0x540   :  { %v3377_v18 = vld [vmem:[#allocation3 + $0x94] sm:$0xf0]  ;;  %v3375_v24 = vld [vmem:[#allocation3 + $0x8c] sm:$0xf]  ;;  %v2779_v25 = vld [vmem:[#allocation3 + $0x98] sm:$0xf0]  ;;  %v2774_v31 = vor.u32 %v3374_v5, %v2771_v13 }
 0x541   :  { %1373 = vmatpush.bf16.msrb.mxu0 %v2786_v43  ;;  %v2778_v35 = vor.u32 %v3377_v18, %v2777_v14  ;;  %v2753_v41 = vld [vmem:[#allocation3 + $0x60] sm:$0xf]  ;;  %v3372_v42 = vld [vmem:[#allocation3 + $0x6c] sm:$0xf0]  ;;  %v3370_v47 = vld [vmem:[#allocation3 + $0x64] sm:$0xf]  ;;  %v2782_v10 = vor.u32 %v3375_v24, %v2779_v25 }
 0x542   :  { %1386 = vmatpush.bf16.msrb.mxu1 %v2790_v57  ;;  %v2755_v56 = vld [vmem:[#allocation3 + $0x70] sm:$0xf0]  ;;  %v2761_v58 = vld [vmem:[#allocation3 + $0x68] sm:$0xf]  ;;  %v3373_v59 = vld [vmem:[#allocation3 + $0x74] sm:$0xf0]  ;;  %v2754_v6 = vor.u32 %v3372_v42, %v2753_v41  ;;  %v1168_v57 = vpack.c.bf16 %v4307_v46, %v4307_v46 }
 0x543   :  { %1399 = vmatpush.bf16.msrb.mxu2 %v2794_v63  ;;  %1412 = vmatpush.bf16.msrb.mxu3 %v2798_v12  ;;  %v3371_v60 = vld [vmem:[#allocation3 + $0x6c] sm:$0xf]  ;;  %v2763_v2 = vld [vmem:[#allocation3 + $0x78] sm:$0xf0]  ;;  %v2758_v7 = vor.u32 %v3370_v47, %v2755_v56  ;;  %v2762_v3 = vor.u32 %v3373_v59, %v2761_v58  ;;  %v2737_v15 = vld [vmem:[#allocation3 + $0x40] sm:$0xf] }
 0x544   :  { %v3368_v17 = vld [vmem:[#allocation3 + $0x4c] sm:$0xf0]  ;;  %v3366_v48 = vld [vmem:[#allocation3 + $0x44] sm:$0xf]  ;;  %v2766_v20 = vor.u32 %v3371_v60, %v2763_v2  ;;  %v2739_v50 = vld [vmem:[#allocation3 + $0x50] sm:$0xf0] }
 0x545   :  { %1374 = vmatpush.bf16.msrb.mxu0 %v2770_v26  ;;  %v2745_v51 = vld [vmem:[#allocation3 + $0x48] sm:$0xf]  ;;  %v3369_v40 = vld [vmem:[#allocation3 + $0x54] sm:$0xf0]  ;;  %v3367_v37 = vld [vmem:[#allocation3 + $0x4c] sm:$0xf]  ;;  %v2738_v45 = vor.u32 %v3368_v17, %v2737_v15  ;;  %v2742_v27 = vor.u32 %v3366_v48, %v2739_v50 }
 0x546   :  { %1387 = vmatpush.bf16.msrb.mxu1 %v2774_v31  ;;  %v2747_v62 = vld [vmem:[#allocation3 + $0x58] sm:$0xf0]  ;;  %v2746_v36 = vor.u32 %v3369_v40, %v2745_v51  ;;  %v2721_v54 = vld [vmem:[#allocation3 + $0x20] sm:$0xf]  ;;  %v3364_v61 = vld [vmem:[#allocation3 + $0x2c] sm:$0xf0] }
 0x547   :  { %1400 = vmatpush.bf16.msrb.mxu2 %v2778_v35  ;;  %1413 = vmatpush.bf16.msrb.mxu3 %v2782_v10  ;;  %v3362_v44 = vld [vmem:[#allocation3 + $0x24] sm:$0xf]  ;;  %v2750_v16 = vor.u32 %v3367_v37, %v2747_v62  ;;  %v2723_v55 = vld [vmem:[#allocation3 + $0x30] sm:$0xf0]  ;;  %v2729_v22 = vld [vmem:[#allocation3 + $0x28] sm:$0xf]  ;;  %v2722_v9 = vor.u32 %v3364_v61, %v2721_v54 }
 0x548   :  { %v3365_v8 = vld [vmem:[#allocation3 + $0x34] sm:$0xf0]  ;;  %v3363_v19 = vld [vmem:[#allocation3 + $0x2c] sm:$0xf]  ;;  %v2731_v32 = vld [vmem:[#allocation3 + $0x38] sm:$0xf0]  ;;  %v2726_v4 = vor.u32 %v3362_v44, %v2723_v55 }
 0x549   :  { %1375 = vmatpush.bf16.msrb.mxu0 %v2754_v6  ;;  %v2730_v21 = vor.u32 %v3365_v8, %v2729_v22  ;;  %v2705_v33 = vld [vmem:[#allocation3] sm:$0xf]  ;;  %v3360_v11 = vld [vmem:[#allocation3 + $0xc] sm:$0xf0]  ;;  %v3358_v23 = vld [vmem:[#allocation3 + $0x4] sm:$0xf]  ;;  %v2734_v28 = vor.u32 %v3363_v19, %v2731_v32 }
 0x54a   :  { %1388 = vmatpush.bf16.msrb.mxu1 %v2758_v7  ;;  %v2707_v29 = vld [vmem:[#allocation3 + $0x10] sm:$0xf0]  ;;  %v2713_v30 = vld [vmem:[#allocation3 + $0x8] sm:$0xf]  ;;  %v3361_v34 = vld [vmem:[#allocation3 + $0x14] sm:$0xf0]  ;;  %v2706_v43 = vor.u32 %v3360_v11, %v2705_v33 }
 0x54b   :  { %1401 = vmatpush.bf16.msrb.mxu2 %v2762_v3  ;;  %1414 = vmatpush.bf16.msrb.mxu3 %v2766_v20  ;;  %v3359_v38 = vld [vmem:[#allocation3 + $0xc] sm:$0xf]  ;;  %v2715_v39 = vld [vmem:[#allocation3 + $0x18] sm:$0xf0]  ;;  %v2710_v49 = vor.u32 %v3358_v23, %v2707_v29  ;;  %v2714_v52 = vor.u32 %v3361_v34, %v2713_v30  ;;  %v1201_v63 = vld [vmem:[%s4384_s5] sm:$0xf] }
 0x54c   :  { %v2718_v53 = vor.u32 %v3359_v38, %v2715_v39  ;;  %v1203_v0 = vperm.slane %v1201_v63, 0  ;;  %v1204_v1 = vperm.slane %v1201_v63, 1  ;;  %v1205_v24 = vperm.slane %v1201_v63, 2 }
 0x54d   :  { %1376 = vmatpush.bf16.msrb.mxu0 %v2738_v45  ;;  %v1206_v25 = vperm.slane %v1201_v63, 3 }
 0x54e   :  { %1389 = vmatpush.bf16.msrb.mxu1 %v2742_v27 }
 0x54f   :  { %1402 = vmatpush.bf16.msrb.mxu2 %v2746_v36  ;;  %1415 = vmatpush.bf16.msrb.mxu3 %v2750_v16 }
 0x551   :  { %1377 = vmatpush.bf16.msrb.mxu0 %v2722_v9 }
 0x552   :  { %1390 = vmatpush.bf16.msrb.mxu1 %v2726_v4 }
 0x553   :  { %1403 = vmatpush.bf16.msrb.mxu2 %v2730_v21  ;;  %1416 = vmatpush.bf16.msrb.mxu3 %v2734_v28 }
 0x555   :  { %1378 = vmatpush.bf16.msrb.mxu0 %v2706_v43 }
 0x556   :  { %1391 = vmatpush.bf16.msrb.mxu1 %v2710_v49 }
 0x557   :  { %1404 = vmatpush.bf16.msrb.mxu2 %v2714_v52  ;;  %1417 = vmatpush.bf16.msrb.mxu3 %v2718_v53 }
 0x558   :  { %1379 = vmatmul.bf16.vlgmr.msrb.gmra.mxu0 %v1168_v57 }
 0x559   :  { %1392 = vmatmul.bf16.vlgmr.msrb.gmra.mxu1 %v1168_v57 }
 0x55a   :  { %1405 = vmatmul.bf16.vlgmr.msrb.gmra.mxu2 %v1168_v57  ;;  %1418 = vmatmul.bf16.vlgmr.msrb.gmra.mxu3 %v1168_v57 }
 0x5d5   :  { %v1380_v5 = vpop.f32.mrf.mxu0 }
 0x5d6   :  { %v4314_v12 = vadd.f32 %v1380_v5, %v1203_v0  ;;  %v1393_v13 = vpop.f32.mrf.mxu1 }
 0x5d7   :  { %v4316_v14 = vadd.f32 %v1393_v13, %v1204_v1 }
 0x5d8   :  { %v1423_v46 = vmax.f32 %v4314_v12, 0.0 }
 0x5d9   :  { %v1424_v18 = vmax.f32 %v4316_v14, 0.0 }
 0x5dd   :  { %v1406_v26 = vpop.f32.mrf.mxu2  ;;  %v1419_v35 = vpop.f32.mrf.mxu3 }
 0x5de   :  { %v4320_v31 = vadd.f32 %v1406_v26, %v1205_v24  ;;  %v1382_v41 = vpop.f32.mrf.mxu0  ;;  %v4322_v42 = vadd.f32 %v1419_v35, %v1206_v25  ;;  %v1395_v47 = vpop.f32.mrf.mxu1 }
 0x5e0   :  { %v1425_v10 = vmax.f32 %v4320_v31, 0.0  ;;  %v1426_v56 = vmax.f32 %v4322_v42, 0.0 }
 0x5e5   :  { %v1408_v58 = vpop.f32.mrf.mxu2  ;;  %v1421_v59 = vpop.f32.mrf.mxu3 }
 0x5e6   :  { %3700 = dma.done.wait [#allocation6 + $0x1], 12288 }
 0x5e7   :  { %3701 = vsyncadd [#allocation6 + $0x1], 4294955008  ;;  %v2917_v60 = vld [vmem:[#allocation4 + $0xa8] sm:$0xf]  ;;  %v3412_v2 = vld [vmem:[#allocation4 + $0xb0] sm:$0xf0] }
 0x5e8   :  { %v3013_v6 = vld [vmem:[#allocation4 + $0x168] sm:$0xf]  ;;  %v2918_v7 = vor.u32 %v3412_v2, %v2917_v60  ;;  %v3436_v3 = vld [vmem:[#allocation4 + $0x170] sm:$0xf0]  ;;  %v2905_v40 = vld [vmem:[#allocation4 + $0x90] sm:$0xf] }
 0x5e9   :  { %v3109_v15 = vld [vmem:[#allocation4 + $0x228] sm:$0xf]  ;;  %v3460_v17 = vld [vmem:[#allocation4 + $0x230] sm:$0xf0]  ;;  %v3014_v48 = vor.u32 %v3436_v3, %v3013_v6  ;;  %v3409_v62 = vld [vmem:[#allocation4 + $0x98] sm:$0xf0] }
 0x5ea   :  { %v3110_v20 = vor.u32 %v3460_v17, %v3109_v15  ;;  %v3205_v50 = vld [vmem:[#allocation4 + $0x2e8] sm:$0xf]  ;;  %v3484_v51 = vld [vmem:[#allocation4 + $0x2f0] sm:$0xf0]  ;;  %2083 = vmatpush.bf16.msra.mxu0 %v2918_v7  ;;  %v3001_v45 = vld [vmem:[#allocation4 + $0x150] sm:$0xf]  ;;  %v2906_v36 = vor.u32 %v3409_v62, %v2905_v40 }
 0x5eb   :  { %v3206_v37 = vor.u32 %v3484_v51, %v3205_v50  ;;  %v3433_v27 = vld [vmem:[#allocation4 + $0x158] sm:$0xf0]  ;;  %2096 = vmatpush.bf16.msra.mxu1 %v3014_v48  ;;  %v3097_v61 = vld [vmem:[#allocation4 + $0x210] sm:$0xf]  ;;  %v2893_v8 = vld [vmem:[#allocation4 + $0x78] sm:$0xf] }
 0x5ec   :  { %2109 = vmatpush.bf16.msra.mxu2 %v3110_v20  ;;  %v3002_v54 = vor.u32 %v3433_v27, %v3001_v45  ;;  %v3457_v44 = vld [vmem:[#allocation4 + $0x218] sm:$0xf0]  ;;  %v3193_v16 = vld [vmem:[#allocation4 + $0x2d0] sm:$0xf]  ;;  %v3406_v19 = vld [vmem:[#allocation4 + $0x80] sm:$0xf0] }
 0x5ed   :  { %2122 = vmatpush.bf16.msra.mxu3 %v3206_v37  ;;  %v3098_v55 = vor.u32 %v3457_v44, %v3097_v61  ;;  %v3481_v22 = vld [vmem:[#allocation4 + $0x2d8] sm:$0xf0]  ;;  %v2989_v9 = vld [vmem:[#allocation4 + $0x138] sm:$0xf]  ;;  %v3430_v4 = vld [vmem:[#allocation4 + $0x140] sm:$0xf0]  ;;  %v2894_v33 = vor.u32 %v3406_v19, %v2893_v8 }
 0x5ee   :  { %v3194_v32 = vor.u32 %v3481_v22, %v3193_v16  ;;  %v3085_v21 = vld [vmem:[#allocation4 + $0x1f8] sm:$0xf]  ;;  %2084 = vmatpush.bf16.msra.mxu0 %v2906_v36  ;;  %v3454_v11 = vld [vmem:[#allocation4 + $0x200] sm:$0xf0]  ;;  %v2990_v29 = vor.u32 %v3430_v4, %v2989_v9  ;;  %v2881_v34 = vld [vmem:[#allocation4 + $0x60] sm:$0xf] }
 0x5ef   :  { %v3181_v23 = vld [vmem:[#allocation4 + $0x2b8] sm:$0xf]  ;;  %v3478_v28 = vld [vmem:[#allocation4 + $0x2c0] sm:$0xf0]  ;;  %2097 = vmatpush.bf16.msra.mxu1 %v3002_v54  ;;  %v3086_v30 = vor.u32 %v3454_v11, %v3085_v21  ;;  %v3403_v38 = vld [vmem:[#allocation4 + $0x68] sm:$0xf0] }
 0x5f0   :  { %2110 = vmatpush.bf16.msra.mxu2 %v3098_v55  ;;  %v2977_v39 = vld [vmem:[#allocation4 + $0x120] sm:$0xf]  ;;  %v3182_v43 = vor.u32 %v3478_v28, %v3181_v23  ;;  %v3427_v49 = vld [vmem:[#allocation4 + $0x128] sm:$0xf0]  ;;  %v2882_v0 = vor.u32 %v3403_v38, %v2881_v34  ;;  %v2869_v13 = vld [vmem:[#allocation4 + $0x48] sm:$0xf] }
 0x5f1   :  { %2123 = vmatpush.bf16.msra.mxu3 %v3194_v32  ;;  %v3073_v52 = vld [vmem:[#allocation4 + $0x1e0] sm:$0xf]  ;;  %v3451_v53 = vld [vmem:[#allocation4 + $0x1e8] sm:$0xf0]  ;;  %v2978_v1 = vor.u32 %v3427_v49, %v2977_v39  ;;  %v3400_v24 = vld [vmem:[#allocation4 + $0x50] sm:$0xf0] }
 0x5f2   :  { %v3169_v57 = vld [vmem:[#allocation4 + $0x2a0] sm:$0xf]  ;;  %v3475_v63 = vld [vmem:[#allocation4 + $0x2a8] sm:$0xf0]  ;;  %2085 = vmatpush.bf16.msra.mxu0 %v2894_v33  ;;  %v3074_v5 = vor.u32 %v3451_v53, %v3073_v52  ;;  %v2965_v25 = vld [vmem:[#allocation4 + $0x108] sm:$0xf]  ;;  %v2870_v60 = vor.u32 %v3400_v24, %v2869_v13 }
 0x5f3   :  { %2098 = vmatpush.bf16.msra.mxu1 %v2990_v29  ;;  %v3170_v26 = vor.u32 %v3475_v63, %v3169_v57  ;;  %v3424_v35 = vld [vmem:[#allocation4 + $0x110] sm:$0xf0]  ;;  %v3061_v41 = vld [vmem:[#allocation4 + $0x1c8] sm:$0xf]  ;;  %v2857_v7 = vld [vmem:[#allocation4 + $0x30] sm:$0xf] }
 0x5f4   :  { %2111 = vmatpush.bf16.msra.mxu2 %v3086_v30  ;;  %v3448_v47 = vld [vmem:[#allocation4 + $0x1d0] sm:$0xf0]  ;;  %v3157_v58 = vld [vmem:[#allocation4 + $0x288] sm:$0xf]  ;;  %v2966_v2 = vor.u32 %v3424_v35, %v2965_v25  ;;  %v3397_v3 = vld [vmem:[#allocation4 + $0x38] sm:$0xf0] }
 0x5f5   :  { %2124 = vmatpush.bf16.msra.mxu3 %v3182_v43  ;;  %v3472_v59 = vld [vmem:[#allocation4 + $0x290] sm:$0xf0]  ;;  %v3062_v6 = vor.u32 %v3448_v47, %v3061_v41  ;;  %v2953_v15 = vld [vmem:[#allocation4 + $0xf0] sm:$0xf]  ;;  %v3421_v48 = vld [vmem:[#allocation4 + $0xf8] sm:$0xf0]  ;;  %v2858_v37 = vor.u32 %v3397_v3, %v2857_v7 }
 0x5f6   :  { %2086 = vmatpush.bf16.msra.mxu0 %v2882_v0  ;;  %v3158_v17 = vor.u32 %v3472_v59, %v3157_v58  ;;  %v3049_v20 = vld [vmem:[#allocation4 + $0x1b0] sm:$0xf]  ;;  %v3445_v50 = vld [vmem:[#allocation4 + $0x1b8] sm:$0xf0]  ;;  %v2954_v62 = vor.u32 %v3421_v48, %v2953_v15  ;;  %v2845_v27 = vld [vmem:[#allocation4 + $0x18] sm:$0xf]  ;;  %v4334_v15 = vpack.c.bf16 %v1426_v56, %v1426_v56 }
 0x5f7   :  { %2099 = vmatpush.bf16.msra.mxu1 %v2978_v1  ;;  %v3145_v51 = vld [vmem:[#allocation4 + $0x270] sm:$0xf]  ;;  %v3469_v40 = vld [vmem:[#allocation4 + $0x278] sm:$0xf0]  ;;  %v3050_v45 = vor.u32 %v3445_v50, %v3049_v20  ;;  %v3394_v36 = vld [vmem:[#allocation4 + $0x20] sm:$0xf0] }
 0x5f8   :  { %2112 = vmatpush.bf16.msra.mxu2 %v3074_v5  ;;  %v2941_v54 = vld [vmem:[#allocation4 + $0xd8] sm:$0xf]  ;;  %v3146_v61 = vor.u32 %v3469_v40, %v3145_v51  ;;  %v3418_v44 = vld [vmem:[#allocation4 + $0xe0] sm:$0xf0]  ;;  %v2846_v19 = vor.u32 %v3394_v36, %v2845_v27  ;;  %v2833_v32 = vld [vmem:[#allocation4] sm:$0xf] }
 0x5f9   :  { %2125 = vmatpush.bf16.msra.mxu3 %v3170_v26  ;;  %v3037_v16 = vld [vmem:[#allocation4 + $0x198] sm:$0xf]  ;;  %v3442_v55 = vld [vmem:[#allocation4 + $0x1a0] sm:$0xf0]  ;;  %v3391_v9 = vld [vmem:[#allocation4 + $0x8] sm:$0xf0]  ;;  %v2942_v4 = vor.u32 %v3418_v44, %v2941_v54 }
 0x5fa   :  { %2087 = vmatpush.bf16.msra.mxu0 %v2870_v60  ;;  %v3133_v22 = vld [vmem:[#allocation4 + $0x258] sm:$0xf]  ;;  %v3466_v8 = vld [vmem:[#allocation4 + $0x260] sm:$0xf0]  ;;  %v3038_v21 = vor.u32 %v3442_v55, %v3037_v16  ;;  %v2929_v33 = vld [vmem:[#allocation4 + $0xc0] sm:$0xf]  ;;  %v2834_v49 = vor.u32 %v3391_v9, %v2833_v32 }
 0x5fb   :  { %2100 = vmatpush.bf16.msra.mxu1 %v2966_v2  ;;  %v3415_v11 = vld [vmem:[#allocation4 + $0xc8] sm:$0xf0]  ;;  %v3025_v23 = vld [vmem:[#allocation4 + $0x180] sm:$0xf]  ;;  %v3134_v28 = vor.u32 %v3466_v8, %v3133_v22  ;;  %v2919_v39 = vld [vmem:[#allocation4 + $0xb4] sm:$0xf0] }
 0x5fc   :  { %2113 = vmatpush.bf16.msra.mxu2 %v3062_v6  ;;  %v3439_v29 = vld [vmem:[#allocation4 + $0x188] sm:$0xf0]  ;;  %v3121_v30 = vld [vmem:[#allocation4 + $0x240] sm:$0xf]  ;;  %v3015_v52 = vld [vmem:[#allocation4 + $0x174] sm:$0xf0]  ;;  %v2930_v63 = vor.u32 %v3415_v11, %v2929_v33  ;;  %v4329_v6 = vpack.c.bf16 %v1425_v10, %v1425_v10  ;;  %v4344_v10 = vpack.c.bf16 %v1424_v18, %v1424_v18 }
 0x5fd   :  { %2126 = vmatpush.bf16.msra.mxu3 %v3158_v17  ;;  %v3463_v34 = vld [vmem:[#allocation4 + $0x248] sm:$0xf0]  ;;  %v3111_v57 = vld [vmem:[#allocation4 + $0x234] sm:$0xf0]  ;;  %v3026_v0 = vor.u32 %v3439_v29, %v3025_v23  ;;  %v3408_v35 = vld [vmem:[#allocation4 + $0x94] sm:$0xf]  ;;  %v4339_v17 = vpack.c.bf16 %v1423_v46, %v1423_v46 }
 0x5fe   :  { %2088 = vmatpush.bf16.msra.mxu0 %v2858_v37  ;;  %v3411_v38 = vld [vmem:[#allocation4 + $0xac] sm:$0xf]  ;;  %v3207_v5 = vld [vmem:[#allocation4 + $0x2f4] sm:$0xf0]  ;;  %v3122_v13 = vor.u32 %v3463_v34, %v3121_v30  ;;  %v2907_v41 = vld [vmem:[#allocation4 + $0x9c] sm:$0xf0] }
 0x5ff   :  { %2101 = vmatpush.bf16.msra.mxu1 %v2954_v62  ;;  %v3435_v43 = vld [vmem:[#allocation4 + $0x16c] sm:$0xf]  ;;  %v2922_v24 = vor.u32 %v3411_v38, %v2919_v39  ;;  %v3432_v47 = vld [vmem:[#allocation4 + $0x154] sm:$0xf]  ;;  %v3003_v59 = vld [vmem:[#allocation4 + $0x15c] sm:$0xf0]  ;;  %v2910_v31 = vor.u32 %v3408_v35, %v2907_v41 }
 0x600   :  { %2114 = vmatpush.bf16.msra.mxu2 %v3050_v45  ;;  %v3459_v53 = vld [vmem:[#allocation4 + $0x22c] sm:$0xf]  ;;  %v3018_v25 = vor.u32 %v3435_v43, %v3015_v52  ;;  %v3456_v60 = vld [vmem:[#allocation4 + $0x214] sm:$0xf]  ;;  %v3099_v2 = vld [vmem:[#allocation4 + $0x21c] sm:$0xf0]  ;;  %v3006_v48 = vor.u32 %v3432_v47, %v3003_v59 }
 0x601   :  { %2127 = vmatpush.bf16.msra.mxu3 %v3146_v61  ;;  %v3483_v1 = vld [vmem:[#allocation4 + $0x2ec] sm:$0xf]  ;;  %v3114_v26 = vor.u32 %v3459_v53, %v3111_v57  ;;  %v3480_v7 = vld [vmem:[#allocation4 + $0x2d4] sm:$0xf]  ;;  %v3195_v3 = vld [vmem:[#allocation4 + $0x2dc] sm:$0xf0]  ;;  %v3102_v42 = vor.u32 %v3456_v60, %v3099_v2 }
 0x602   :  { %2089 = vmatpush.bf16.msra.mxu0 %v2846_v19  ;;  %v3210_v58 = vor.u32 %v3483_v1, %v3207_v5  ;;  %v3405_v20 = vld [vmem:[#allocation4 + $0x7c] sm:$0xf]  ;;  %v2895_v56 = vld [vmem:[#allocation4 + $0x84] sm:$0xf0]  ;;  %v3198_v12 = vor.u32 %v3480_v7, %v3195_v3  ;;  %v3402_v27 = vld [vmem:[#allocation4 + $0x64] sm:$0xf] }
 0x603   :  { %2102 = vmatpush.bf16.msra.mxu1 %v2942_v4  ;;  %v3429_v50 = vld [vmem:[#allocation4 + $0x13c] sm:$0xf]  ;;  %v2991_v51 = vld [vmem:[#allocation4 + $0x144] sm:$0xf0]  ;;  %v2898_v14 = vor.u32 %v3405_v20, %v2895_v56  ;;  %v2883_v36 = vld [vmem:[#allocation4 + $0x6c] sm:$0xf0] }
 0x604   :  { %2115 = vmatpush.bf16.msra.mxu2 %v3038_v21  ;;  %v3453_v46 = vld [vmem:[#allocation4 + $0x1fc] sm:$0xf]  ;;  %v3087_v40 = vld [vmem:[#allocation4 + $0x204] sm:$0xf0]  ;;  %v2994_v18 = vor.u32 %v3429_v50, %v2991_v51  ;;  %v3426_v54 = vld [vmem:[#allocation4 + $0x124] sm:$0xf]  ;;  %v2886_v19 = vor.u32 %v3402_v27, %v2883_v36 }
 0x605   :  { %2128 = vmatpush.bf16.msra.mxu3 %v3134_v28  ;;  %v3477_v37 = vld [vmem:[#allocation4 + $0x2bc] sm:$0xf]  ;;  %v3183_v62 = vld [vmem:[#allocation4 + $0x2c4] sm:$0xf0]  ;;  %v3090_v45 = vor.u32 %v3453_v46, %v3087_v40  ;;  %v2979_v44 = vld [vmem:[#allocation4 + $0x12c] sm:$0xf0] }
 0x606   :  { %2090 = vmatpush.bf16.msra.mxu0 %v2834_v49  ;;  %v3186_v61 = vor.u32 %v3477_v37, %v3183_v62  ;;  %v3450_v16 = vld [vmem:[#allocation4 + $0x1e4] sm:$0xf]  ;;  %v3075_v55 = vld [vmem:[#allocation4 + $0x1ec] sm:$0xf0]  ;;  %v2982_v32 = vor.u32 %v3426_v54, %v2979_v44  ;;  %v3399_v4 = vld [vmem:[#allocation4 + $0x4c] sm:$0xf] }
 0x607   :  { %2103 = vmatpush.bf16.msra.mxu1 %v2930_v63  ;;  %v3474_v22 = vld [vmem:[#allocation4 + $0x2a4] sm:$0xf]  ;;  %v3171_v8 = vld [vmem:[#allocation4 + $0x2ac] sm:$0xf0]  ;;  %v3078_v9 = vor.u32 %v3450_v16, %v3075_v55  ;;  %v2871_v21 = vld [vmem:[#allocation4 + $0x54] sm:$0xf0] }
 0x608   :  { %2116 = vmatpush.bf16.msra.mxu2 %v3026_v0  ;;  %v3423_v33 = vld [vmem:[#allocation4 + $0x10c] sm:$0xf]  ;;  %v3174_v11 = vor.u32 %v3474_v22, %v3171_v8  ;;  %v2967_v23 = vld [vmem:[#allocation4 + $0x114] sm:$0xf0]  ;;  %v2874_v38 = vor.u32 %v3399_v4, %v2871_v21  ;;  %v3396_v49 = vld [vmem:[#allocation4 + $0x34] sm:$0xf] }
 0x609   :  { %2129 = vmatpush.bf16.msra.mxu3 %v3122_v13  ;;  %2091 = vmatmul.bf16.vlgmr.msra.gmra.mxu0 %v4339_v17  ;;  %v3447_v28 = vld [vmem:[#allocation4 + $0x1cc] sm:$0xf]  ;;  %v3063_v29 = vld [vmem:[#allocation4 + $0x1d4] sm:$0xf0]  ;;  %v2970_v39 = vor.u32 %v3423_v33, %v2967_v23  ;;  %v2859_v52 = vld [vmem:[#allocation4 + $0x3c] sm:$0xf0] }
 0x60a   :  { %2135 = vmatpush.bf16.msrb.mxu0 %v2922_v24  ;;  %2104 = vmatmul.bf16.vlgmr.msra.gmra.mxu1 %v4344_v10  ;;  %v3471_v30 = vld [vmem:[#allocation4 + $0x28c] sm:$0xf]  ;;  %v3159_v34 = vld [vmem:[#allocation4 + $0x294] sm:$0xf0]  ;;  %v3066_v43 = vor.u32 %v3447_v28, %v3063_v29  ;;  %v3420_v53 = vld [vmem:[#allocation4 + $0xf4] sm:$0xf]  ;;  %v2862_v24 = vor.u32 %v3396_v49, %v2859_v52 }
 0x60b   :  { %2148 = vmatpush.bf16.msrb.mxu1 %v3018_v25  ;;  %2117 = vmatmul.bf16.vlgmr.msra.gmra.mxu2 %v4329_v6  ;;  %v3162_v57 = vor.u32 %v3471_v30, %v3159_v34  ;;  %v2955_v63 = vld [vmem:[#allocation4 + $0xfc] sm:$0xf0]  ;;  %v3444_v0 = vld [vmem:[#allocation4 + $0x1b4] sm:$0xf]  ;;  %v3393_v35 = vld [vmem:[#allocation4 + $0x1c] sm:$0xf] }
 0x60c   :  { %2161 = vmatpush.bf16.msrb.mxu2 %v3114_v26  ;;  %2130 = vmatmul.bf16.vlgmr.msra.gmra.mxu3 %v4334_v15  ;;  %v3051_v1 = vld [vmem:[#allocation4 + $0x1bc] sm:$0xf0]  ;;  %v3468_v5 = vld [vmem:[#allocation4 + $0x274] sm:$0xf]  ;;  %v2958_v25 = vor.u32 %v3420_v53, %v2955_v63  ;;  %v2847_v41 = vld [vmem:[#allocation4 + $0x24] sm:$0xf0] }
 0x60d   :  { %2174 = vmatpush.bf16.msrb.mxu3 %v3210_v58  ;;  %v3147_v13 = vld [vmem:[#allocation4 + $0x27c] sm:$0xf0]  ;;  %v3054_v26 = vor.u32 %v3444_v0, %v3051_v1  ;;  %v3417_v47 = vld [vmem:[#allocation4 + $0xdc] sm:$0xf]  ;;  %v2943_v59 = vld [vmem:[#allocation4 + $0xe4] sm:$0xf0] }
 0x60e   :  { %2136 = vmatpush.bf16.msrb.mxu0 %v2910_v31  ;;  %v3150_v58 = vor.u32 %v3468_v5, %v3147_v13  ;;  %v3441_v60 = vld [vmem:[#allocation4 + $0x19c] sm:$0xf]  ;;  %v3039_v2 = vld [vmem:[#allocation4 + $0x1a4] sm:$0xf0]  ;;  %v2850_v31 = vor.u32 %v3393_v35, %v2847_v41  ;;  %v2946_v20 = vor.u32 %v3417_v47, %v2943_v59  ;;  %v3414_v50 = vld [vmem:[#allocation4 + $0xc4] sm:$0xf] }
 0x60f   :  { %2149 = vmatpush.bf16.msrb.mxu1 %v3006_v48  ;;  %v3465_v7 = vld [vmem:[#allocation4 + $0x25c] sm:$0xf]  ;;  %v3135_v3 = vld [vmem:[#allocation4 + $0x264] sm:$0xf0]  ;;  %v3390_v48 = vld [vmem:[#allocation4 + $0x4] sm:$0xf]  ;;  %v3042_v56 = vor.u32 %v3441_v60, %v3039_v2 }
 0x610   :  { %2162 = vmatpush.bf16.msrb.mxu2 %v3102_v42  ;;  %v2835_v42 = vld [vmem:[#allocation4 + $0xc] sm:$0xf0]  ;;  %v3438_v51 = vld [vmem:[#allocation4 + $0x184] sm:$0xf]  ;;  %v3138_v46 = vor.u32 %v3465_v7, %v3135_v3  ;;  %v3437_v36 = vld [vmem:[#allocation4 + $0x178] sm:$0xf0] }
 0x611   :  { %2175 = vmatpush.bf16.msrb.mxu3 %v3198_v12  ;;  %v2931_v12 = vld [vmem:[#allocation4 + $0xcc] sm:$0xf0]  ;;  %v3462_v37 = vld [vmem:[#allocation4 + $0x244] sm:$0xf]  ;;  %v2838_v27 = vor.u32 %v3390_v48, %v2835_v42  ;;  %v3485_v22 = vld [vmem:[#allocation4 + $0x2f8] sm:$0xf0] }
 0x612   :  { %2137 = vmatpush.bf16.msrb.mxu0 %v2898_v14  ;;  %v3027_v40 = vld [vmem:[#allocation4 + $0x18c] sm:$0xf0]  ;;  %v2934_v44 = vor.u32 %v3414_v50, %v2931_v12  ;;  %v2913_v4 = vld [vmem:[#allocation4 + $0x98] sm:$0xf]  ;;  %v3410_v21 = vld [vmem:[#allocation4 + $0xa0] sm:$0xf0] }
 0x613   :  { %2150 = vmatpush.bf16.msrb.mxu1 %v2994_v18  ;;  %v3123_v62 = vld [vmem:[#allocation4 + $0x24c] sm:$0xf0]  ;;  %v3413_v18 = vld [vmem:[#allocation4 + $0xb8] sm:$0xf0]  ;;  %v3030_v16 = vor.u32 %v3438_v51, %v3027_v40  ;;  %v3009_v33 = vld [vmem:[#allocation4 + $0x158] sm:$0xf] }
 0x614   :  { %2163 = vmatpush.bf16.msrb.mxu2 %v3090_v45  ;;  %v2925_v14 = vld [vmem:[#allocation4 + $0xb0] sm:$0xf]  ;;  %v3126_v8 = vor.u32 %v3462_v37, %v3123_v62  ;;  %v3434_v23 = vld [vmem:[#allocation4 + $0x160] sm:$0xf0]  ;;  %v3105_v28 = vld [vmem:[#allocation4 + $0x218] sm:$0xf] }
 0x615   :  { %2176 = vmatpush.bf16.msrb.mxu3 %v3186_v61  ;;  %v3021_v45 = vld [vmem:[#allocation4 + $0x170] sm:$0xf]  ;;  %v3461_v61 = vld [vmem:[#allocation4 + $0x238] sm:$0xf0]  ;;  %v3458_v29 = vld [vmem:[#allocation4 + $0x220] sm:$0xf0] }
 0x616   :  { %2138 = vmatpush.bf16.msrb.mxu0 %v2886_v19  ;;  %v3117_v54 = vld [vmem:[#allocation4 + $0x230] sm:$0xf]  ;;  %v2926_v19 = vor.u32 %v3413_v18, %v2925_v14  ;;  %v3201_v30 = vld [vmem:[#allocation4 + $0x2d8] sm:$0xf]  ;;  %v3482_v34 = vld [vmem:[#allocation4 + $0x2e0] sm:$0xf0] }
 0x617   :  { %2151 = vmatpush.bf16.msrb.mxu1 %v2982_v32  ;;  %v3213_v55 = vld [vmem:[#allocation4 + $0x2f0] sm:$0xf]  ;;  %v3022_v32 = vor.u32 %v3437_v36, %v3021_v45  ;;  %v2901_v49 = vld [vmem:[#allocation4 + $0x80] sm:$0xf]  ;;  %v3407_v52 = vld [vmem:[#allocation4 + $0x88] sm:$0xf0] }
 0x618   :  { %2164 = vmatpush.bf16.msrb.mxu2 %v3078_v9  ;;  %v3118_v9 = vor.u32 %v3461_v61, %v3117_v54  ;;  %v2997_v53 = vld [vmem:[#allocation4 + $0x140] sm:$0xf]  ;;  %v3431_v63 = vld [vmem:[#allocation4 + $0x148] sm:$0xf0]  ;;  %v2889_v35 = vld [vmem:[#allocation4 + $0x68] sm:$0xf] }
 0x619   :  { %2177 = vmatpush.bf16.msrb.mxu3 %v3174_v11  ;;  %v3214_v11 = vor.u32 %v3485_v22, %v3213_v55  ;;  %v3093_v0 = vld [vmem:[#allocation4 + $0x200] sm:$0xf]  ;;  %v3455_v1 = vld [vmem:[#allocation4 + $0x208] sm:$0xf0]  ;;  %v3404_v41 = vld [vmem:[#allocation4 + $0x70] sm:$0xf0] }
 0x61a   :  { %2139 = vmatpush.bf16.msrb.mxu0 %v2874_v38  ;;  %v2914_v38 = vor.u32 %v3410_v21, %v2913_v4  ;;  %v3189_v5 = vld [vmem:[#allocation4 + $0x2c0] sm:$0xf]  ;;  %v3479_v13 = vld [vmem:[#allocation4 + $0x2c8] sm:$0xf0]  ;;  %v2985_v47 = vld [vmem:[#allocation4 + $0x128] sm:$0xf] }
 0x61b   :  { %2152 = vmatpush.bf16.msrb.mxu1 %v2970_v39  ;;  %v3010_v39 = vor.u32 %v3434_v23, %v3009_v33  ;;  %v3428_v59 = vld [vmem:[#allocation4 + $0x130] sm:$0xf0]  ;;  %v3081_v60 = vld [vmem:[#allocation4 + $0x1e8] sm:$0xf]  ;;  %v2973_v50 = vld [vmem:[#allocation4 + $0x110] sm:$0xf] }
 0x61c   :  { %2165 = vmatpush.bf16.msrb.mxu2 %v3066_v43  ;;  %v3106_v43 = vor.u32 %v3458_v29, %v3105_v28  ;;  %v3452_v2 = vld [vmem:[#allocation4 + $0x1f0] sm:$0xf0]  ;;  %v3177_v7 = vld [vmem:[#allocation4 + $0x2a8] sm:$0xf]  ;;  %v2986_v48 = vor.u32 %v3428_v59, %v2985_v47  ;;  %v3425_v51 = vld [vmem:[#allocation4 + $0x118] sm:$0xf0] }
 0x61d   :  { %2178 = vmatpush.bf16.msrb.mxu3 %v3162_v57  ;;  %v3202_v57 = vor.u32 %v3482_v34, %v3201_v30  ;;  %v3476_v3 = vld [vmem:[#allocation4 + $0x2b0] sm:$0xf0]  ;;  %v3082_v42 = vor.u32 %v3452_v2, %v3081_v60  ;;  %v3449_v40 = vld [vmem:[#allocation4 + $0x1d8] sm:$0xf0]  ;;  %v3165_v37 = vld [vmem:[#allocation4 + $0x290] sm:$0xf]  ;;  %v2974_v18 = vor.u32 %v3425_v51, %v2973_v50 }
 0x61e   :  { %2140 = vmatpush.bf16.msrb.mxu0 %v2862_v24  ;;  %v2902_v24 = vor.u32 %v3407_v52, %v2901_v49  ;;  %v3178_v12 = vor.u32 %v3476_v3, %v3177_v7  ;;  %v3473_v62 = vld [vmem:[#allocation4 + $0x298] sm:$0xf0]  ;;  %v3398_v36 = vld [vmem:[#allocation4 + $0x40] sm:$0xf0]  ;;  %v2961_v54 = vld [vmem:[#allocation4 + $0xf8] sm:$0xf] }
 0x61f   :  { %2153 = vmatpush.bf16.msrb.mxu1 %v2958_v25  ;;  %v2998_v25 = vor.u32 %v3431_v63, %v2997_v53  ;;  %v3166_v61 = vor.u32 %v3473_v62, %v3165_v37  ;;  %v3446_v55 = vld [vmem:[#allocation4 + $0x1c0] sm:$0xf0]  ;;  %v3153_v22 = vld [vmem:[#allocation4 + $0x278] sm:$0xf]  ;;  %v2853_v4 = vld [vmem:[#allocation4 + $0x20] sm:$0xf] }
 0x620   :  { %2166 = vmatpush.bf16.msrb.mxu2 %v3054_v26  ;;  %v3094_v26 = vor.u32 %v3455_v1, %v3093_v0  ;;  %v3395_v21 = vld [vmem:[#allocation4 + $0x28] sm:$0xf0]  ;;  %v2949_v33 = vld [vmem:[#allocation4 + $0xe0] sm:$0xf]  ;;  %v2841_v49 = vld [vmem:[#allocation4 + $0x8] sm:$0xf] }
 0x621   :  { %2179 = vmatpush.bf16.msrb.mxu3 %v3150_v58  ;;  %v3190_v58 = vor.u32 %v3479_v13, %v3189_v5  ;;  %v3419_v23 = vld [vmem:[#allocation4 + $0xe8] sm:$0xf0]  ;;  %v3045_v28 = vld [vmem:[#allocation4 + $0x1a0] sm:$0xf]  ;;  %v3392_v52 = vld [vmem:[#allocation4 + $0x10] sm:$0xf0] }
 0x622   :  { %2141 = vmatpush.bf16.msrb.mxu0 %v2850_v31  ;;  %v2890_v31 = vor.u32 %v3404_v41, %v2889_v35  ;;  %v3443_v29 = vld [vmem:[#allocation4 + $0x1a8] sm:$0xf0]  ;;  %v3141_v30 = vld [vmem:[#allocation4 + $0x260] sm:$0xf]  ;;  %v2937_v53 = vld [vmem:[#allocation4 + $0xc8] sm:$0xf] }
 0x623   :  { %2154 = vmatpush.bf16.msrb.mxu1 %v2946_v20  ;;  %v2877_v20 = vld [vmem:[#allocation4 + $0x50] sm:$0xf]  ;;  %v3467_v34 = vld [vmem:[#allocation4 + $0x268] sm:$0xf0]  ;;  %v3416_v63 = vld [vmem:[#allocation4 + $0xd0] sm:$0xf0] }
 0x624   :  { %2167 = vmatpush.bf16.msrb.mxu2 %v3042_v56  ;;  %v3401_v56 = vld [vmem:[#allocation4 + $0x58] sm:$0xf0]  ;;  %v3033_v0 = vld [vmem:[#allocation4 + $0x188] sm:$0xf]  ;;  %v3440_v1 = vld [vmem:[#allocation4 + $0x190] sm:$0xf0] }
 0x625   :  { %2180 = vmatpush.bf16.msrb.mxu3 %v3138_v46  ;;  %v3069_v46 = vld [vmem:[#allocation4 + $0x1d0] sm:$0xf]  ;;  %v2878_v14 = vor.u32 %v3401_v56, %v2877_v20  ;;  %v3129_v5 = vld [vmem:[#allocation4 + $0x248] sm:$0xf]  ;;  %v3464_v13 = vld [vmem:[#allocation4 + $0x250] sm:$0xf0] }
 0x626   :  { %2142 = vmatpush.bf16.msrb.mxu0 %v2838_v27  ;;  %v3070_v45 = vor.u32 %v3449_v40, %v3069_v46  ;;  %v2865_v27 = vld [vmem:[#allocation4 + $0x38] sm:$0xf]  ;;  %v3130_v35 = vor.u32 %v3464_v13, %v3129_v5  ;;  %v1563_v41 = vld [vmem:[%s4386_s7] sm:$0x7] }
 0x627   :  { %2155 = vmatpush.bf16.msrb.mxu1 %v2934_v44  ;;  %v3422_v44 = vld [vmem:[#allocation4 + $0x100] sm:$0xf0]  ;;  %v1565_v47 = vperm.slane %v1563_v41, 0  ;;  %v1566_v20 = vperm.slane %v1563_v41, 1 }
 0x628   :  { %2168 = vmatpush.bf16.msrb.mxu2 %v3030_v16  ;;  %v3057_v16 = vld [vmem:[#allocation4 + $0x1b8] sm:$0xf] }
 0x629   :  { %2181 = vmatpush.bf16.msrb.mxu3 %v3126_v8  ;;  %2143 = vmatmul.bf16.vlgmr.msrb.gmra.mxu0 %v4339_v17  ;;  %v3470_v8 = vld [vmem:[#allocation4 + $0x280] sm:$0xf0] }
 0x62a   :  { %2187 = vmatpush.bf16.msra.mxu0 %v2926_v19  ;;  %2156 = vmatmul.bf16.vlgmr.msrb.gmra.mxu1 %v4344_v10  ;;  %v2866_v19 = vor.u32 %v3398_v36, %v2865_v27 }
 0x62b   :  { %2200 = vmatpush.bf16.msra.mxu1 %v3022_v32  ;;  %2169 = vmatmul.bf16.vlgmr.msrb.gmra.mxu2 %v4329_v6  ;;  %v2962_v32 = vor.u32 %v3422_v44, %v2961_v54  ;;  %v1567_v54 = vperm.slane %v1563_v41, 2 }
 0x62c   :  { %2213 = vmatpush.bf16.msra.mxu2 %v3118_v9  ;;  %2182 = vmatmul.bf16.vlgmr.msrb.gmra.mxu3 %v4334_v15  ;;  %v3058_v9 = vor.u32 %v3446_v55, %v3057_v16 }
 0x62d   :  { %2226 = vmatpush.bf16.msra.mxu3 %v3214_v11  ;;  %v3154_v11 = vor.u32 %v3470_v8, %v3153_v22 }
 0x62e   :  { %2188 = vmatpush.bf16.msra.mxu0 %v2914_v38  ;;  %v2854_v38 = vor.u32 %v3395_v21, %v2853_v4 }
 0x62f   :  { %2201 = vmatpush.bf16.msra.mxu1 %v3010_v39  ;;  %v2950_v39 = vor.u32 %v3419_v23, %v2949_v33 }
 0x630   :  { %2214 = vmatpush.bf16.msra.mxu2 %v3106_v43  ;;  %v3046_v43 = vor.u32 %v3443_v29, %v3045_v28 }
 0x631   :  { %2227 = vmatpush.bf16.msra.mxu3 %v3202_v57  ;;  %v3142_v57 = vor.u32 %v3467_v34, %v3141_v30 }
 0x632   :  { %2189 = vmatpush.bf16.msra.mxu0 %v2902_v24  ;;  %v2842_v24 = vor.u32 %v3392_v52, %v2841_v49 }
 0x633   :  { %2202 = vmatpush.bf16.msra.mxu1 %v2998_v25  ;;  %v2938_v25 = vor.u32 %v3416_v63, %v2937_v53 }
 0x634   :  { %2215 = vmatpush.bf16.msra.mxu2 %v3094_v26  ;;  %v3034_v26 = vor.u32 %v3440_v1, %v3033_v0 }
 0x635   :  { %2228 = vmatpush.bf16.msra.mxu3 %v3190_v58 }
 0x636   :  { %2190 = vmatpush.bf16.msra.mxu0 %v2890_v31 }
 0x637   :  { %2203 = vmatpush.bf16.msra.mxu1 %v2986_v48 }
 0x638   :  { %2216 = vmatpush.bf16.msra.mxu2 %v3082_v42 }
 0x639   :  { %2229 = vmatpush.bf16.msra.mxu3 %v3178_v12 }
 0x63a   :  { %2191 = vmatpush.bf16.msra.mxu0 %v2878_v14 }
 0x63b   :  { %2204 = vmatpush.bf16.msra.mxu1 %v2974_v18 }
 0x63c   :  { %2217 = vmatpush.bf16.msra.mxu2 %v3070_v45 }
 0x63d   :  { %2230 = vmatpush.bf16.msra.mxu3 %v3166_v61 }
 0x63e   :  { %2192 = vmatpush.bf16.msra.mxu0 %v2866_v19 }
 0x63f   :  { %2205 = vmatpush.bf16.msra.mxu1 %v2962_v32 }
 0x640   :  { %2218 = vmatpush.bf16.msra.mxu2 %v3058_v9 }
 0x641   :  { %2231 = vmatpush.bf16.msra.mxu3 %v3154_v11 }
 0x642   :  { %2193 = vmatpush.bf16.msra.mxu0 %v2854_v38 }
 0x643   :  { %2206 = vmatpush.bf16.msra.mxu1 %v2950_v39 }
 0x644   :  { %2219 = vmatpush.bf16.msra.mxu2 %v3046_v43 }
 0x645   :  { %2232 = vmatpush.bf16.msra.mxu3 %v3142_v57 }
 0x646   :  { %2194 = vmatpush.bf16.msra.mxu0 %v2842_v24 }
 0x647   :  { %2207 = vmatpush.bf16.msra.mxu1 %v2938_v25 }
 0x648   :  { %2220 = vmatpush.bf16.msra.mxu2 %v3034_v26 }
 0x649   :  { %2233 = vmatpush.bf16.msra.mxu3 %v3130_v35  ;;  %2195 = vmatmul.bf16.vlgmr.msra.gmra.mxu0 %v4339_v17 }
 0x64a   :  { %2208 = vmatmul.bf16.vlgmr.msra.gmra.mxu1 %v4344_v10 }
 0x64b   :  { %2221 = vmatmul.bf16.vlgmr.msra.gmra.mxu2 %v4329_v6 }
 0x64c   :  { %2234 = vmatmul.bf16.vlgmr.msra.gmra.mxu3 %v4334_v15 }
 0x686   :  { %v2092_v58 = vpop.f32.mrf.mxu0 }
 0x687   :  { %v2093_v59 = vadd.f32 %v2092_v58, %v1565_v47  ;;  %v2105_v60 = vpop.f32.mrf.mxu1 }
 0x689   :  { %v2106_v2 = vadd.f32 %v2105_v60, %v2093_v59 }
 0x68e   :  { %v2118_v7 = vpop.f32.mrf.mxu2  ;;  %v2094_v17 = vpop.f32.mrf.mxu0 }
 0x68f   :  { %v2119_v3 = vadd.f32 %v2118_v7, %v2106_v2  ;;  %v2131_v31 = vpop.f32.mrf.mxu3  ;;  %v2107_v10 = vpop.f32.mrf.mxu1 }
 0x691   :  { %v4361_v48 = vadd.f32 %v2131_v31, %v2119_v3 }
 0x693   :  { %v2239_v6 = vmax.f32 %v4361_v48, 0.0 }
 0x696   :  { %v2120_v42 = vpop.f32.mrf.mxu2 }
 0x697   :  { %v2133_v15 = vpop.f32.mrf.mxu3 }
 0x6a6   :  { %v2144_v56 = vpop.f32.mrf.mxu0 }
 0x6a7   :  { %v2145_v50 = vadd.f32 %v2144_v56, %v1566_v20  ;;  %v2157_v12 = vpop.f32.mrf.mxu1 }
 0x6a9   :  { %v2158_v51 = vadd.f32 %v2157_v12, %v2145_v50 }
 0x6ae   :  { %v2170_v46 = vpop.f32.mrf.mxu2  ;;  %v2146_v14 = vpop.f32.mrf.mxu0 }
 0x6af   :  { %v2171_v40 = vadd.f32 %v2170_v46, %v2158_v51  ;;  %v2183_v37 = vpop.f32.mrf.mxu3  ;;  %v2159_v18 = vpop.f32.mrf.mxu1 }
 0x6b1   :  { %v4364_v62 = vadd.f32 %v2183_v37, %v2171_v40 }
 0x6b3   :  { %v2240_v45 = vmax.f32 %v4364_v62, 0.0 }
 0x6b6   :  { %v2172_v27 = vpop.f32.mrf.mxu2 }
 0x6b7   :  { %v2185_v36 = vpop.f32.mrf.mxu3 }
 0x6c6   :  { %v2196_v61 = vpop.f32.mrf.mxu0 }
 0x6c7   :  { %v2197_v44 = vadd.f32 %v2196_v61, %v1567_v54  ;;  %v2209_v16 = vpop.f32.mrf.mxu1 }
 0x6c9   :  { %v2210_v55 = vadd.f32 %v2209_v16, %v2197_v44 }
 0x6ce   :  { %v2222_v22 = vpop.f32.mrf.mxu2  ;;  %v2198_v32 = vpop.f32.mrf.mxu0 }
 0x6cf   :  { %v2223_v8 = vadd.f32 %v2222_v22, %v2210_v55  ;;  %v2235_v19 = vpop.f32.mrf.mxu3  ;;  %v2211_v9 = vpop.f32.mrf.mxu1 }
 0x6d1   :  { %v2236_v4 = vadd.f32 %v2235_v19, %v2223_v8 }
 0x6d3   :  { %v2241_v21 = vmax.f32 %v2236_v4, 0.0 }
 0x6d6   :  { %v2224_v33 = vpop.f32.mrf.mxu2 }
 0x6d7   :  { %v2237_v11 = vpop.f32.mrf.mxu3 }
 0x6d8   :  { %3702 = dma.done.wait [#allocation6 + $0x2], 3072 }
 0x6d9   :  { %3703 = vsyncadd [#allocation6 + $0x2], 4294964224  ;;  %v3493_v23 = vld [vmem:[#allocation5 + $0x38] sm:$0xff]  ;;  %v3492_v30 = vld [vmem:[#allocation5 + $0x30] sm:$0xff]  ;;  %v2246_v59 = vpack.c.bf16 %v2239_v6, %v2239_v6  ;;  %v2247_v60 = vpack.c.bf16 %v2240_v45, %v2240_v45  ;;  %v2248_v2 = vpack.c.bf16 %v2241_v21, %v2241_v21 }
 0x6da   :  { %v3501_v28 = vld [vmem:[#allocation5 + $0x78] sm:$0xff]  ;;  %2445 = vmatpush.bf16.msrb.mxu0 %v3493_v23  ;;  %v3500_v34 = vld [vmem:[#allocation5 + $0x70] sm:$0xff]  ;;  %v3491_v39 = vld [vmem:[#allocation5 + $0x28] sm:$0xff] }
 0x6db   :  { %v3509_v29 = vld [vmem:[#allocation5 + $0xb8] sm:$0xff]  ;;  %2458 = vmatpush.bf16.msrb.mxu1 %v3501_v28  ;;  %v3508_v38 = vld [vmem:[#allocation5 + $0xb0] sm:$0xff]  ;;  %v3499_v43 = vld [vmem:[#allocation5 + $0x68] sm:$0xff] }
 0x6dc   :  { %2471 = vmatpush.bf16.msrb.mxu2 %v3509_v29  ;;  %v3507_v49 = vld [vmem:[#allocation5 + $0xa8] sm:$0xff]  ;;  %v3490_v52 = vld [vmem:[#allocation5 + $0x20] sm:$0xff]  ;;  %v3489_v63 = vld [vmem:[#allocation5 + $0x18] sm:$0xff] }
 0x6dd   :  { %v3498_v53 = vld [vmem:[#allocation5 + $0x60] sm:$0xff]  ;;  %v3497_v0 = vld [vmem:[#allocation5 + $0x58] sm:$0xff]  ;;  %v3488_v5 = vld [vmem:[#allocation5 + $0x10] sm:$0xff] }
 0x6de   :  { %2446 = vmatpush.bf16.msrb.mxu0 %v3492_v30  ;;  %v3506_v57 = vld [vmem:[#allocation5 + $0xa0] sm:$0xff]  ;;  %v3505_v1 = vld [vmem:[#allocation5 + $0x98] sm:$0xff]  ;;  %v3496_v13 = vld [vmem:[#allocation5 + $0x50] sm:$0xff] }
 0x6df   :  { %2459 = vmatpush.bf16.msrb.mxu1 %v3500_v34  ;;  %v3504_v24 = vld [vmem:[#allocation5 + $0x90] sm:$0xff]  ;;  %v3487_v25 = vld [vmem:[#allocation5 + $0x8] sm:$0xff]  ;;  %v3486_v41 = vld [vmem:[#allocation5] sm:$0xff] }
 0x6e0   :  { %2472 = vmatpush.bf16.msrb.mxu2 %v3508_v38  ;;  %v3495_v26 = vld [vmem:[#allocation5 + $0x48] sm:$0xff]  ;;  %v3494_v47 = vld [vmem:[#allocation5 + $0x40] sm:$0xff] }
 0x6e1   :  { %v3503_v35 = vld [vmem:[#allocation5 + $0x88] sm:$0xff]  ;;  %v3502_v58 = vld [vmem:[#allocation5 + $0x80] sm:$0xff] }
 0x6e2   :  { %2447 = vmatpush.bf16.msrb.mxu0 %v3491_v39  ;;  %v3597_v7 = vld [vmem:[%s4388_s9] ss:$0 sm:$0xff] }
 0x6e3   :  { %2460 = vmatpush.bf16.msrb.mxu1 %v3499_v43 }
 0x6e4   :  { %2473 = vmatpush.bf16.msrb.mxu2 %v3507_v49 }
 0x6e6   :  { %2448 = vmatpush.bf16.msrb.mxu0 %v3490_v52 }
 0x6e7   :  { %2461 = vmatpush.bf16.msrb.mxu1 %v3498_v53 }
 0x6e8   :  { %2474 = vmatpush.bf16.msrb.mxu2 %v3506_v57 }
 0x6ea   :  { %2449 = vmatpush.bf16.msrb.mxu0 %v3489_v63 }
 0x6eb   :  { %2462 = vmatpush.bf16.msrb.mxu1 %v3497_v0 }
 0x6ec   :  { %2475 = vmatpush.bf16.msrb.mxu2 %v3505_v1 }
 0x6ee   :  { %2450 = vmatpush.bf16.msrb.mxu0 %v3488_v5 }
 0x6ef   :  { %2463 = vmatpush.bf16.msrb.mxu1 %v3496_v13 }
 0x6f0   :  { %2476 = vmatpush.bf16.msrb.mxu2 %v3504_v24 }
 0x6f2   :  { %2451 = vmatpush.bf16.msrb.mxu0 %v3487_v25 }
 0x6f3   :  { %2464 = vmatpush.bf16.msrb.mxu1 %v3495_v26 }
 0x6f4   :  { %2477 = vmatpush.bf16.msrb.mxu2 %v3503_v35 }
 0x6f6   :  { %2452 = vmatpush.bf16.msrb.mxu0 %v3486_v41 }
 0x6f7   :  { %2465 = vmatpush.bf16.msrb.mxu1 %v3494_v47 }
 0x6f8   :  { %2478 = vmatpush.bf16.msrb.mxu2 %v3502_v58 }
 0x6f9   :  { %2453 = vmatmul.bf16.vlgmr.msrb.gmra.mxu0 %v2246_v59 }
 0x6fa   :  { %2466 = vmatmul.bf16.vlgmr.msrb.gmra.mxu1 %v2247_v60 }
 0x6fb   :  { %2479 = vmatmul.bf16.vlgmr.msrb.gmra.mxu2 %v2248_v2 }
 0x776   :  { %v2454_v3 = vpop.f32.mrf.mxu0 }
 0x777   :  { %v2467_v31 = vpop.f32.mrf.mxu1  ;;  %v2455_v48 = vadd.f32 %v3597_v7, %v2454_v3 }
 0x779   :  { %v2468_v17 = vadd.f32 %v2467_v31, %v2455_v48 }
 0x77e   :  { %v2480_v10 = vpop.f32.mrf.mxu2  ;;  %v2456_v42 = vpop.f32.mrf.mxu0 }
 0x77f   :  { %v2481_v6 = vadd.f32 %v2480_v10, %v2468_v17  ;;  %v2469_v15 = vpop.f32.mrf.mxu1 }
 0x781   :  { %3598 = vtanh.f32 %v2481_v6 }
 0x786   :  { %v2482_v20 = vpop.f32.mrf.mxu2 }
 0x787   :  { %v3599_v56 = vpop.eup %3598 }
 0x788   :  { %2485 = vst [vmem:[%s4389_s10] sm:$0xff] %v3599_v56 }
 0x789   :  { %2490 = vsyncpa [#allocation8], 1 }
 0x78a   :  { %2491 = vsyncmov [#allocation6] }
 0x78d   :  { %s2492_s13 = vpop.sfrf %2491 }
 0x78e   :  { %p3311_p0 = scmp.ne.s32.totalorder %s2492_s13, 0 }
 0x790   :  { %2496 = shalt.err (%p3311_p0)  }
 0x791   :  { %2498 = vsyncmov [#allocation6 + $0x1] }
 0x794   :  { %s2499_s9 = vpop.sfrf %2498 }
 0x795   :  { %p3312_p1 = scmp.ne.s32.totalorder %s2499_s9, 0 }
 0x797   :  { %2503 = shalt.err (%p3312_p1)  }
 0x798   :  { %2505 = vsyncmov [#allocation6 + $0x2] }
 0x79b   :  { %s2506_s14 = vpop.sfrf %2505 }
 0x79c   :  { %p3313_p2 = scmp.ne.s32.totalorder %s2506_s14, 0 }
 0x79e   :  { %2510 = shalt.err (%p3313_p2)  }

</bundles_post_ra>
